<compile_context>
chip_gen: v5e
topology: v5e:2x2
jax: 0.10.0
libtpu: 0.0.40
codegen_flags: <defaults>
</compile_context>

<pallas_src>
import functools

import jax
import jax.numpy as jnp
from jax.experimental import pallas as pl
from jax.experimental.pallas import tpu as pltpu


def bottleneck_kernel(x_ref, w1_ref, s1_ref, b1_ref,
                      w2_ref, s2_ref, b2_ref,
                      w3_ref, s3_ref, b3_ref,
                      out_ref, col_ref, *, NB, H, W):
    HW = H * W
    width = w2_ref.shape[-1]
    Cout = out_ref.shape[-1]

    # ---- conv1x1 + bn1 + relu -------------------------------------------
    # x block is bf16; feed the MXU directly, accumulate in f32.  No f32 copy
    # of x is kept live; it is re-read at the residual add below.
    x2d = x_ref[...].reshape(NB * HW, x_ref.shape[-1])
    h1 = jnp.dot(x2d, w1_ref[...], preferred_element_type=jnp.float32)
    h1 = jnp.maximum(h1 * s1_ref[...] + b1_ref[...], 0.0)

    # ---- conv3x3 (stride 1, pad 1) via im2col + one K=9*width MXU matmul --
    # Scatter h1 straight into the 9 shifted column blocks of col_ref (all NB
    # images at once); the out-of-image halo of each tap block is a thin zero
    # strip.  Every element of col_ref is overwritten every grid step.
    h1_bf = h1.astype(jnp.bfloat16).reshape(NB, H, W, width)
    zrow = jnp.zeros((NB, 1, W, width), jnp.bfloat16)
    zcol = jnp.zeros((NB, H, 1, width), jnp.bfloat16)
    for k in range(9):
        kh, kw = k // 3, k % 3
        dh, dw = kh - 1, kw - 1                    # input offset of this tap
        hs, he = max(0, -dh), H - max(0, dh)       # valid output rows
        ws, we = max(0, -dw), W - max(0, dw)       # valid output cols
        c0 = k * width
        col_ref[:, hs:he, ws:we, c0:c0 + width] = \
            h1_bf[:, hs + dh:he + dh, ws + dw:we + dw, :]
        if dh == -1:
            col_ref[:, 0:1, :, c0:c0 + width] = zrow
        elif dh == 1:
            col_ref[:, H - 1:H, :, c0:c0 + width] = zrow
        if dw == -1:
            col_ref[:, :, 0:1, c0:c0 + width] = zcol
        elif dw == 1:
            col_ref[:, :, W - 1:W, c0:c0 + width] = zcol

    cols = col_ref[...].reshape(NB * HW, 9 * width)
    h2 = jnp.dot(cols, w2_ref[...], preferred_element_type=jnp.float32)
    h2 = jnp.maximum(h2 * s2_ref[...] + b2_ref[...], 0.0)

    # ---- conv1x1 + bn3 + residual + relu ----------------------------------
    h3 = jnp.dot(h2.astype(jnp.bfloat16), w3_ref[...],
                 preferred_element_type=jnp.float32)
    identity = x_ref[...].reshape(NB * HW, Cout).astype(jnp.float32)
    h3 = h3 * s3_ref[...] + b3_ref[...] + identity
    out_ref[...] = jnp.maximum(h3, 0.0).reshape(
        NB, HW, Cout).astype(out_ref.dtype)


def _vmem_limit_bytes():
    """~3/4 of physical VMEM: ~48 MiB on v7x, ~96 MiB on v5e/v6e."""
    try:
        cap = int(pltpu.get_tpu_info().vmem_capacity_bytes)
    except Exception:
        cap = 64 * 1024 * 1024
    return max(32 * 1024 * 1024, min(cap * 3 // 4, 100 * 1024 * 1024))


def bottleneck_forward(x_nhwc, params, *, images_per_step=None):
    """x_nhwc: (N, H, W, Cin) float32. params: folded weights (see make_params)."""
    N, H, W, Cin = x_nhwc.shape
    width = params["w2"].shape[-1]
    Cout = params["w3"].shape[-1]
    # downsample=None (PyTorch default) => identity residual needs Cin == Cout.
    assert Cin == Cout, "identity residual requires inplanes == planes * expansion"
    HW = H * W

    NB = images_per_step if images_per_step is not None else (2 if N % 2 == 0 else 1)
    assert N % NB == 0, "images_per_step must divide the batch"

    # bf16 I/O: halves HBM DMA bytes and the pipelined block footprint.
    x_flat = x_nhwc.reshape(N, HW, Cin).astype(jnp.bfloat16)

    def call(single_buffer_consts):
        if single_buffer_consts:
            const = lambda shape: pl.BlockSpec(
                shape, lambda n: (0,) * len(shape), pipeline_mode=pl.Buffered(1))
        else:
            const = lambda shape: pl.BlockSpec(shape, lambda n: (0,) * len(shape))

        kernel = functools.partial(bottleneck_kernel, NB=NB, H=H, W=W)
        return pl.pallas_call(
            kernel,
            out_shape=jax.ShapeDtypeStruct((N, HW, Cout), jnp.bfloat16),
            grid_spec=pltpu.PrefetchScalarGridSpec(
                num_scalar_prefetch=0,
                grid=(N // NB,),
                in_specs=[
                    pl.BlockSpec((NB, HW, Cin), lambda n: (n, 0, 0)),
                    const((Cin, width)), const((1, width)), const((1, width)),
                    const((9 * width, width)), const((1, width)), const((1, width)),
                    const((width, Cout)), const((1, Cout)), const((1, Cout)),
                ],
                out_specs=pl.BlockSpec((NB, HW, Cout), lambda n: (n, 0, 0)),
                scratch_shapes=[
                    # im2col slab; fully overwritten every grid step.
                    pltpu.VMEM((NB, H, W, 9 * width), jnp.bfloat16),
                ],
            ),
            compiler_params=pltpu.CompilerParams(
                dimension_semantics=("parallel",),   # images are independent
                vmem_limit_bytes=_vmem_limit_bytes()),
        )(x_flat,
          params["w1"], params["s1"], params["b1"],
          params["w2"], params["s2"], params["b2"],
          params["w3"], params["s3"], params["b3"])

    try:
        out_flat = call(True)
    except Exception:
        # pipeline_mode=pl.Buffered(1) on top-level BlockSpecs is a newer API;
        # fall back to default (double-buffered) constants if it is rejected.
        out_flat = call(False)
    return out_flat.reshape(N, H, W, Cout)


def fold_bn(gamma, beta, mean, var, eps=1e-5):
    scale = gamma / jnp.sqrt(var + eps)
    bias = beta - mean * scale
    return scale.reshape(1, -1), bias.reshape(1, -1)


def make_params(key, inplanes, planes, base_width=64, groups=1):
    expansion = 4
    width = int(planes * (base_width / 64.0)) * groups
    cout = planes * expansion
    ks = jax.random.split(key, 12)

    # conv weights in PyTorch OIHW; stored transposed (and bf16) for NHWC matmuls.
    w1_oihw = 0.1 * jax.random.normal(ks[0], (width, inplanes, 1, 1), jnp.float32)
    w2_oihw = 0.1 * jax.random.normal(ks[1], (width, width, 3, 3), jnp.float32)
    w3_oihw = 0.1 * jax.random.normal(ks[2], (cout, width, 1, 1), jnp.float32)

    def bn(kg, kb, km, kv, c):
        gamma = 1.0 + 0.1 * jax.random.normal(kg, (c,), jnp.float32)
        beta = 0.1 * jax.random.normal(kb, (c,), jnp.float32)
        mean = 0.1 * jax.random.normal(km, (c,), jnp.float32)
        var = jnp.abs(jax.random.normal(kv, (c,), jnp.float32)) + 0.5
        return fold_bn(gamma, beta, mean, var)

    s1, b1 = bn(ks[3], ks[4], ks[5], ks[6], width)
    s2, b2 = bn(ks[7], ks[8], ks[9], ks[10], width)
    s3, b3 = bn(*jax.random.split(ks[11], 4), cout)

    params = dict(
        # w1: (Cin, width) bf16 for x2d @ w1
        w1=jnp.transpose(w1_oihw[:, :, 0, 0], (1, 0)).astype(jnp.bfloat16),
        s1=s1, b1=b1,
        # w2: (9*width, width) bf16; row block k = kh*3+kw holds that tap's (Cin, Cout)
        w2=jnp.transpose(w2_oihw, (2, 3, 1, 0)).reshape(9 * width, width)
              .astype(jnp.bfloat16),
        s2=s2, b2=b2,
        # w3: (width, Cout) bf16
        w3=jnp.transpose(w3_oihw[:, :, 0, 0], (1, 0)).astype(jnp.bfloat16),
        s3=s3, b3=b3,
    )
    raw = dict(w1=w1_oihw, w2=w2_oihw, w3=w3_oihw)
    return params, raw


def reference_forward(x_nhwc, params, raw):
    """Pure-JAX reference (lax convs, same bf16 weights / f32 accumulation)."""
    dn = ("NHWC", "HWIO", "NHWC")

    def conv(x, w_oihw, pad):
        w_hwio = jnp.transpose(w_oihw, (2, 3, 1, 0)).astype(jnp.bfloat16)
        return jax.lax.conv_general_dilated(
            x.astype(jnp.bfloat16), w_hwio, (1, 1), pad,
            dimension_numbers=dn, preferred_element_type=jnp.float32)

    h = conv(x_nhwc, raw["w1"], "VALID") * params["s1"][0] + params["b1"][0]
    h = jnp.maximum(h, 0.0)
    h = conv(h, raw["w2"], "SAME") * params["s2"][0] + params["b2"][0]
    h = jnp.maximum(h, 0.0)
    h = conv(h, raw["w3"], "VALID") * params["s3"][0] + params["b3"][0]
    return jnp.maximum(h + x_nhwc, 0.0)


if __name__ == "__main__":
    key = jax.random.PRNGKey(0)
    kx, kp = jax.random.split(key)

    # Small bottleneck: inplanes = planes * expansion so the identity path
    # works without a downsample module (PyTorch default downsample=None).
    N, H, W = 4, 8, 8
    planes = 4
    inplanes = planes * 4          # 16

    x_nchw = jax.random.normal(kx, (N, inplanes, H, W), jnp.float32)
    x_nhwc = jnp.transpose(x_nchw, (0, 2, 3, 1))

    params, raw = make_params(kp, inplanes, planes)

    out = bottleneck_forward(x_nhwc, params, images_per_step=2)
    out = jax.block_until_ready(out)

    ref = reference_forward(x_nhwc, params, raw)
    assert out.shape == (N, H, W, planes * 4)
    out_f32 = out.astype(jnp.float32)
    max_err = float(jnp.max(jnp.abs(out_f32 - ref)))
    assert jnp.allclose(out_f32, ref, atol=3e-2, rtol=3e-2), max_err

    print("KERNEL_OK")
</pallas_src>

<mosaic_0001>
module attributes {stable_mosaic.version = 11 : i64} {
  func.func @bottleneck_kernel(%arg0: i32, %arg1: memref<2x64x16xbf16, #tpu.memory_space<vmem>>, %arg2: memref<16x4xbf16, #tpu.memory_space<vmem>>, %arg3: memref<1x4xf32, #tpu.memory_space<vmem>>, %arg4: memref<1x4xf32, #tpu.memory_space<vmem>>, %arg5: memref<36x4xbf16, #tpu.memory_space<vmem>>, %arg6: memref<1x4xf32, #tpu.memory_space<vmem>>, %arg7: memref<1x4xf32, #tpu.memory_space<vmem>>, %arg8: memref<4x16xbf16, #tpu.memory_space<vmem>>, %arg9: memref<1x16xf32, #tpu.memory_space<vmem>>, %arg10: memref<1x16xf32, #tpu.memory_space<vmem>>, %arg11: memref<2x64x16xbf16, #tpu.memory_space<vmem>>, %arg12: memref<2x8x8x36xbf16, #tpu.memory_space<vmem>>) attributes {dimension_semantics = [#tpu.dimension_semantics<parallel>], iteration_bounds = array<i64: 2>, scalar_prefetch = 0 : i64, scratch_operands = 1 : i64, tpu.core_type = #tpu.core_type<tc>, window_params = [{transform_indices = @transform_0, window_bounds = array<i64: 2, 64, 16>}, {pipeline_mode = #tpu.pipeline_mode<synchronous>, transform_indices = @transform_1, window_bounds = array<i64: 16, 4>}, {pipeline_mode = #tpu.pipeline_mode<synchronous>, transform_indices = @transform_2, window_bounds = array<i64: 1, 4>}, {pipeline_mode = #tpu.pipeline_mode<synchronous>, transform_indices = @transform_3, window_bounds = array<i64: 1, 4>}, {pipeline_mode = #tpu.pipeline_mode<synchronous>, transform_indices = @transform_4, window_bounds = array<i64: 36, 4>}, {pipeline_mode = #tpu.pipeline_mode<synchronous>, transform_indices = @transform_5, window_bounds = array<i64: 1, 4>}, {pipeline_mode = #tpu.pipeline_mode<synchronous>, transform_indices = @transform_6, window_bounds = array<i64: 1, 4>}, {pipeline_mode = #tpu.pipeline_mode<synchronous>, transform_indices = @transform_7, window_bounds = array<i64: 4, 16>}, {pipeline_mode = #tpu.pipeline_mode<synchronous>, transform_indices = @transform_8, window_bounds = array<i64: 1, 16>}, {pipeline_mode = #tpu.pipeline_mode<synchronous>, transform_indices = @transform_9, window_bounds = array<i64: 1, 16>}, {transform_indices = @transform_10, window_bounds = array<i64: 2, 64, 16>}]} {
    %c0 = arith.constant 0 : index
    %c0_0 = arith.constant 0 : index
    %c0_1 = arith.constant 0 : index
    %0 = vector.load %arg1[%c0, %c0_0, %c0_1] : memref<2x64x16xbf16, #tpu.memory_space<vmem>>, vector<2x64x16xbf16>
    %1 = vector.shape_cast %0 : vector<2x64x16xbf16> to vector<128x16xbf16>
    %c0_2 = arith.constant 0 : index
    %c0_3 = arith.constant 0 : index
    %2 = vector.load %arg2[%c0_2, %c0_3] : memref<16x4xbf16, #tpu.memory_space<vmem>>, vector<16x4xbf16>
    %cst = arith.constant dense<0.000000e+00> : vector<128x4xf32>
    %3 = tpu.matmul %1, %2, %cst {dimension_numbers = #tpu.dot_dimension_numbers<[1], [0], [0], [1], [0, 0, 1, 1], [], []>} : vector<128x16xbf16>, vector<16x4xbf16>, vector<128x4xf32> -> vector<128x4xf32>
    %c0_4 = arith.constant 0 : index
    %c0_5 = arith.constant 0 : index
    %4 = vector.load %arg3[%c0_4, %c0_5] : memref<1x4xf32, #tpu.memory_space<vmem>>, vector<1x4xf32>
    %5 = vector.broadcast %4 : vector<1x4xf32> to vector<128x4xf32>
    %6 = arith.mulf %3, %5 : vector<128x4xf32>
    %c0_6 = arith.constant 0 : index
    %c0_7 = arith.constant 0 : index
    %7 = vector.load %arg4[%c0_6, %c0_7] : memref<1x4xf32, #tpu.memory_space<vmem>>, vector<1x4xf32>
    %8 = vector.broadcast %7 : vector<1x4xf32> to vector<128x4xf32>
    %9 = arith.addf %6, %8 : vector<128x4xf32>
    %cst_8 = arith.constant 0.000000e+00 : f32
    %10 = vector.broadcast %cst_8 : f32 to vector<128x4xf32>
    %11 = arith.maximumf %9, %10 : vector<128x4xf32>
    %12 = arith.truncf %11 : vector<128x4xf32> to vector<128x4xbf16>
    %13 = vector.shape_cast %12 : vector<128x4xbf16> to vector<2x8x8x4xbf16>
    %cst_9 = arith.constant 0.000000e+00 : bf16
    %14 = vector.broadcast %cst_9 : bf16 to vector<2x1x8x4xbf16>
    %cst_10 = arith.constant 0.000000e+00 : bf16
    %15 = vector.broadcast %cst_10 : bf16 to vector<2x8x1x4xbf16>
    %16 = vector.extract_strided_slice %13 {offsets = [0, 0, 0, 0], sizes = [2, 7, 7, 4], strides = [1, 1, 1, 1]} : vector<2x8x8x4xbf16> to vector<2x7x7x4xbf16>
    %c0_11 = arith.constant 0 : index
    %c1 = arith.constant 1 : index
    %c1_12 = arith.constant 1 : index
    %c0_13 = arith.constant 0 : index
    %17 = vector.load %arg12[%c0_11, %c1, %c1_12, %c0_13] : memref<2x8x8x36xbf16, #tpu.memory_space<vmem>>, vector<2x7x7x4xbf16>
    tpu.vector_store %arg12[%c0_11, %c1, %c1_12, %c0_13], %16 {strides = array<i32>} : memref<2x8x8x36xbf16, #tpu.memory_space<vmem>>, vector<2x7x7x4xbf16>,
    %c0_14 = arith.constant 0 : index
    %c0_15 = arith.constant 0 : index
    %c0_16 = arith.constant 0 : index
    %c0_17 = arith.constant 0 : index
    %18 = vector.load %arg12[%c0_14, %c0_15, %c0_16, %c0_17] : memref<2x8x8x36xbf16, #tpu.memory_space<vmem>>, vector<2x1x8x4xbf16>
    tpu.vector_store %arg12[%c0_14, %c0_15, %c0_16, %c0_17], %14 {strides = array<i32>} : memref<2x8x8x36xbf16, #tpu.memory_space<vmem>>, vector<2x1x8x4xbf16>,
    %c0_18 = arith.constant 0 : index
    %c0_19 = arith.constant 0 : index
    %c0_20 = arith.constant 0 : index
    %c0_21 = arith.constant 0 : index
    %19 = vector.load %arg12[%c0_18, %c0_19, %c0_20, %c0_21] : memref<2x8x8x36xbf16, #tpu.memory_space<vmem>>, vector<2x8x1x4xbf16>
    tpu.vector_store %arg12[%c0_18, %c0_19, %c0_20, %c0_21], %15 {strides = array<i32>} : memref<2x8x8x36xbf16, #tpu.memory_space<vmem>>, vector<2x8x1x4xbf16>,
    %20 = vector.extract_strided_slice %13 {offsets = [0, 0, 0, 0], sizes = [2, 7, 8, 4], strides = [1, 1, 1, 1]} : vector<2x8x8x4xbf16> to vector<2x7x8x4xbf16>
    %c0_22 = arith.constant 0 : index
    %c1_23 = arith.constant 1 : index
    %c0_24 = arith.constant 0 : index
    %c4 = arith.constant 4 : index
    %21 = vector.load %arg12[%c0_22, %c1_23, %c0_24, %c4] : memref<2x8x8x36xbf16, #tpu.memory_space<vmem>>, vector<2x7x8x4xbf16>
    tpu.vector_store %arg12[%c0_22, %c1_23, %c0_24, %c4], %20 {strides = array<i32>} : memref<2x8x8x36xbf16, #tpu.memory_space<vmem>>, vector<2x7x8x4xbf16>,
    %c0_25 = arith.constant 0 : index
    %c0_26 = arith.constant 0 : index
    %c0_27 = arith.constant 0 : index
    %c4_28 = arith.constant 4 : index
    %22 = vector.load %arg12[%c0_25, %c0_26, %c0_27, %c4_28] : memref<2x8x8x36xbf16, #tpu.memory_space<vmem>>, vector<2x1x8x4xbf16>
    tpu.vector_store %arg12[%c0_25, %c0_26, %c0_27, %c4_28], %14 {strides = array<i32>} : memref<2x8x8x36xbf16, #tpu.memory_space<vmem>>, vector<2x1x8x4xbf16>,
    %23 = vector.extract_strided_slice %13 {offsets = [0, 0, 1, 0], sizes = [2, 7, 7, 4], strides = [1, 1, 1, 1]} : vector<2x8x8x4xbf16> to vector<2x7x7x4xbf16>
    %c0_29 = arith.constant 0 : index
    %c1_30 = arith.constant 1 : index
    %c0_31 = arith.constant 0 : index
    %c8 = arith.constant 8 : index
    %24 = vector.load %arg12[%c0_29, %c1_30, %c0_31, %c8] : memref<2x8x8x36xbf16, #tpu.memory_space<vmem>>, vector<2x7x7x4xbf16>
    tpu.vector_store %arg12[%c0_29, %c1_30, %c0_31, %c8], %23 {strides = array<i32>} : memref<2x8x8x36xbf16, #tpu.memory_space<vmem>>, vector<2x7x7x4xbf16>,
    %c0_32 = arith.constant 0 : index
    %c0_33 = arith.constant 0 : index
    %c0_34 = arith.constant 0 : index
    %c8_35 = arith.constant 8 : index
    %25 = vector.load %arg12[%c0_32, %c0_33, %c0_34, %c8_35] : memref<2x8x8x36xbf16, #tpu.memory_space<vmem>>, vector<2x1x8x4xbf16>
    tpu.vector_store %arg12[%c0_32, %c0_33, %c0_34, %c8_35], %14 {strides = array<i32>} : memref<2x8x8x36xbf16, #tpu.memory_space<vmem>>, vector<2x1x8x4xbf16>,
    %c0_36 = arith.constant 0 : index
    %c0_37 = arith.constant 0 : index
    %c7 = arith.constant 7 : index
    %c8_38 = arith.constant 8 : index
    %26 = vector.load %arg12[%c0_36, %c0_37, %c7, %c8_38] : memref<2x8x8x36xbf16, #tpu.memory_space<vmem>>, vector<2x8x1x4xbf16>
    tpu.vector_store %arg12[%c0_36, %c0_37, %c7, %c8_38], %15 {strides = array<i32>} : memref<2x8x8x36xbf16, #tpu.memory_space<vmem>>, vector<2x8x1x4xbf16>,
    %27 = vector.extract_strided_slice %13 {offsets = [0, 0, 0, 0], sizes = [2, 8, 7, 4], strides = [1, 1, 1, 1]} : vector<2x8x8x4xbf16> to vector<2x8x7x4xbf16>
    %c0_39 = arith.constant 0 : index
    %c0_40 = arith.constant 0 : index
    %c1_41 = arith.constant 1 : index
    %c12 = arith.constant 12 : index
    %28 = vector.load %arg12[%c0_39, %c0_40, %c1_41, %c12] : memref<2x8x8x36xbf16, #tpu.memory_space<vmem>>, vector<2x8x7x4xbf16>
    tpu.vector_store %arg12[%c0_39, %c0_40, %c1_41, %c12], %27 {strides = array<i32>} : memref<2x8x8x36xbf16, #tpu.memory_space<vmem>>, vector<2x8x7x4xbf16>,
    %c0_42 = arith.constant 0 : index
    %c0_43 = arith.constant 0 : index
    %c0_44 = arith.constant 0 : index
    %c12_45 = arith.constant 12 : index
    %29 = vector.load %arg12[%c0_42, %c0_43, %c0_44, %c12_45] : memref<2x8x8x36xbf16, #tpu.memory_space<vmem>>, vector<2x8x1x4xbf16>
    tpu.vector_store %arg12[%c0_42, %c0_43, %c0_44, %c12_45], %15 {strides = array<i32>} : memref<2x8x8x36xbf16, #tpu.memory_space<vmem>>, vector<2x8x1x4xbf16>,
    %c0_46 = arith.constant 0 : index
    %c0_47 = arith.constant 0 : index
    %c0_48 = arith.constant 0 : index
    %c16 = arith.constant 16 : index
    %30 = vector.load %arg12[%c0_46, %c0_47, %c0_48, %c16] : memref<2x8x8x36xbf16, #tpu.memory_space<vmem>>, vector<2x8x8x4xbf16>
    tpu.vector_store %arg12[%c0_46, %c0_47, %c0_48, %c16], %13 {strides = array<i32>} : memref<2x8x8x36xbf16, #tpu.memory_space<vmem>>, vector<2x8x8x4xbf16>,
    %31 = vector.extract_strided_slice %13 {offsets = [0, 0, 1, 0], sizes = [2, 8, 7, 4], strides = [1, 1, 1, 1]} : vector<2x8x8x4xbf16> to vector<2x8x7x4xbf16>
    %c0_49 = arith.constant 0 : index
    %c0_50 = arith.constant 0 : index
    %c0_51 = arith.constant 0 : index
    %c20 = arith.constant 20 : index
    %32 = vector.load %arg12[%c0_49, %c0_50, %c0_51, %c20] : memref<2x8x8x36xbf16, #tpu.memory_space<vmem>>, vector<2x8x7x4xbf16>
    tpu.vector_store %arg12[%c0_49, %c0_50, %c0_51, %c20], %31 {strides = array<i32>} : memref<2x8x8x36xbf16, #tpu.memory_space<vmem>>, vector<2x8x7x4xbf16>,
    %c0_52 = arith.constant 0 : index
    %c0_53 = arith.constant 0 : index
    %c7_54 = arith.constant 7 : index
    %c20_55 = arith.constant 20 : index
    %33 = vector.load %arg12[%c0_52, %c0_53, %c7_54, %c20_55] : memref<2x8x8x36xbf16, #tpu.memory_space<vmem>>, vector<2x8x1x4xbf16>
    tpu.vector_store %arg12[%c0_52, %c0_53, %c7_54, %c20_55], %15 {strides = array<i32>} : memref<2x8x8x36xbf16, #tpu.memory_space<vmem>>, vector<2x8x1x4xbf16>,
    %34 = vector.extract_strided_slice %13 {offsets = [0, 1, 0, 0], sizes = [2, 7, 7, 4], strides = [1, 1, 1, 1]} : vector<2x8x8x4xbf16> to vector<2x7x7x4xbf16>
    %c0_56 = arith.constant 0 : index
    %c0_57 = arith.constant 0 : index
    %c1_58 = arith.constant 1 : index
    %c24 = arith.constant 24 : index
    %35 = vector.load %arg12[%c0_56, %c0_57, %c1_58, %c24] : memref<2x8x8x36xbf16, #tpu.memory_space<vmem>>, vector<2x7x7x4xbf16>
    tpu.vector_store %arg12[%c0_56, %c0_57, %c1_58, %c24], %34 {strides = array<i32>} : memref<2x8x8x36xbf16, #tpu.memory_space<vmem>>, vector<2x7x7x4xbf16>,
    %c0_59 = arith.constant 0 : index
    %c7_60 = arith.constant 7 : index
    %c0_61 = arith.constant 0 : index
    %c24_62 = arith.constant 24 : index
    %36 = vector.load %arg12[%c0_59, %c7_60, %c0_61, %c24_62] : memref<2x8x8x36xbf16, #tpu.memory_space<vmem>>, vector<2x1x8x4xbf16>
    tpu.vector_store %arg12[%c0_59, %c7_60, %c0_61, %c24_62], %14 {strides = array<i32>} : memref<2x8x8x36xbf16, #tpu.memory_space<vmem>>, vector<2x1x8x4xbf16>,
    %c0_63 = arith.constant 0 : index
    %c0_64 = arith.constant 0 : index
    %c0_65 = arith.constant 0 : index
    %c24_66 = arith.constant 24 : index
    %37 = vector.load %arg12[%c0_63, %c0_64, %c0_65, %c24_66] : memref<2x8x8x36xbf16, #tpu.memory_space<vmem>>, vector<2x8x1x4xbf16>
    tpu.vector_store %arg12[%c0_63, %c0_64, %c0_65, %c24_66], %15 {strides = array<i32>} : memref<2x8x8x36xbf16, #tpu.memory_space<vmem>>, vector<2x8x1x4xbf16>,
    %38 = vector.extract_strided_slice %13 {offsets = [0, 1, 0, 0], sizes = [2, 7, 8, 4], strides = [1, 1, 1, 1]} : vector<2x8x8x4xbf16> to vector<2x7x8x4xbf16>
    %c0_67 = arith.constant 0 : index
    %c0_68 = arith.constant 0 : index
    %c0_69 = arith.constant 0 : index
    %c28 = arith.constant 28 : index
    %39 = vector.load %arg12[%c0_67, %c0_68, %c0_69, %c28] : memref<2x8x8x36xbf16, #tpu.memory_space<vmem>>, vector<2x7x8x4xbf16>
    tpu.vector_store %arg12[%c0_67, %c0_68, %c0_69, %c28], %38 {strides = array<i32>} : memref<2x8x8x36xbf16, #tpu.memory_space<vmem>>, vector<2x7x8x4xbf16>,
    %c0_70 = arith.constant 0 : index
    %c7_71 = arith.constant 7 : index
    %c0_72 = arith.constant 0 : index
    %c28_73 = arith.constant 28 : index
    %40 = vector.load %arg12[%c0_70, %c7_71, %c0_72, %c28_73] : memref<2x8x8x36xbf16, #tpu.memory_space<vmem>>, vector<2x1x8x4xbf16>
    tpu.vector_store %arg12[%c0_70, %c7_71, %c0_72, %c28_73], %14 {strides = array<i32>} : memref<2x8x8x36xbf16, #tpu.memory_space<vmem>>, vector<2x1x8x4xbf16>,
    %41 = vector.extract_strided_slice %13 {offsets = [0, 1, 1, 0], sizes = [2, 7, 7, 4], strides = [1, 1, 1, 1]} : vector<2x8x8x4xbf16> to vector<2x7x7x4xbf16>
    %c0_74 = arith.constant 0 : index
    %c0_75 = arith.constant 0 : index
    %c0_76 = arith.constant 0 : index
    %c32 = arith.constant 32 : index
    %42 = vector.load %arg12[%c0_74, %c0_75, %c0_76, %c32] : memref<2x8x8x36xbf16, #tpu.memory_space<vmem>>, vector<2x7x7x4xbf16>
    tpu.vector_store %arg12[%c0_74, %c0_75, %c0_76, %c32], %41 {strides = array<i32>} : memref<2x8x8x36xbf16, #tpu.memory_space<vmem>>, vector<2x7x7x4xbf16>,
    %c0_77 = arith.constant 0 : index
    %c7_78 = arith.constant 7 : index
    %c0_79 = arith.constant 0 : index
    %c32_80 = arith.constant 32 : index
    %43 = vector.load %arg12[%c0_77, %c7_78, %c0_79, %c32_80] : memref<2x8x8x36xbf16, #tpu.memory_space<vmem>>, vector<2x1x8x4xbf16>
    tpu.vector_store %arg12[%c0_77, %c7_78, %c0_79, %c32_80], %14 {strides = array<i32>} : memref<2x8x8x36xbf16, #tpu.memory_space<vmem>>, vector<2x1x8x4xbf16>,
    %c0_81 = arith.constant 0 : index
    %c0_82 = arith.constant 0 : index
    %c7_83 = arith.constant 7 : index
    %c32_84 = arith.constant 32 : index
    %44 = vector.load %arg12[%c0_81, %c0_82, %c7_83, %c32_84] : memref<2x8x8x36xbf16, #tpu.memory_space<vmem>>, vector<2x8x1x4xbf16>
    tpu.vector_store %arg12[%c0_81, %c0_82, %c7_83, %c32_84], %15 {strides = array<i32>} : memref<2x8x8x36xbf16, #tpu.memory_space<vmem>>, vector<2x8x1x4xbf16>,
    %c0_85 = arith.constant 0 : index
    %c0_86 = arith.constant 0 : index
    %c0_87 = arith.constant 0 : index
    %c0_88 = arith.constant 0 : index
    %45 = vector.load %arg12[%c0_85, %c0_86, %c0_87, %c0_88] : memref<2x8x8x36xbf16, #tpu.memory_space<vmem>>, vector<2x8x8x36xbf16>
    %46 = vector.shape_cast %45 : vector<2x8x8x36xbf16> to vector<128x36xbf16>
    %c0_89 = arith.constant 0 : index
    %c0_90 = arith.constant 0 : index
    %47 = vector.load %arg5[%c0_89, %c0_90] : memref<36x4xbf16, #tpu.memory_space<vmem>>, vector<36x4xbf16>
    %cst_91 = arith.constant dense<0.000000e+00> : vector<128x4xf32>
    %48 = tpu.matmul %46, %47, %cst_91 {dimension_numbers = #tpu.dot_dimension_numbers<[1], [0], [0], [1], [0, 0, 1, 1], [], []>} : vector<128x36xbf16>, vector<36x4xbf16>, vector<128x4xf32> -> vector<128x4xf32>
    %c0_92 = arith.constant 0 : index
    %c0_93 = arith.constant 0 : index
    %49 = vector.load %arg6[%c0_92, %c0_93] : memref<1x4xf32, #tpu.memory_space<vmem>>, vector<1x4xf32>
    %50 = vector.broadcast %49 : vector<1x4xf32> to vector<128x4xf32>
    %51 = arith.mulf %48, %50 : vector<128x4xf32>
    %c0_94 = arith.constant 0 : index
    %c0_95 = arith.constant 0 : index
    %52 = vector.load %arg7[%c0_94, %c0_95] : memref<1x4xf32, #tpu.memory_space<vmem>>, vector<1x4xf32>
    %53 = vector.broadcast %52 : vector<1x4xf32> to vector<128x4xf32>
    %54 = arith.addf %51, %53 : vector<128x4xf32>
    %cst_96 = arith.constant 0.000000e+00 : f32
    %55 = vector.broadcast %cst_96 : f32 to vector<128x4xf32>
    %56 = arith.maximumf %54, %55 : vector<128x4xf32>
    %57 = arith.truncf %56 : vector<128x4xf32> to vector<128x4xbf16>
    %c0_97 = arith.constant 0 : index
    %c0_98 = arith.constant 0 : index
    %58 = vector.load %arg8[%c0_97, %c0_98] : memref<4x16xbf16, #tpu.memory_space<vmem>>, vector<4x16xbf16>
    %cst_99 = arith.constant dense<0.000000e+00> : vector<128x16xf32>
    %59 = tpu.matmul %57, %58, %cst_99 {dimension_numbers = #tpu.dot_dimension_numbers<[1], [0], [0], [1], [0, 0, 1, 1], [], []>} : vector<128x4xbf16>, vector<4x16xbf16>, vector<128x16xf32> -> vector<128x16xf32>
    %c0_100 = arith.constant 0 : index
    %c0_101 = arith.constant 0 : index
    %c0_102 = arith.constant 0 : index
    %60 = vector.load %arg1[%c0_100, %c0_101, %c0_102] : memref<2x64x16xbf16, #tpu.memory_space<vmem>>, vector<2x64x16xbf16>
    %61 = vector.shape_cast %60 : vector<2x64x16xbf16> to vector<128x16xbf16>
    %62 = arith.extf %61 : vector<128x16xbf16> to vector<128x16xf32>
    %c0_103 = arith.constant 0 : index
    %c0_104 = arith.constant 0 : index
    %63 = vector.load %arg9[%c0_103, %c0_104] : memref<1x16xf32, #tpu.memory_space<vmem>>, vector<1x16xf32>
    %64 = vector.broadcast %63 : vector<1x16xf32> to vector<128x16xf32>
    %65 = arith.mulf %59, %64 : vector<128x16xf32>
    %c0_105 = arith.constant 0 : index
    %c0_106 = arith.constant 0 : index
    %66 = vector.load %arg10[%c0_105, %c0_106] : memref<1x16xf32, #tpu.memory_space<vmem>>, vector<1x16xf32>
    %67 = vector.broadcast %66 : vector<1x16xf32> to vector<128x16xf32>
    %68 = arith.addf %65, %67 : vector<128x16xf32>
    %69 = arith.addf %68, %62 : vector<128x16xf32>
    %cst_107 = arith.constant 0.000000e+00 : f32
    %70 = vector.broadcast %cst_107 : f32 to vector<128x16xf32>
    %71 = arith.maximumf %69, %70 : vector<128x16xf32>
    %72 = vector.shape_cast %71 : vector<128x16xf32> to vector<2x64x16xf32>
    %73 = arith.truncf %72 : vector<2x64x16xf32> to vector<2x64x16xbf16>
    %c0_108 = arith.constant 0 : index
    %c0_109 = arith.constant 0 : index
    %c0_110 = arith.constant 0 : index
    %74 = vector.load %arg11[%c0_108, %c0_109, %c0_110] : memref<2x64x16xbf16, #tpu.memory_space<vmem>>, vector<2x64x16xbf16>
    tpu.vector_store %arg11[%c0_108, %c0_109, %c0_110], %73 {strides = array<i32>} : memref<2x64x16xbf16, #tpu.memory_space<vmem>>, vector<2x64x16xbf16>,
    return
  }
  func.func @transform_0(%arg0: i32) -> (i32, i32, i32) {
    %c0_i32 = arith.constant 0 : i32
    %c0_i32_0 = arith.constant 0 : i32
    %c0_i32_1 = arith.constant 0 : i32
    return %arg0, %c0_i32, %c0_i32_0 : i32, i32, i32
  }
  func.func @transform_1(%arg0: i32) -> (i32, i32) {
    %c0_i32 = arith.constant 0 : i32
    %c0_i32_0 = arith.constant 0 : i32
    %c0_i32_1 = arith.constant 0 : i32
    return %c0_i32, %c0_i32_0 : i32, i32
  }
  func.func @transform_2(%arg0: i32) -> (i32, i32) {
    %c0_i32 = arith.constant 0 : i32
    %c0_i32_0 = arith.constant 0 : i32
    %c0_i32_1 = arith.constant 0 : i32
    return %c0_i32, %c0_i32_0 : i32, i32
  }
  func.func @transform_3(%arg0: i32) -> (i32, i32) {
    %c0_i32 = arith.constant 0 : i32
    %c0_i32_0 = arith.constant 0 : i32
    %c0_i32_1 = arith.constant 0 : i32
    return %c0_i32, %c0_i32_0 : i32, i32
  }
  func.func @transform_4(%arg0: i32) -> (i32, i32) {
    %c0_i32 = arith.constant 0 : i32
    %c0_i32_0 = arith.constant 0 : i32
    %c0_i32_1 = arith.constant 0 : i32
    return %c0_i32, %c0_i32_0 : i32, i32
  }
  func.func @transform_5(%arg0: i32) -> (i32, i32) {
    %c0_i32 = arith.constant 0 : i32
    %c0_i32_0 = arith.constant 0 : i32
    %c0_i32_1 = arith.constant 0 : i32
    return %c0_i32, %c0_i32_0 : i32, i32
  }
  func.func @transform_6(%arg0: i32) -> (i32, i32) {
    %c0_i32 = arith.constant 0 : i32
    %c0_i32_0 = arith.constant 0 : i32
    %c0_i32_1 = arith.constant 0 : i32
    return %c0_i32, %c0_i32_0 : i32, i32
  }
  func.func @transform_7(%arg0: i32) -> (i32, i32) {
    %c0_i32 = arith.constant 0 : i32
    %c0_i32_0 = arith.constant 0 : i32
    %c0_i32_1 = arith.constant 0 : i32
    return %c0_i32, %c0_i32_0 : i32, i32
  }
  func.func @transform_8(%arg0: i32) -> (i32, i32) {
    %c0_i32 = arith.constant 0 : i32
    %c0_i32_0 = arith.constant 0 : i32
    %c0_i32_1 = arith.constant 0 : i32
    return %c0_i32, %c0_i32_0 : i32, i32
  }
  func.func @transform_9(%arg0: i32) -> (i32, i32) {
    %c0_i32 = arith.constant 0 : i32
    %c0_i32_0 = arith.constant 0 : i32
    %c0_i32_1 = arith.constant 0 : i32
    return %c0_i32, %c0_i32_0 : i32, i32
  }
  func.func @transform_10(%arg0: i32) -> (i32, i32, i32) {
    %c0_i32 = arith.constant 0 : i32
    %c0_i32_0 = arith.constant 0 : i32
    %c0_i32_1 = arith.constant 0 : i32
    return %arg0, %c0_i32, %c0_i32_0 : i32, i32, i32
  }
}

module attributes {stable_mosaic.version = 11 : i64} {
  func.func @bottleneck_kernel(%arg0: i32, %arg1: memref<2x64x16xbf16, #tpu.memory_space<vmem>>, %arg2: memref<16x4xbf16, #tpu.memory_space<vmem>>, %arg3: memref<1x4xf32, #tpu.memory_space<vmem>>, %arg4: memref<1x4xf32, #tpu.memory_space<vmem>>, %arg5: memref<36x4xbf16, #tpu.memory_space<vmem>>, %arg6: memref<1x4xf32, #tpu.memory_space<vmem>>, %arg7: memref<1x4xf32, #tpu.memory_space<vmem>>, %arg8: memref<4x16xbf16, #tpu.memory_space<vmem>>, %arg9: memref<1x16xf32, #tpu.memory_space<vmem>>, %arg10: memref<1x16xf32, #tpu.memory_space<vmem>>, %arg11: memref<2x64x16xbf16, #tpu.memory_space<vmem>>, %arg12: memref<2x8x8x36xbf16, #tpu.memory_space<vmem>>) attributes {dimension_semantics = [#tpu.dimension_semantics<parallel>], iteration_bounds = array<i64: 2>, scalar_prefetch = 0 : i64, scratch_operands = 1 : i64, tpu.core_type = #tpu.core_type<tc>, window_params = [{transform_indices = @transform_0, window_bounds = array<i64: 2, 64, 16>}, {pipeline_mode = #tpu.pipeline_mode<synchronous>, transform_indices = @transform_1, window_bounds = array<i64: 16, 4>}, {pipeline_mode = #tpu.pipeline_mode<synchronous>, transform_indices = @transform_2, window_bounds = array<i64: 1, 4>}, {pipeline_mode = #tpu.pipeline_mode<synchronous>, transform_indices = @transform_3, window_bounds = array<i64: 1, 4>}, {pipeline_mode = #tpu.pipeline_mode<synchronous>, transform_indices = @transform_4, window_bounds = array<i64: 36, 4>}, {pipeline_mode = #tpu.pipeline_mode<synchronous>, transform_indices = @transform_5, window_bounds = array<i64: 1, 4>}, {pipeline_mode = #tpu.pipeline_mode<synchronous>, transform_indices = @transform_6, window_bounds = array<i64: 1, 4>}, {pipeline_mode = #tpu.pipeline_mode<synchronous>, transform_indices = @transform_7, window_bounds = array<i64: 4, 16>}, {pipeline_mode = #tpu.pipeline_mode<synchronous>, transform_indices = @transform_8, window_bounds = array<i64: 1, 16>}, {pipeline_mode = #tpu.pipeline_mode<synchronous>, transform_indices = @transform_9, window_bounds = array<i64: 1, 16>}, {transform_indices = @transform_10, window_bounds = array<i64: 2, 64, 16>}]} {
    %c0 = arith.constant 0 : index
    %c0_0 = arith.constant 0 : index
    %c0_1 = arith.constant 0 : index
    %0 = vector.load %arg1[%c0, %c0_0, %c0_1] : memref<2x64x16xbf16, #tpu.memory_space<vmem>>, vector<2x64x16xbf16>
    %1 = vector.shape_cast %0 : vector<2x64x16xbf16> to vector<128x16xbf16>
    %c0_2 = arith.constant 0 : index
    %c0_3 = arith.constant 0 : index
    %2 = vector.load %arg2[%c0_2, %c0_3] : memref<16x4xbf16, #tpu.memory_space<vmem>>, vector<16x4xbf16>
    %cst = arith.constant dense<0.000000e+00> : vector<128x4xf32>
    %3 = tpu.matmul %1, %2, %cst {dimension_numbers = #tpu.dot_dimension_numbers<[1], [0], [0], [1], [0, 0, 1, 1], [], []>} : vector<128x16xbf16>, vector<16x4xbf16>, vector<128x4xf32> -> vector<128x4xf32>
    %c0_4 = arith.constant 0 : index
    %c0_5 = arith.constant 0 : index
    %4 = vector.load %arg3[%c0_4, %c0_5] : memref<1x4xf32, #tpu.memory_space<vmem>>, vector<1x4xf32>
    %5 = vector.broadcast %4 : vector<1x4xf32> to vector<128x4xf32>
    %6 = arith.mulf %3, %5 : vector<128x4xf32>
    %c0_6 = arith.constant 0 : index
    %c0_7 = arith.constant 0 : index
    %7 = vector.load %arg4[%c0_6, %c0_7] : memref<1x4xf32, #tpu.memory_space<vmem>>, vector<1x4xf32>
    %8 = vector.broadcast %7 : vector<1x4xf32> to vector<128x4xf32>
    %9 = arith.addf %6, %8 : vector<128x4xf32>
    %cst_8 = arith.constant 0.000000e+00 : f32
    %10 = vector.broadcast %cst_8 : f32 to vector<128x4xf32>
    %11 = arith.maximumf %9, %10 : vector<128x4xf32>
    %12 = arith.truncf %11 : vector<128x4xf32> to vector<128x4xbf16>
    %13 = vector.shape_cast %12 : vector<128x4xbf16> to vector<2x8x8x4xbf16>
    %cst_9 = arith.constant 0.000000e+00 : bf16
    %14 = vector.broadcast %cst_9 : bf16 to vector<2x1x8x4xbf16>
    %cst_10 = arith.constant 0.000000e+00 : bf16
    %15 = vector.broadcast %cst_10 : bf16 to vector<2x8x1x4xbf16>
    %16 = vector.extract_strided_slice %13 {offsets = [0, 0, 0, 0], sizes = [2, 7, 7, 4], strides = [1, 1, 1, 1]} : vector<2x8x8x4xbf16> to vector<2x7x7x4xbf16>
    %c0_11 = arith.constant 0 : index
    %c1 = arith.constant 1 : index
    %c1_12 = arith.constant 1 : index
    %c0_13 = arith.constant 0 : index
    %17 = vector.load %arg12[%c0_11, %c1, %c1_12, %c0_13] : memref<2x8x8x36xbf16, #tpu.memory_space<vmem>>, vector<2x7x7x4xbf16>
    tpu.vector_store %arg12[%c0_11, %c1, %c1_12, %c0_13], %16 {strides = array<i32>} : memref<2x8x8x36xbf16, #tpu.memory_space<vmem>>, vector<2x7x7x4xbf16>,
    %c0_14 = arith.constant 0 : index
    %c0_15 = arith.constant 0 : index
    %c0_16 = arith.constant 0 : index
    %c0_17 = arith.constant 0 : index
    %18 = vector.load %arg12[%c0_14, %c0_15, %c0_16, %c0_17] : memref<2x8x8x36xbf16, #tpu.memory_space<vmem>>, vector<2x1x8x4xbf16>
    tpu.vector_store %arg12[%c0_14, %c0_15, %c0_16, %c0_17], %14 {strides = array<i32>} : memref<2x8x8x36xbf16, #tpu.memory_space<vmem>>, vector<2x1x8x4xbf16>,
    %c0_18 = arith.constant 0 : index
    %c0_19 = arith.constant 0 : index
    %c0_20 = arith.constant 0 : index
    %c0_21 = arith.constant 0 : index
    %19 = vector.load %arg12[%c0_18, %c0_19, %c0_20, %c0_21] : memref<2x8x8x36xbf16, #tpu.memory_space<vmem>>, vector<2x8x1x4xbf16>
    tpu.vector_store %arg12[%c0_18, %c0_19, %c0_20, %c0_21], %15 {strides = array<i32>} : memref<2x8x8x36xbf16, #tpu.memory_space<vmem>>, vector<2x8x1x4xbf16>,
    %20 = vector.extract_strided_slice %13 {offsets = [0, 0, 0, 0], sizes = [2, 7, 8, 4], strides = [1, 1, 1, 1]} : vector<2x8x8x4xbf16> to vector<2x7x8x4xbf16>
    %c0_22 = arith.constant 0 : index
    %c1_23 = arith.constant 1 : index
    %c0_24 = arith.constant 0 : index
    %c4 = arith.constant 4 : index
    %21 = vector.load %arg12[%c0_22, %c1_23, %c0_24, %c4] : memref<2x8x8x36xbf16, #tpu.memory_space<vmem>>, vector<2x7x8x4xbf16>
    tpu.vector_store %arg12[%c0_22, %c1_23, %c0_24, %c4], %20 {strides = array<i32>} : memref<2x8x8x36xbf16, #tpu.memory_space<vmem>>, vector<2x7x8x4xbf16>,
    %c0_25 = arith.constant 0 : index
    %c0_26 = arith.constant 0 : index
    %c0_27 = arith.constant 0 : index
    %c4_28 = arith.constant 4 : index
    %22 = vector.load %arg12[%c0_25, %c0_26, %c0_27, %c4_28] : memref<2x8x8x36xbf16, #tpu.memory_space<vmem>>, vector<2x1x8x4xbf16>
    tpu.vector_store %arg12[%c0_25, %c0_26, %c0_27, %c4_28], %14 {strides = array<i32>} : memref<2x8x8x36xbf16, #tpu.memory_space<vmem>>, vector<2x1x8x4xbf16>,
    %23 = vector.extract_strided_slice %13 {offsets = [0, 0, 1, 0], sizes = [2, 7, 7, 4], strides = [1, 1, 1, 1]} : vector<2x8x8x4xbf16> to vector<2x7x7x4xbf16>
    %c0_29 = arith.constant 0 : index
    %c1_30 = arith.constant 1 : index
    %c0_31 = arith.constant 0 : index
    %c8 = arith.constant 8 : index
    %24 = vector.load %arg12[%c0_29, %c1_30, %c0_31, %c8] : memref<2x8x8x36xbf16, #tpu.memory_space<vmem>>, vector<2x7x7x4xbf16>
    tpu.vector_store %arg12[%c0_29, %c1_30, %c0_31, %c8], %23 {strides = array<i32>} : memref<2x8x8x36xbf16, #tpu.memory_space<vmem>>, vector<2x7x7x4xbf16>,
    %c0_32 = arith.constant 0 : index
    %c0_33 = arith.constant 0 : index
    %c0_34 = arith.constant 0 : index
    %c8_35 = arith.constant 8 : index
    %25 = vector.load %arg12[%c0_32, %c0_33, %c0_34, %c8_35] : memref<2x8x8x36xbf16, #tpu.memory_space<vmem>>, vector<2x1x8x4xbf16>
    tpu.vector_store %arg12[%c0_32, %c0_33, %c0_34, %c8_35], %14 {strides = array<i32>} : memref<2x8x8x36xbf16, #tpu.memory_space<vmem>>, vector<2x1x8x4xbf16>,
    %c0_36 = arith.constant 0 : index
    %c0_37 = arith.constant 0 : index
    %c7 = arith.constant 7 : index
    %c8_38 = arith.constant 8 : index
    %26 = vector.load %arg12[%c0_36, %c0_37, %c7, %c8_38] : memref<2x8x8x36xbf16, #tpu.memory_space<vmem>>, vector<2x8x1x4xbf16>
    tpu.vector_store %arg12[%c0_36, %c0_37, %c7, %c8_38], %15 {strides = array<i32>} : memref<2x8x8x36xbf16, #tpu.memory_space<vmem>>, vector<2x8x1x4xbf16>,
    %27 = vector.extract_strided_slice %13 {offsets = [0, 0, 0, 0], sizes = [2, 8, 7, 4], strides = [1, 1, 1, 1]} : vector<2x8x8x4xbf16> to vector<2x8x7x4xbf16>
    %c0_39 = arith.constant 0 : index
    %c0_40 = arith.constant 0 : index
    %c1_41 = arith.constant 1 : index
    %c12 = arith.constant 12 : index
    %28 = vector.load %arg12[%c0_39, %c0_40, %c1_41, %c12] : memref<2x8x8x36xbf16, #tpu.memory_space<vmem>>, vector<2x8x7x4xbf16>
    tpu.vector_store %arg12[%c0_39, %c0_40, %c1_41, %c12], %27 {strides = array<i32>} : memref<2x8x8x36xbf16, #tpu.memory_space<vmem>>, vector<2x8x7x4xbf16>,
    %c0_42 = arith.constant 0 : index
    %c0_43 = arith.constant 0 : index
    %c0_44 = arith.constant 0 : index
    %c12_45 = arith.constant 12 : index
    %29 = vector.load %arg12[%c0_42, %c0_43, %c0_44, %c12_45] : memref<2x8x8x36xbf16, #tpu.memory_space<vmem>>, vector<2x8x1x4xbf16>
    tpu.vector_store %arg12[%c0_42, %c0_43, %c0_44, %c12_45], %15 {strides = array<i32>} : memref<2x8x8x36xbf16, #tpu.memory_space<vmem>>, vector<2x8x1x4xbf16>,
    %c0_46 = arith.constant 0 : index
    %c0_47 = arith.constant 0 : index
    %c0_48 = arith.constant 0 : index
    %c16 = arith.constant 16 : index
    %30 = vector.load %arg12[%c0_46, %c0_47, %c0_48, %c16] : memref<2x8x8x36xbf16, #tpu.memory_space<vmem>>, vector<2x8x8x4xbf16>
    tpu.vector_store %arg12[%c0_46, %c0_47, %c0_48, %c16], %13 {strides = array<i32>} : memref<2x8x8x36xbf16, #tpu.memory_space<vmem>>, vector<2x8x8x4xbf16>,
    %31 = vector.extract_strided_slice %13 {offsets = [0, 0, 1, 0], sizes = [2, 8, 7, 4], strides = [1, 1, 1, 1]} : vector<2x8x8x4xbf16> to vector<2x8x7x4xbf16>
    %c0_49 = arith.constant 0 : index
    %c0_50 = arith.constant 0 : index
    %c0_51 = arith.constant 0 : index
    %c20 = arith.constant 20 : index
    %32 = vector.load %arg12[%c0_49, %c0_50, %c0_51, %c20] : memref<2x8x8x36xbf16, #tpu.memory_space<vmem>>, vector<2x8x7x4xbf16>
    tpu.vector_store %arg12[%c0_49, %c0_50, %c0_51, %c20], %31 {strides = array<i32>} : memref<2x8x8x36xbf16, #tpu.memory_space<vmem>>, vector<2x8x7x4xbf16>,
    %c0_52 = arith.constant 0 : index
    %c0_53 = arith.constant 0 : index
    %c7_54 = arith.constant 7 : index
    %c20_55 = arith.constant 20 : index
    %33 = vector.load %arg12[%c0_52, %c0_53, %c7_54, %c20_55] : memref<2x8x8x36xbf16, #tpu.memory_space<vmem>>, vector<2x8x1x4xbf16>
    tpu.vector_store %arg12[%c0_52, %c0_53, %c7_54, %c20_55], %15 {strides = array<i32>} : memref<2x8x8x36xbf16, #tpu.memory_space<vmem>>, vector<2x8x1x4xbf16>,
    %34 = vector.extract_strided_slice %13 {offsets = [0, 1, 0, 0], sizes = [2, 7, 7, 4], strides = [1, 1, 1, 1]} : vector<2x8x8x4xbf16> to vector<2x7x7x4xbf16>
    %c0_56 = arith.constant 0 : index
    %c0_57 = arith.constant 0 : index
    %c1_58 = arith.constant 1 : index
    %c24 = arith.constant 24 : index
    %35 = vector.load %arg12[%c0_56, %c0_57, %c1_58, %c24] : memref<2x8x8x36xbf16, #tpu.memory_space<vmem>>, vector<2x7x7x4xbf16>
    tpu.vector_store %arg12[%c0_56, %c0_57, %c1_58, %c24], %34 {strides = array<i32>} : memref<2x8x8x36xbf16, #tpu.memory_space<vmem>>, vector<2x7x7x4xbf16>,
    %c0_59 = arith.constant 0 : index
    %c7_60 = arith.constant 7 : index
    %c0_61 = arith.constant 0 : index
    %c24_62 = arith.constant 24 : index
    %36 = vector.load %arg12[%c0_59, %c7_60, %c0_61, %c24_62] : memref<2x8x8x36xbf16, #tpu.memory_space<vmem>>, vector<2x1x8x4xbf16>
    tpu.vector_store %arg12[%c0_59, %c7_60, %c0_61, %c24_62], %14 {strides = array<i32>} : memref<2x8x8x36xbf16, #tpu.memory_space<vmem>>, vector<2x1x8x4xbf16>,
    %c0_63 = arith.constant 0 : index
    %c0_64 = arith.constant 0 : index
    %c0_65 = arith.constant 0 : index
    %c24_66 = arith.constant 24 : index
    %37 = vector.load %arg12[%c0_63, %c0_64, %c0_65, %c24_66] : memref<2x8x8x36xbf16, #tpu.memory_space<vmem>>, vector<2x8x1x4xbf16>
    tpu.vector_store %arg12[%c0_63, %c0_64, %c0_65, %c24_66], %15 {strides = array<i32>} : memref<2x8x8x36xbf16, #tpu.memory_space<vmem>>, vector<2x8x1x4xbf16>,
    %38 = vector.extract_strided_slice %13 {offsets = [0, 1, 0, 0], sizes = [2, 7, 8, 4], strides = [1, 1, 1, 1]} : vector<2x8x8x4xbf16> to vector<2x7x8x4xbf16>
    %c0_67 = arith.constant 0 : index
    %c0_68 = arith.constant 0 : index
    %c0_69 = arith.constant 0 : index
    %c28 = arith.constant 28 : index
    %39 = vector.load %arg12[%c0_67, %c0_68, %c0_69, %c28] : memref<2x8x8x36xbf16, #tpu.memory_space<vmem>>, vector<2x7x8x4xbf16>
    tpu.vector_store %arg12[%c0_67, %c0_68, %c0_69, %c28], %38 {strides = array<i32>} : memref<2x8x8x36xbf16, #tpu.memory_space<vmem>>, vector<2x7x8x4xbf16>,
    %c0_70 = arith.constant 0 : index
    %c7_71 = arith.constant 7 : index
    %c0_72 = arith.constant 0 : index
    %c28_73 = arith.constant 28 : index
    %40 = vector.load %arg12[%c0_70, %c7_71, %c0_72, %c28_73] : memref<2x8x8x36xbf16, #tpu.memory_space<vmem>>, vector<2x1x8x4xbf16>
    tpu.vector_store %arg12[%c0_70, %c7_71, %c0_72, %c28_73], %14 {strides = array<i32>} : memref<2x8x8x36xbf16, #tpu.memory_space<vmem>>, vector<2x1x8x4xbf16>,
    %41 = vector.extract_strided_slice %13 {offsets = [0, 1, 1, 0], sizes = [2, 7, 7, 4], strides = [1, 1, 1, 1]} : vector<2x8x8x4xbf16> to vector<2x7x7x4xbf16>
    %c0_74 = arith.constant 0 : index
    %c0_75 = arith.constant 0 : index
    %c0_76 = arith.constant 0 : index
    %c32 = arith.constant 32 : index
    %42 = vector.load %arg12[%c0_74, %c0_75, %c0_76, %c32] : memref<2x8x8x36xbf16, #tpu.memory_space<vmem>>, vector<2x7x7x4xbf16>
    tpu.vector_store %arg12[%c0_74, %c0_75, %c0_76, %c32], %41 {strides = array<i32>} : memref<2x8x8x36xbf16, #tpu.memory_space<vmem>>, vector<2x7x7x4xbf16>,
    %c0_77 = arith.constant 0 : index
    %c7_78 = arith.constant 7 : index
    %c0_79 = arith.constant 0 : index
    %c32_80 = arith.constant 32 : index
    %43 = vector.load %arg12[%c0_77, %c7_78, %c0_79, %c32_80] : memref<2x8x8x36xbf16, #tpu.memory_space<vmem>>, vector<2x1x8x4xbf16>
    tpu.vector_store %arg12[%c0_77, %c7_78, %c0_79, %c32_80], %14 {strides = array<i32>} : memref<2x8x8x36xbf16, #tpu.memory_space<vmem>>, vector<2x1x8x4xbf16>,
    %c0_81 = arith.constant 0 : index
    %c0_82 = arith.constant 0 : index
    %c7_83 = arith.constant 7 : index
    %c32_84 = arith.constant 32 : index
    %44 = vector.load %arg12[%c0_81, %c0_82, %c7_83, %c32_84] : memref<2x8x8x36xbf16, #tpu.memory_space<vmem>>, vector<2x8x1x4xbf16>
    tpu.vector_store %arg12[%c0_81, %c0_82, %c7_83, %c32_84], %15 {strides = array<i32>} : memref<2x8x8x36xbf16, #tpu.memory_space<vmem>>, vector<2x8x1x4xbf16>,
    %c0_85 = arith.constant 0 : index
    %c0_86 = arith.constant 0 : index
    %c0_87 = arith.constant 0 : index
    %c0_88 = arith.constant 0 : index
    %45 = vector.load %arg12[%c0_85, %c0_86, %c0_87, %c0_88] : memref<2x8x8x36xbf16, #tpu.memory_space<vmem>>, vector<2x8x8x36xbf16>
    %46 = vector.shape_cast %45 : vector<2x8x8x36xbf16> to vector<128x36xbf16>
    %c0_89 = arith.constant 0 : index
    %c0_90 = arith.constant 0 : index
    %47 = vector.load %arg5[%c0_89, %c0_90] : memref<36x4xbf16, #tpu.memory_space<vmem>>, vector<36x4xbf16>
    %cst_91 = arith.constant dense<0.000000e+00> : vector<128x4xf32>
    %48 = tpu.matmul %46, %47, %cst_91 {dimension_numbers = #tpu.dot_dimension_numbers<[1], [0], [0], [1], [0, 0, 1, 1], [], []>} : vector<128x36xbf16>, vector<36x4xbf16>, vector<128x4xf32> -> vector<128x4xf32>
    %c0_92 = arith.constant 0 : index
    %c0_93 = arith.constant 0 : index
    %49 = vector.load %arg6[%c0_92, %c0_93] : memref<1x4xf32, #tpu.memory_space<vmem>>, vector<1x4xf32>
    %50 = vector.broadcast %49 : vector<1x4xf32> to vector<128x4xf32>
    %51 = arith.mulf %48, %50 : vector<128x4xf32>
    %c0_94 = arith.constant 0 : index
    %c0_95 = arith.constant 0 : index
    %52 = vector.load %arg7[%c0_94, %c0_95] : memref<1x4xf32, #tpu.memory_space<vmem>>, vector<1x4xf32>
    %53 = vector.broadcast %52 : vector<1x4xf32> to vector<128x4xf32>
    %54 = arith.addf %51, %53 : vector<128x4xf32>
    %cst_96 = arith.constant 0.000000e+00 : f32
    %55 = vector.broadcast %cst_96 : f32 to vector<128x4xf32>
    %56 = arith.maximumf %54, %55 : vector<128x4xf32>
    %57 = arith.truncf %56 : vector<128x4xf32> to vector<128x4xbf16>
    %c0_97 = arith.constant 0 : index
    %c0_98 = arith.constant 0 : index
    %58 = vector.load %arg8[%c0_97, %c0_98] : memref<4x16xbf16, #tpu.memory_space<vmem>>, vector<4x16xbf16>
    %cst_99 = arith.constant dense<0.000000e+00> : vector<128x16xf32>
    %59 = tpu.matmul %57, %58, %cst_99 {dimension_numbers = #tpu.dot_dimension_numbers<[1], [0], [0], [1], [0, 0, 1, 1], [], []>} : vector<128x4xbf16>, vector<4x16xbf16>, vector<128x16xf32> -> vector<128x16xf32>
    %c0_100 = arith.constant 0 : index
    %c0_101 = arith.constant 0 : index
    %c0_102 = arith.constant 0 : index
    %60 = vector.load %arg1[%c0_100, %c0_101, %c0_102] : memref<2x64x16xbf16, #tpu.memory_space<vmem>>, vector<2x64x16xbf16>
    %61 = vector.shape_cast %60 : vector<2x64x16xbf16> to vector<128x16xbf16>
    %62 = arith.extf %61 : vector<128x16xbf16> to vector<128x16xf32>
    %c0_103 = arith.constant 0 : index
    %c0_104 = arith.constant 0 : index
    %63 = vector.load %arg9[%c0_103, %c0_104] : memref<1x16xf32, #tpu.memory_space<vmem>>, vector<1x16xf32>
    %64 = vector.broadcast %63 : vector<1x16xf32> to vector<128x16xf32>
    %65 = arith.mulf %59, %64 : vector<128x16xf32>
    %c0_105 = arith.constant 0 : index
    %c0_106 = arith.constant 0 : index
    %66 = vector.load %arg10[%c0_105, %c0_106] : memref<1x16xf32, #tpu.memory_space<vmem>>, vector<1x16xf32>
    %67 = vector.broadcast %66 : vector<1x16xf32> to vector<128x16xf32>
    %68 = arith.addf %65, %67 : vector<128x16xf32>
    %69 = arith.addf %68, %62 : vector<128x16xf32>
    %cst_107 = arith.constant 0.000000e+00 : f32
    %70 = vector.broadcast %cst_107 : f32 to vector<128x16xf32>
    %71 = arith.maximumf %69, %70 : vector<128x16xf32>
    %72 = vector.shape_cast %71 : vector<128x16xf32> to vector<2x64x16xf32>
    %73 = arith.truncf %72 : vector<2x64x16xf32> to vector<2x64x16xbf16>
    %c0_108 = arith.constant 0 : index
    %c0_109 = arith.constant 0 : index
    %c0_110 = arith.constant 0 : index
    %74 = vector.load %arg11[%c0_108, %c0_109, %c0_110] : memref<2x64x16xbf16, #tpu.memory_space<vmem>>, vector<2x64x16xbf16>
    tpu.vector_store %arg11[%c0_108, %c0_109, %c0_110], %73 {strides = array<i32>} : memref<2x64x16xbf16, #tpu.memory_space<vmem>>, vector<2x64x16xbf16>,
    return
  }
  func.func @transform_0(%arg0: i32) -> (i32, i32, i32) {
    %c0_i32 = arith.constant 0 : i32
    %c0_i32_0 = arith.constant 0 : i32
    %c0_i32_1 = arith.constant 0 : i32
    return %arg0, %c0_i32, %c0_i32_0 : i32, i32, i32
  }
  func.func @transform_1(%arg0: i32) -> (i32, i32) {
    %c0_i32 = arith.constant 0 : i32
    %c0_i32_0 = arith.constant 0 : i32
    %c0_i32_1 = arith.constant 0 : i32
    return %c0_i32, %c0_i32_0 : i32, i32
  }
  func.func @transform_2(%arg0: i32) -> (i32, i32) {
    %c0_i32 = arith.constant 0 : i32
    %c0_i32_0 = arith.constant 0 : i32
    %c0_i32_1 = arith.constant 0 : i32
    return %c0_i32, %c0_i32_0 : i32, i32
  }
  func.func @transform_3(%arg0: i32) -> (i32, i32) {
    %c0_i32 = arith.constant 0 : i32
    %c0_i32_0 = arith.constant 0 : i32
    %c0_i32_1 = arith.constant 0 : i32
    return %c0_i32, %c0_i32_0 : i32, i32
  }
  func.func @transform_4(%arg0: i32) -> (i32, i32) {
    %c0_i32 = arith.constant 0 : i32
    %c0_i32_0 = arith.constant 0 : i32
    %c0_i32_1 = arith.constant 0 : i32
    return %c0_i32, %c0_i32_0 : i32, i32
  }
  func.func @transform_5(%arg0: i32) -> (i32, i32) {
    %c0_i32 = arith.constant 0 : i32
    %c0_i32_0 = arith.constant 0 : i32
    %c0_i32_1 = arith.constant 0 : i32
    return %c0_i32, %c0_i32_0 : i32, i32
  }
  func.func @transform_6(%arg0: i32) -> (i32, i32) {
    %c0_i32 = arith.constant 0 : i32
    %c0_i32_0 = arith.constant 0 : i32
    %c0_i32_1 = arith.constant 0 : i32
    return %c0_i32, %c0_i32_0 : i32, i32
  }
  func.func @transform_7(%arg0: i32) -> (i32, i32) {
    %c0_i32 = arith.constant 0 : i32
    %c0_i32_0 = arith.constant 0 : i32
    %c0_i32_1 = arith.constant 0 : i32
    return %c0_i32, %c0_i32_0 : i32, i32
  }
  func.func @transform_8(%arg0: i32) -> (i32, i32) {
    %c0_i32 = arith.constant 0 : i32
    %c0_i32_0 = arith.constant 0 : i32
    %c0_i32_1 = arith.constant 0 : i32
    return %c0_i32, %c0_i32_0 : i32, i32
  }
  func.func @transform_9(%arg0: i32) -> (i32, i32) {
    %c0_i32 = arith.constant 0 : i32
    %c0_i32_0 = arith.constant 0 : i32
    %c0_i32_1 = arith.constant 0 : i32
    return %c0_i32, %c0_i32_0 : i32, i32
  }
  func.func @transform_10(%arg0: i32) -> (i32, i32, i32) {
    %c0_i32 = arith.constant 0 : i32
    %c0_i32_0 = arith.constant 0 : i32
    %c0_i32_1 = arith.constant 0 : i32
    return %arg0, %c0_i32, %c0_i32_0 : i32, i32, i32
  }
}

</mosaic_0001>

<bundles_post_ra>
// kernel: tpu_custom_call.1
= control target key start
LH: loop header
LB: loop body
LE: loop exit
PB: predicated region body
PF: predicated region fallthrough
CT: control target
= control target key end

     0   :  { %s2550_s13 = smov 0   ;;  %s3836_s0 = inlined_call_operand.vmem [shape: bf16[4,64,16], index: 0, kind: input, shape index: {}]   ;;  %s3837_s1 = inlined_call_operand.vmem [shape: bf16[16,4], index: 1, kind: input, shape index: {}]   ;;  %s3838_s2 = inlined_call_operand.vmem [shape: f32[1,4], index: 2, kind: input, shape index: {}]   ;;  %s3839_s3 = inlined_call_operand.vmem [shape: f32[1,4], index: 3, kind: input, shape index: {}]   ;;  %s3840_s4 = inlined_call_operand.vmem [shape: bf16[36,4], index: 4, kind: input, shape index: {}]   ;;  %s3841_s5 = inlined_call_operand.vmem [shape: f32[1,4], index: 5, kind: input, shape index: {}]   ;;  %s3842_s6 = inlined_call_operand.vmem [shape: f32[1,4], index: 6, kind: input, shape index: {}]   ;;  %s3843_s7 = inlined_call_operand.vmem [shape: bf16[4,16], index: 7, kind: input, shape index: {}]   ;;  %s3844_s8 = inlined_call_operand.vmem [shape: f32[1,16], index: 8, kind: input, shape index: {}]   ;;  %s3845_s9 = inlined_call_operand.vmem [shape: f32[1,16], index: 9, kind: input, shape index: {}]   ;;  %s3846_s10 = inlined_call_operand.vmem [shape: bf16[4,64,16], index: 10, kind: output, shape index: {}]  }
   0x1 LB: > { %s2275_s14 = sadd.s32 4294967295, %s2484_s13   ;;  %p2279_p0 = scmp.ge.s32.totalorder %s2484_s13, 1  ;;  %s2484_s13 = sphi %s2550_s13, %s20_s13  }
   0x2   : > { %p314_p1 = scmp.lt.s32.totalorder %s2484_s13, 3 }
   0x4   : > { %p315_p2 = pnand %p2279_p0, %p314_p1 }
   0x5   : > { %s2280_s17 = sshll.u32 (!%p315_p2), %s2275_s14, 1  ;;  %s2486_s26 = smov (!%p315_p2), 16  }
   0x6   : > { %318 = sbr.rel (%p315_p2) target bundleno = 903 (0x387), region = 60  ;;  %p355_p3 = scmp.lt.s32.totalorder (!%p315_p2), %s2280_s17, 3 }
   0x7   : > { %s2487_s27 = smov (!%p315_p2), 4   ;;  %s2488_s28 = smov (!%p315_p2), 12  }
   0x8   : > { %s2489_s29 = smov (!%p315_p2), 8   ;;  %s2490_s30 = smov (!%p315_p2), 20  }
   0x9   : > { %s2491_s11 = smov (!%p315_p2), 24   ;;  %s2492_s12 = smov (!%p315_p2), 28  }
   0xa   : > { %s2493_s14 = smov (!%p315_p2), 32  }
   0xb   : > { %v2398_v0 = vld [vmem:[%s3837_s1] sm:$0xff]  ;;  %s3887_s17 = smov (!%p355_p3, %s2280_s17), 3  ;;  %vm433_vm0 = vcmask 130048   ;;  %vm692_vm1 = vcmask 27648   ;;  %vm693_vm2 = vsmask.f32 7938 }
   0xc   : > { %465 = vmatpush.bf16.msra.mxu0 %v2398_v0  ;;  %2448 = vmatpush.bf16.msra.mxu3 %v2398_v0  ;;  %s2388_s18 = sshll.u32 %s3887_s17, 5  ;;  %v2586_v7 = vld [vmem:[%s3838_s2] ss:$0 sm:$0xff]  ;;  %vm2603_vm3 = vmand %vm692_vm1, %vm693_vm2  ;;  %v695_v25 = vld [vmem:[#allocation2 + $0x4] sm:$0xf]  ;;  %vm740_vm4 = vcmask 24576  }
   0xd   : > { %s2569_s21 = scalar_lea.vmem %s3836_s0, %s2388_s18  ;;  %v2591_v8 = vld [vmem:[%s3839_s3] ss:$0 sm:$0xff]  ;;  %vm741_vm5 = vsmask.f32 256  ;;  %v734_v37 = vld [vmem:[#allocation2 + $0x3c] sm:$0xf]  ;;  %s3738_s24 = scalar_lea.vmem %s3846_s10, %s2388_s18 }
   0xe   : > { %v2390_v1 = vld [vmem:[%s2569_s21] sm:$0xff]  ;;  %v2397_v2 = vld [vmem:[%s2569_s21 + $0x38] sm:$0xff]  ;;  %v2391_v3 = vld [vmem:[%s2569_s21 + $0x8] sm:$0xff]  ;;  %vm3851_vm7 = vcmask 60448   ;;  %vm3847_vm8 = vcmask 93248   ;;  %vm1010_vm9 = vcmask 93251  }
   0xf   : > { %2322 = vmatmul.msk.bf16.vlgmr.msra.gmra.mxu0 %vm433_vm0, %v2390_v1  ;;  %2329 = vmatmul.msk.bf16.vlgmr.msra.gmra.mxu3 %vm433_vm0, %v2397_v2  ;;  %v2392_v4 = vld [vmem:[%s2569_s21 + $0x10] sm:$0xff]  ;;  %v2393_v5 = vld [vmem:[%s2569_s21 + $0x18] sm:$0xff]  ;;  %v2394_v6 = vld [vmem:[%s2569_s21 + $0x20] sm:$0xff]  ;;  %vm3849_vm10 = vsmask.f32 7950  ;;  %vm1123_vm12 = vcmask 126048  }
  0x10   : > { %v2395_v38 = vld [vmem:[%s2569_s21 + $0x28] sm:$0xff]  ;;  %vm2631_vm6 = vmand %vm740_vm4, %vm741_vm5  ;;  %vm1173_vm14 = vcmask 122976  }
  0x11   : > { %v698_v43 = vld [vmem:[#allocation2 + $0x8] sm:$0xf]  ;;  %v701_v61 = vld [vmem:[#allocation2 + $0xc] sm:$0xf]  ;;  %vm2799_vm11 = vmand %vm1010_vm9, %vm3849_vm10  ;;  %vm1346_vm9 = vcmask 191648  }
  0x12   : > { %vm2847_vm13 = vmand %vm1123_vm12, %vm693_vm2 }
  0x13   : > { %vm2870_vm15 = vmand %vm1173_vm14, %vm741_vm5  ;;  %vm1396_vm14 = vcmask 191651  }
  0x1f   : > { %2323 = vmatmul.msk.bf16.gmra.mxu0 %vm433_vm0, %v2391_v3 }
  0x2f   : > { %2324 = vmatmul.msk.bf16.gmra.mxu0 %vm433_vm0, %v2392_v4 }
  0x3f   : > { %2325 = vmatmul.msk.bf16.gmra.mxu0 %vm433_vm0, %v2393_v5 }
  0x4f   : > { %2326 = vmatmul.msk.bf16.gmra.mxu0 %vm433_vm0, %v2394_v6 }
  0x5f   : > { %2327 = vmatmul.msk.bf16.gmra.mxu0 %vm433_vm0, %v2395_v38 }
  0x8c   : > { %v467_v9 = vpop.f32.mrf.mxu0 }
  0x8d   : > { %v511_v10 = vmul.f32 %v2586_v7, %v467_v9 }
  0x8f   : > { %v531_v11 = vadd.f32 %v2591_v8, %v511_v10 }
  0x91   : > { %v547_v12 = vmax.f32 %v531_v11, 0.0 }
  0x92   : > { %v502_v13 = vpop.f32.mrf.mxu3 }
  0x93   : > { %v563_v14 = vpack.c.bf16 %v547_v12, %v547_v12  ;;  %v525_v15 = vmul.f32 %v2586_v7, %v502_v13 }
  0x94   : > { %v469_v16 = vpop.f32.mrf.mxu0 }
  0x95   : > { %v545_v17 = vadd.f32 %v2591_v8, %v525_v15  ;;  %v512_v18 = vmul.f32 %v2586_v7, %v469_v16  ;;  %1225 = vrot.lane.b32.xlu1 %v563_v14, %s2486_s26  ;;  %805 = vrot.lane.b32.xlu0 %v563_v14, %s2487_s27  ;;  %v580_v19 = vshrl.u32 %v563_v14, 16  ;;  %v583_v23 = vshll.u32 %v563_v14, 16 }
  0x97   : > { %v561_v20 = vmax.f32 %v545_v17, 0.0  ;;  %v532_v21 = vadd.f32 %v2591_v8, %v512_v18  ;;  %v582_v22 = vrot.slane %v580_v19, 7  ;;  %v864_v50 = vrot.slane %v580_v19, 4  ;;  %v704_v18 = vld [vmem:[#allocation2 + $0x10] sm:$0xf] }
  0x98   : > { %v865_v51 = vrot.slane %v583_v23, 5 }
  0x99   : > { %v2607_v26 = vpack.c.bf16 %v561_v20, %v561_v20  ;;  %v548_v27 = vmax.f32 %v532_v21, 0.0  ;;  %v585_v28 = vor.u32 %v583_v23, %v582_v22 }
  0x9a   : > { %v866_v59 = vor.u32 %v865_v51, %v864_v50 }
  0x9b   : > { %v2609_v29 = vpack.c.bf16 %v548_v27, %v548_v27  ;;  %v696_v30 = vsel %vm2603_vm3, %v585_v28, %v695_v25  ;;  %v671_v31 = vshrl.u32 %v2607_v26, 16  ;;  %v674_v33 = vshll.u32 %v2607_v26, 16 }
  0x9c   : > { %v472_v32 = vpop.f32.mrf.mxu0  ;;  %697 = vst [vmem:[#allocation2 + $0x4] sm:$0xf] %v696_v30  ;;  %v867_v3 = vrot.slane %v866_v59, 4 }
  0x9d   : > { %v513_v34 = vmul.f32 %v2586_v7, %v472_v32  ;;  %1253 = vrot.lane.b32.xlu1 %v2607_v26, %s2486_s26  ;;  %1075 = vrot.lane.b32.xlu0 %v585_v28, %s2488_s28  ;;  %v673_v35 = vrot.slane %v671_v31, 7  ;;  %v587_v36 = vshrl.u32 %v2609_v29, 16  ;;  %v590_v42 = vshll.u32 %v2609_v29, 16 }
  0x9e   : > { %1227 = vrot.lane.b32.xlu2 %v2609_v29, %s2486_s26  ;;  %v916_v9 = vrot.slane %v671_v31, 4  ;;  %v917_v10 = vrot.slane %v674_v33, 5 }
  0x9f   : > { %v533_v39 = vadd.f32 %v2591_v8, %v513_v34  ;;  %v2624_v40 = vor.u32 %v674_v33, %v673_v35  ;;  %v589_v41 = vrot.slane %v587_v36, 7  ;;  %v868_v31 = vrot.slane %v587_v36, 4  ;;  %v2396_v36 = vld [vmem:[%s2569_s21 + $0x30] sm:$0xff] }
  0xa0   : > { %v918_v17 = vor.u32 %v917_v10, %v916_v9  ;;  %v869_v32 = vrot.slane %v590_v42, 5  ;;  %2328 = vmatmul.msk.bf16.gmra.mxu0 %vm433_vm0, %v2396_v36  ;;  %vm1273_vm0 = vcmask 158848  }
  0xa1   : > { %v549_v44 = vmax.f32 %v533_v39, 0.0  ;;  %v735_v46 = vsel %vm2603_vm3, %v2624_v40, %v734_v37  ;;  %v2640_v47 = vor.u32 %v590_v42, %v589_v41 }
  0xa2   : > { %736 = vst [vmem:[#allocation2 + $0x3c] sm:$0xf] %v735_v46  ;;  %v2689_v28 = vrot.slane %v918_v17, 4  ;;  %v870_v42 = vor.u32 %v869_v32, %v868_v31 }
  0xa3   : > { %v2642_v48 = vpack.c.bf16 %v549_v44, %v549_v44  ;;  %v746_v49 = vld [vmem:[#allocation2 + $0x4] sm:$0x1]  ;;  %v699_v52 = vsel %vm2603_vm3, %v2640_v47, %v698_v43  ;;  %v707_v44 = vld [vmem:[#allocation2 + $0x14] sm:$0xf] }
  0xa4   : > { %v747_v53 = vsel %vm2631_vm6, 0, %v746_v49  ;;  %v474_v54 = vpop.f32.mrf.mxu0  ;;  %700 = vst [vmem:[#allocation2 + $0x8] sm:$0xf] %v699_v52  ;;  %v871_v52 = vrot.slane %v870_v42, 4 }
  0xa5   : > { %748 = vst [vmem:[#allocation2 + $0x4] sm:$0x1] %v747_v53  ;;  %v514_v55 = vmul.f32 %v2586_v7, %v474_v54  ;;  %831 = vrot.lane.b32.xlu0 %v2607_v26, %s2487_s27  ;;  %807 = vrot.lane.b32.xlu1 %v2609_v29, %s2487_s27  ;;  %v594_v56 = vshrl.u32 %v2642_v48, 16  ;;  %v597_v57 = vshll.u32 %v2642_v48, 16 }
  0xa6   : > { %1103 = vrot.lane.b32.xlu2 %v2624_v40, %s2488_s28 }
  0xa7   : > { %v534_v58 = vadd.f32 %v2591_v8, %v514_v55  ;;  %v596_v60 = vrot.slane %v594_v56, 7  ;;  %v872_v22 = vrot.slane %v594_v56, 4  ;;  %v873_v23 = vrot.slane %v597_v57, 5 }
  0xa9   : > { %v550_v62 = vmax.f32 %v534_v58, 0.0  ;;  %v788_v63 = vld [vmem:[#allocation2 + $0x3c] sm:$0x1]  ;;  %v2659_v0 = vor.u32 %v597_v57, %v596_v60  ;;  %v874_v38 = vor.u32 %v873_v23, %v872_v22  ;;  %v710_v57 = vld [vmem:[#allocation2 + $0x18] sm:$0xf] }
  0xaa   : > { %v789_v1 = vsel %vm2631_vm6, 0, %v788_v63 }
  0xab   : > { %v2663_v2 = vpack.c.bf16 %v550_v62, %v550_v62  ;;  %790 = vst [vmem:[#allocation2 + $0x3c] sm:$0x1] %v789_v1  ;;  %v749_v4 = vld [vmem:[#allocation2 + $0x8] sm:$0x1]  ;;  %v702_v5 = vsel %vm2603_vm3, %v2659_v0, %v701_v61  ;;  %v2711_v46 = vrot.slane %v874_v38, 4 }
  0xac   : > { %v750_v6 = vsel %vm2631_vm6, 0, %v749_v4  ;;  %703 = vst [vmem:[#allocation2 + $0xc] sm:$0xf] %v702_v5  ;;  %v477_v11 = vpop.f32.mrf.mxu0 }
  0xad   : > { %920 = vrot.lane.b32.xlu0 %v867_v3, %s2489_s29  ;;  %1298 = vrot.lane.b32.xlu1 %v867_v3, %s2490_s30  ;;  %751 = vst [vmem:[#allocation2 + $0x8] sm:$0x1] %v750_v6  ;;  %v515_v12 = vmul.f32 %v2586_v7, %v477_v11  ;;  %v601_v13 = vshrl.u32 %v2663_v2, 16  ;;  %v604_v14 = vshll.u32 %v2663_v2, 16 }
  0xae   : > { %1446 = vrot.lane.b32.xlu2 %v2640_v47, %s2491_s11 }
  0xaf   : > { %v535_v15 = vadd.f32 %v2591_v8, %v515_v12  ;;  %v603_v16 = vrot.slane %v601_v13, 7  ;;  %v876_v1 = vrot.slane %v601_v13, 4  ;;  %v877_v3 = vrot.slane %v604_v14, 5 }
  0xb0   : > { %v2494_v13 = vmov 0  }
  0xb1   : > { %v551_v19 = vmax.f32 %v535_v15, 0.0  ;;  %v2682_v20 = vor.u32 %v604_v14, %v603_v16  ;;  %v878_v9 = vor.u32 %v877_v3, %v876_v1  ;;  %738 = vst.msk [vmem:[#allocation2] sm:$0xf] %vm692_vm1, %v2494_v13  ;;  %v713_v16 = vld [vmem:[#allocation2 + $0x1c] sm:$0xf] }
  0xb2   : > { %739 = vst.msk [vmem:[#allocation2 + $0x20] sm:$0xf] %vm692_vm1, %v2494_v13  ;;  %vm963_vm1 = vsmask.f32 3328 }
  0xb3   : > { %v752_v21 = vld [vmem:[#allocation2 + $0xc] sm:$0x1]  ;;  %v2684_v25 = vpack.c.bf16 %v551_v19, %v551_v19  ;;  %v705_v27 = vsel %vm2603_vm3, %v2682_v20, %v704_v18  ;;  %v2759_v11 = vrot.slane %v878_v9, 4  ;;  %vm2900_vm4 = vmand %vm3847_vm8, %vm963_vm1 }
  0xb4   : > { %v753_v30 = vsel %vm2631_vm6, 0, %v752_v21  ;;  %v479_v33 = vpop.f32.mrf.mxu0  ;;  %706 = vst [vmem:[#allocation2 + $0x10] sm:$0xf] %v705_v27  ;;  %vm2922_vm12 = vmand %vm1346_vm9, %vm963_vm1 }
  0xb5   : > { %1586 = vrot.lane.b32.xlu1 %v2609_v29, %s2492_s12  ;;  %1448 = vrot.lane.b32.xlu0 %v2659_v0, %s2491_s11  ;;  %754 = vst [vmem:[#allocation2 + $0xc] sm:$0x1] %v753_v30  ;;  %v516_v34 = vmul.f32 %v2586_v7, %v479_v33  ;;  %v608_v35 = vshrl.u32 %v2684_v25, 16  ;;  %v611_v37 = vshll.u32 %v2684_v25, 16  ;;  %vm2953_vm9 = vmand %vm1396_vm14, %vm3849_vm10  ;;  %vm3848_vm14 = vcmask 224448  }
  0xb6   : > { %946 = vrot.lane.b32.xlu2 %v2689_v28, %s2489_s29  ;;  %vm1628_vm10 = vcmask 257248  }
  0xb7   : > { %v536_v39 = vadd.f32 %v2591_v8, %v516_v34  ;;  %v610_v41 = vrot.slane %v608_v35, 7  ;;  %v880_v17 = vrot.slane %v608_v35, 4  ;;  %v881_v18 = vrot.slane %v611_v37, 5 }
  0xb8   : > { %v743_v21 = vld [vmem:[#allocation2] sm:$0x1] }
  0xb9   : > { %v552_v29 = vmax.f32 %v536_v39, 0.0  ;;  %v2709_v43 = vor.u32 %v611_v37, %v610_v41  ;;  %v744_v22 = vsel %vm2631_vm6, 0, %v743_v21  ;;  %v882_v23 = vor.u32 %v881_v18, %v880_v17 }
  0xba   : > { %745 = vst [vmem:[#allocation2] sm:$0x1] %v744_v22  ;;  %v716_v22 = vld [vmem:[#allocation2 + $0x24] sm:$0xf] }
  0xbb   : > { %v2713_v49 = vpack.c.bf16 %v552_v29, %v552_v29  ;;  %v755_v50 = vld [vmem:[#allocation2 + $0x10] sm:$0x1]  ;;  %v708_v51 = vsel %vm2603_vm3, %v2709_v43, %v707_v44  ;;  %862 = vst.msk [vmem:[#allocation2] sm:$0xf] %vm3851_vm7, %v2494_v13  ;;  %v883_v27 = vrot.slane %v882_v23, 4 }
  0xbc   : > { %v756_v53 = vsel %vm2631_vm6, 0, %v755_v50  ;;  %709 = vst [vmem:[#allocation2 + $0x14] sm:$0xf] %v708_v51 }
  0xbd   : > { %1077 = vrot.lane.b32.xlu1 %v2640_v47, %s2488_s28  ;;  %1302 = vrot.lane.b32.xlu0 %v2711_v46, %s2490_s30  ;;  %757 = vst [vmem:[#allocation2 + $0x10] sm:$0x1] %v756_v53  ;;  %v615_v54 = vshrl.u32 %v2713_v49, 16  ;;  %v618_v55 = vshll.u32 %v2713_v49, 16  ;;  %v482_v47 = vpop.f32.mrf.mxu0 }
  0xbe   : > { %922 = vrot.lane.b32.xlu2 %v871_v52, %s2489_s29  ;;  %v517_v62 = vmul.f32 %v2586_v7, %v482_v47  ;;  %1008 = vst.msk [vmem:[#allocation2] sm:$0xf] %vm3847_vm8, %v2494_v13  ;;  %vm2981_vm8 = vmand %vm3848_vm14, %vm693_vm2  ;;  %vm1536_vm2 = vcmask 221376  }
  0xbf   : > { %v617_v56 = vrot.slane %v615_v54, 7  ;;  %v884_v34 = vrot.slane %v615_v54, 4  ;;  %v885_v35 = vrot.slane %v618_v55, 5  ;;  %vm3024_vm14 = vmand %vm1536_vm2, %vm741_vm5  ;;  %vm3850_vm5 = vcmask 290048  }
  0xc0   : > { %v537_v63 = vadd.f32 %v2591_v8, %v517_v62  ;;  %vm3069_vm2 = vmand %vm3850_vm5, %vm963_vm1  ;;  %vm1734_vm1 = vcmask 290051   ;;  %vm3874_vm5 = vsmask.f32 7950 }
  0xc1   : > { %v2731_v58 = vor.u32 %v618_v55, %v617_v56 }
  0xc2   : > { %v553_v5 = vmax.f32 %v537_v63, 0.0 }
  0xc3   : > { %v758_v59 = vld [vmem:[#allocation2 + $0x14] sm:$0x1]  ;;  %v711_v60 = vsel %vm2603_vm3, %v2731_v58, %v710_v57 }
  0xc4   : > { %v759_v61 = vsel %vm2631_vm6, 0, %v758_v59  ;;  %712 = vst [vmem:[#allocation2 + $0x18] sm:$0xf] %v711_v60  ;;  %v2757_v10 = vpack.c.bf16 %v553_v5, %v553_v5 }
  0xc5   : > { %809 = vrot.lane.b32.xlu1 %v2642_v48, %s2487_s27  ;;  %1647 = vrot.lane.b32.xlu0 %v2711_v46, %s2493_s14  ;;  %760 = vst [vmem:[#allocation2 + $0x14] sm:$0x1] %v759_v61  ;;  %v1013_v32 = vld [vmem:[#allocation2] sm:$0x8]  ;;  %v484_v38 = vpop.f32.mrf.mxu0 }
  0xc6   : > { %1300 = vrot.lane.b32.xlu2 %v871_v52, %s2490_s30  ;;  %v622_v12 = vshrl.u32 %v2757_v10, 16  ;;  %v1014_v33 = vsel %vm2799_vm11, 0, %v1013_v32  ;;  %v518_v62 = vmul.f32 %v2586_v7, %v484_v38 }
  0xc7   : > { %1015 = vst [vmem:[#allocation2] sm:$0x8] %v1014_v33 }
  0xc8   : > { %v624_v14 = vrot.slane %v622_v12, 7  ;;  %v538_v5 = vadd.f32 %v2591_v8, %v518_v62 }
  0xcb   : > { %v761_v4 = vld [vmem:[#allocation2 + $0x18] sm:$0x1] }
  0xcc   : > { %v762_v6 = vsel %vm2631_vm6, 0, %v761_v4 }
  0xcd   : > { %1229 = vrot.lane.b32.xlu1 %v2642_v48, %s2486_s26  ;;  %1081 = vrot.lane.b32.xlu0 %v2682_v20, %s2488_s28  ;;  %763 = vst [vmem:[#allocation2 + $0x18] sm:$0x1] %v762_v6  ;;  %v487_v41 = vpop.f32.mrf.mxu0 }
  0xce   : > { %1588 = vrot.lane.b32.xlu2 %v2642_v48, %s2492_s12  ;;  %v625_v48 = vshll.u32 %v2757_v10, 16  ;;  %v1125_v50 = vld [vmem:[#allocation2] sm:$0xf]  ;;  %v519_v51 = vmul.f32 %v2586_v7, %v487_v41 }
  0xd0   : > { %v2774_v15 = vor.u32 %v625_v48, %v624_v14  ;;  %v889_v44 = vrot.slane %v625_v48, 5  ;;  %v539_v56 = vadd.f32 %v2591_v8, %v519_v51 }
  0xd2   : > { %v714_v19 = vsel %vm2603_vm3, %v2774_v15, %v713_v16  ;;  %v555_v60 = vmax.f32 %v539_v56, 0.0 }
  0xd3   : > { %715 = vst [vmem:[#allocation2 + $0x1c] sm:$0xf] %v714_v19  ;;  %v554_v19 = vmax.f32 %v538_v5, 0.0 }
  0xd4   : > { %v2862_v1 = vpack.c.bf16 %v555_v60, %v555_v60 }
  0xd5   : > { %1304 = vrot.lane.b32.xlu1 %v2759_v11, %s2490_s30  ;;  %813 = vrot.lane.b32.xlu0 %v2684_v25, %s2487_s27  ;;  %v2915_v33 = vpack.c.bf16 %v554_v19, %v554_v19 }
  0xd6   : > { %1645 = vrot.lane.b32.xlu2 %v871_v52, %s2493_s14  ;;  %v632_v16 = vshll.u32 %v2862_v1, 16 }
  0xd7   : > { %v1065_v60 = vshll.u32 %v2915_v33, 16 }
  0xda   : > { %v764_v30 = vld [vmem:[#allocation2 + $0x1c] sm:$0x1] }
  0xdb   : > { %v765_v31 = vsel %vm2631_vm6, 0, %v764_v30 }
  0xdc   : > { %766 = vst [vmem:[#allocation2 + $0x1c] sm:$0x1] %v765_v31 }
  0xdd   : > { %926 = vrot.lane.b32.xlu0 %v2759_v11, %s2489_s29  ;;  %1083 = vrot.lane.b32.xlu1 %v2709_v43, %s2488_s28 }
  0xde   : > { %1079 = vrot.lane.b32.xlu2 %v2659_v0, %s2488_s28 }
  0xe5   : > { %1233 = vrot.lane.b32.xlu0 %v2684_v25, %s2486_s26  ;;  %928 = vrot.lane.b32.xlu1 %v883_v27, %s2489_s29 }
  0xe6   : > { %924 = vrot.lane.b32.xlu2 %v2711_v46, %s2489_s29  ;;  %v489_v46 = vpop.f32.mrf.mxu0 }
  0xe7   : > { %v520_v52 = vmul.f32 %v2586_v7, %v489_v46 }
  0xe9   : > { %v540_v57 = vadd.f32 %v2591_v8, %v520_v52  ;;  %v1062_v52 = vshrl.u32 %v2915_v33, 16 }
  0xeb   : > { %v556_v61 = vmax.f32 %v540_v57, 0.0 }
  0xed   : > { %1592 = vrot.lane.b32.xlu0 %v2684_v25, %s2492_s12  ;;  %1235 = vrot.lane.b32.xlu1 %v2713_v49, %s2486_s26  ;;  %v886_v25 = vor.u32 %v885_v35, %v884_v34  ;;  %v2864_v3 = vpack.c.bf16 %v556_v61, %v556_v61 }
  0xee   : > { %811 = vrot.lane.b32.xlu2 %v2663_v2, %s2487_s27 }
  0xef   : > { %v2823_v37 = vrot.slane %v886_v25, 4  ;;  %v639_v18 = vshll.u32 %v2864_v3, 16 }
  0xf5   : > { %1452 = vrot.lane.b32.xlu0 %v2709_v43, %s2491_s11  ;;  %817 = vrot.lane.b32.xlu1 %v2757_v10, %s2487_s27 }
  0xf6   : > { %1231 = vrot.lane.b32.xlu2 %v2663_v2, %s2486_s26 }
  0xf8   : > { %v2821_v36 = vpop.permute.xlu2 %1227 }
  0xfd   : > { %815 = vrot.lane.b32.xlu0 %v2713_v49, %s2487_s27  ;;  %1308 = vrot.lane.b32.xlu1 %v2823_v37, %s2490_s30 }
  0xfe   : > { %1590 = vrot.lane.b32.xlu2 %v2663_v2, %s2492_s12  ;;  %v888_v2 = vrot.slane %v622_v12, 4 }
 0x100   : > { %v2831_v39 = vpop.permute.xlu2 %1103  ;;  %v890_v55 = vor.u32 %v889_v44, %v888_v2  ;;  %v492_v44 = vpop.f32.mrf.mxu0 }
 0x102   : > { %v891_v63 = vrot.slane %v890_v55, 4 }
 0x105   : > { %1306 = vrot.lane.b32.xlu0 %v883_v27, %s2490_s30  ;;  %1237 = vrot.lane.b32.xlu1 %v2757_v10, %s2486_s26 }
 0x106   : > { %1450 = vrot.lane.b32.xlu2 %v2682_v20, %s2491_s11 }
 0x107   : > { %v1226_v42 = vpop.permute.xlu1 %1225  ;;  %v806_v29 = vpop.permute.xlu0 %805 }
 0x108   : > { %848 = vst.msk [vmem:[#allocation2 + $0x4] sm:$0xf] %vm3851_vm7, %v806_v29  ;;  %v2839_v43 = vpop.permute.xlu2 %1446  ;;  %v494_v5 = vpop.f32.mrf.mxu0 }
 0x10d   : > { %1651 = vrot.lane.b32.xlu0 %v883_v27, %s2493_s14  ;;  %1596 = vrot.lane.b32.xlu1 %v2757_v10, %s2492_s12  ;;  %v629_v10 = vshrl.u32 %v2862_v1, 16  ;;  %v719_v27 = vld [vmem:[#allocation2 + $0x28] sm:$0xf] }
 0x10e   : > { %1649 = vrot.lane.b32.xlu2 %v2759_v11, %s2493_s14  ;;  %v636_v11 = vshrl.u32 %v2864_v3, 16 }
 0x10f   : > { %v2855_v53 = vpop.permute.xlu1 %1253  ;;  %v1076_v54 = vpop.permute.xlu0 %1075  ;;  %v631_v14 = vrot.slane %v629_v10, 7  ;;  %v965_v34 = vld [vmem:[#allocation2 + $0x4] sm:$0xf] }
 0x110   : > { %v1126_v59 = vsel %vm2847_vm13, %v1076_v54, %v1125_v50  ;;  %v947_v47 = vpop.permute.xlu2 %946  ;;  %v638_v17 = vrot.slane %v636_v11, 7 }
 0x111   : > { %1127 = vst [vmem:[#allocation2] sm:$0xf] %v1126_v59  ;;  %v2892_v21 = vor.u32 %v632_v16, %v631_v14 }
 0x112   : > { %v2896_v23 = vor.u32 %v639_v18, %v638_v17 }
 0x113   : > { %v717_v31 = vsel %vm2603_vm3, %v2892_v21, %v716_v22 }
 0x114   : > { %718 = vst [vmem:[#allocation2 + $0x24] sm:$0xf] %v717_v31  ;;  %v720_v32 = vsel %vm2603_vm3, %v2896_v23, %v719_v27 }
 0x115   : > { %1594 = vrot.lane.b32.xlu0 %v2713_v49, %s2492_s12  ;;  %1310 = vrot.lane.b32.xlu1 %v891_v63, %s2490_s30  ;;  %721 = vst [vmem:[#allocation2 + $0x28] sm:$0xf] %v720_v32 }
 0x116   : > { %1085 = vrot.lane.b32.xlu2 %v2731_v58, %s2488_s28 }
 0x117   : > { %v832_v6 = vpop.permute.xlu0 %831  ;;  %v808_v9 = vpop.permute.xlu1 %807 }
 0x118   : > { %v1175_v12 = vld [vmem:[#allocation2] sm:$0x1]  ;;  %861 = vst.msk [vmem:[#allocation2 + $0x3c] sm:$0xf] %vm3851_vm7, %v832_v6  ;;  %v923_v49 = vpop.permute.xlu2 %922 }
 0x119   : > { %v1176_v48 = vsel %vm2870_vm15, 0, %v1175_v12  ;;  %849 = vst.msk [vmem:[#allocation2 + $0x8] sm:$0xf] %vm3851_vm7, %v808_v9  ;;  %v521_v12 = vmul.f32 %v2586_v7, %v492_v44 }
 0x11a   : > { %1177 = vst [vmem:[#allocation2] sm:$0x1] %v1176_v48 }
 0x11b   : > { %1274 = vst.msk [vmem:[#allocation2] sm:$0xf] %vm1273_vm0, %v1226_v42  ;;  %v770_v54 = vld [vmem:[#allocation2 + $0x24] sm:$0x1]  ;;  %v541_v27 = vadd.f32 %v2591_v8, %v521_v12 }
 0x11c   : > { %v771_v55 = vsel %vm2631_vm6, 0, %v770_v54  ;;  %v773_v56 = vld [vmem:[#allocation2 + $0x28] sm:$0x1]  ;;  %v1290_v54 = vrot.slane %v1062_v52, 4 }
 0x11d   : > { %930 = vrot.lane.b32.xlu0 %v2823_v37, %s2489_s29  ;;  %1655 = vrot.lane.b32.xlu1 %v891_v63, %s2493_s14  ;;  %772 = vst [vmem:[#allocation2 + $0x24] sm:$0x1] %v771_v55  ;;  %v1291_v55 = vrot.slane %v1065_v60, 5 }
 0x11e   : > { %1454 = vrot.lane.b32.xlu2 %v2731_v58, %s2491_s11 }
 0x11f   : > { %v1004_v35 = vld [vmem:[#allocation2 + $0x3c] sm:$0xf]  ;;  %v921_v25 = vpop.permute.xlu0 %920  ;;  %v1299_v38 = vpop.permute.xlu1 %1298 }
 0x120   : > { %v1005_v41 = vsel %vm2900_vm4, %v947_v47, %v1004_v35  ;;  %v968_v42 = vld [vmem:[#allocation2 + $0x8] sm:$0xf]  ;;  %v966_v29 = vsel %vm2900_vm4, %v921_v25, %v965_v34  ;;  %v2926_v2 = vpop.permute.xlu2 %1300  ;;  %v1064_v47 = vrot.slane %v1062_v52, 7  ;;  %v557_v34 = vmax.f32 %v541_v27, 0.0  ;;  %v497_v27 = vpop.f32.mrf.mxu0 }
 0x121   : > { %1006 = vst [vmem:[#allocation2 + $0x3c] sm:$0xf] %v1005_v41  ;;  %v969_v46 = vsel %vm2900_vm4, %v923_v49, %v968_v42  ;;  %v522_v49 = vmul.f32 %v2586_v7, %v494_v5 }
 0x122   : > { %970 = vst [vmem:[#allocation2 + $0x8] sm:$0xf] %v969_v46  ;;  %v1348_v50 = vld [vmem:[#allocation2] sm:$0xf]  ;;  %v1067_v22 = vor.u32 %v1065_v60, %v1064_v47  ;;  %v2973_v41 = vpack.c.bf16 %v557_v34, %v557_v34 }
 0x123   : > { %967 = vst [vmem:[#allocation2 + $0x4] sm:$0xf] %v966_v29  ;;  %v1349_v51 = vsel %vm2922_vm12, %v1299_v38, %v1348_v50  ;;  %v542_v31 = vadd.f32 %v2591_v8, %v522_v49  ;;  %v725_v49 = vld [vmem:[#allocation2 + $0x30] sm:$0xf] }
 0x124   : > { %1350 = vst [vmem:[#allocation2] sm:$0xf] %v1349_v51  ;;  %v643_v46 = vshrl.u32 %v2973_v41, 16 }
 0x125   : > { %1653 = vrot.lane.b32.xlu0 %v2823_v37, %s2493_s14  ;;  %1598 = vrot.lane.b32.xlu1 %v2915_v33, %s2492_s12  ;;  %v774_v37 = vsel %vm2631_vm6, 0, %v773_v56  ;;  %v558_v35 = vmax.f32 %v542_v31, 0.0 }
 0x126   : > { %932 = vrot.lane.b32.xlu2 %v891_v63, %s2489_s29  ;;  %775 = vst [vmem:[#allocation2 + $0x28] sm:$0x1] %v774_v37  ;;  %v645_v37 = vrot.slane %v643_v46, 7 }
 0x127   : > { %v2940_v57 = vpop.permute.xlu1 %1586  ;;  %v2942_v59 = vpop.permute.xlu0 %1448  ;;  %v2975_v42 = vpack.c.bf16 %v558_v35, %v558_v35 }
 0x128   : > { %v1058_v61 = vld [vmem:[#allocation2 + $0x3c] sm:$0x8]  ;;  %v2947_v62 = vpop.permute.xlu2 %1588 }
 0x129   : > { %v1059_v63 = vsel %vm2799_vm11, 0, %v1058_v61  ;;  %v1019_v6 = vld [vmem:[#allocation2 + $0x8] sm:$0x8]  ;;  %v650_v50 = vshrl.u32 %v2975_v42, 16  ;;  %v646_v61 = vshll.u32 %v2973_v41, 16  ;;  %v653_v52 = vshll.u32 %v2975_v42, 16 }
 0x12a   : > { %1060 = vst [vmem:[#allocation2 + $0x3c] sm:$0x8] %v1059_v63  ;;  %v1020_v48 = vsel %vm2799_vm11, 0, %v1019_v6  ;;  %v1016_v14 = vld [vmem:[#allocation2 + $0x4] sm:$0x8] }
 0x12b   : > { %1021 = vst [vmem:[#allocation2 + $0x8] sm:$0x8] %v1020_v48  ;;  %v1017_v17 = vsel %vm2799_vm11, 0, %v1016_v14  ;;  %v1398_v19 = vld [vmem:[#allocation2] sm:$0x8]  ;;  %v652_v5 = vrot.slane %v650_v50, 7  ;;  %v3006_v60 = vor.u32 %v646_v61, %v645_v37 }
 0x12c   : > { %1018 = vst [vmem:[#allocation2 + $0x4] sm:$0x8] %v1017_v17  ;;  %v1399_v32 = vsel %vm2953_vm9, 0, %v1398_v19  ;;  %v1292_v17 = vor.u32 %v1291_v55, %v1290_v54 }
 0x12d   : > { %1400 = vst [vmem:[#allocation2] sm:$0x8] %v1399_v32  ;;  %1087 = vrot.lane.b32.xlu0 %v2774_v15, %s2488_s28  ;;  %1458 = vrot.lane.b32.xlu1 %v1067_v22, %s2491_s11 }
 0x12e   : > { %1089 = vrot.lane.b32.xlu2 %v1067_v22, %s2488_s28  ;;  %v3028_v35 = vrot.slane %v1292_v17, 4  ;;  %v896_v17 = vrot.slane %v636_v11, 4 }
 0x12f   : > { %v1078_v25 = vpop.permute.xlu1 %1077  ;;  %v2971_v38 = vpop.permute.xlu0 %1302 }
 0x130   : > { %v2977_v29 = vpop.permute.xlu2 %1645 }
 0x132   : > { %v1131_v48 = vld [vmem:[#allocation2 + $0x8] sm:$0xf] }
 0x133   : > { %v1128_v51 = vld [vmem:[#allocation2 + $0x4] sm:$0xf] }
 0x134   : > { %v1490_v56 = vld [vmem:[#allocation2] sm:$0xf]  ;;  %v1129_v47 = vsel %vm2847_vm13, %v1078_v25, %v1128_v51 }
 0x135   : > { %v1491_v63 = vsel %vm2981_vm8, %v2839_v43, %v1490_v56  ;;  %1130 = vst [vmem:[#allocation2 + $0x4] sm:$0xf] %v1129_v47  ;;  %1456 = vrot.lane.b32.xlu0 %v2774_v15, %s2491_s11  ;;  %1241 = vrot.lane.b32.xlu1 %v2862_v1, %s2486_s26  ;;  %v722_v43 = vld [vmem:[#allocation2 + $0x2c] sm:$0xf]  ;;  %v3012_v15 = vor.u32 %v653_v52, %v652_v5 }
 0x136   : > { %1492 = vst [vmem:[#allocation2] sm:$0xf] %v1491_v63  ;;  %819 = vrot.lane.b32.xlu2 %v2862_v1, %s2487_s27  ;;  %v723_v19 = vsel %vm2603_vm3, %v3006_v60, %v722_v43  ;;  %v893_v43 = vrot.slane %v632_v16, 5  ;;  %v897_v1 = vrot.slane %v639_v18, 5 }
 0x137   : > { %v810_v6 = vpop.permute.xlu1 %809  ;;  %v3008_v12 = vpop.permute.xlu0 %1647  ;;  %724 = vst [vmem:[#allocation2 + $0x2c] sm:$0xf] %v723_v19  ;;  %v726_v31 = vsel %vm2603_vm3, %v3012_v15, %v725_v49 }
 0x138   : > { %850 = vst.msk [vmem:[#allocation2 + $0xc] sm:$0xf] %vm3851_vm7, %v810_v6  ;;  %v1080_v14 = vpop.permute.xlu2 %1079  ;;  %v499_v49 = vpop.f32.mrf.mxu0 }
 0x139   : > { %v1132_v22 = vsel %vm2847_vm13, %v1080_v14, %v1131_v48  ;;  %727 = vst [vmem:[#allocation2 + $0x30] sm:$0xf] %v726_v31  ;;  %v523_v48 = vmul.f32 %v2586_v7, %v497_v27 }
 0x13a   : > { %1133 = vst [vmem:[#allocation2 + $0x8] sm:$0xf] %v1132_v22 }
 0x13b   : > { %v543_v19 = vadd.f32 %v2591_v8, %v523_v48 }
 0x13c   : > { %v1178_v34 = vld [vmem:[#allocation2 + $0x4] sm:$0x1] }
 0x13d   : > { %v1538_v25 = vld [vmem:[#allocation2] sm:$0x1]  ;;  %v1179_v51 = vsel %vm2870_vm15, 0, %v1178_v34  ;;  %1239 = vrot.lane.b32.xlu0 %v2915_v33, %s2486_s26  ;;  %821 = vrot.lane.b32.xlu1 %v2864_v3, %s2487_s27  ;;  %v892_v33 = vrot.slane %v629_v10, 4  ;;  %v559_v18 = vmax.f32 %v543_v19, 0.0 }
 0x13e   : > { %v1539_v54 = vsel %vm3024_vm14, 0, %v1538_v25  ;;  %1180 = vst [vmem:[#allocation2 + $0x4] sm:$0x1] %v1179_v51  ;;  %1312 = vrot.lane.b32.xlu2 %v3028_v35, %s2490_s30  ;;  %v776_v5 = vld [vmem:[#allocation2 + $0x2c] sm:$0x1]  ;;  %v898_v25 = vor.u32 %v897_v1, %v896_v17 }
 0x13f   : > { %1540 = vst [vmem:[#allocation2] sm:$0x1] %v1539_v54  ;;  %v971_v55 = vld [vmem:[#allocation2 + $0xc] sm:$0xf]  ;;  %v1230_v56 = vpop.permute.xlu1 %1229  ;;  %v3040_v47 = vpop.permute.xlu0 %1081  ;;  %v777_v10 = vsel %vm2631_vm6, 0, %v776_v5  ;;  %v894_v11 = vor.u32 %v893_v43, %v892_v33 }
 0x140   : > { %1629 = vst.msk [vmem:[#allocation2] sm:$0xf] %vm1628_vm10, %v2940_v57  ;;  %v925_v37 = vpop.permute.xlu2 %924  ;;  %v779_v14 = vld [vmem:[#allocation2 + $0x30] sm:$0x1] }
 0x141   : > { %1275 = vst.msk [vmem:[#allocation2 + $0x4] sm:$0xf] %vm1273_vm0, %v2821_v36  ;;  %v1181_v63 = vld [vmem:[#allocation2 + $0x8] sm:$0x1]  ;;  %v972_v6 = vsel %vm2900_vm4, %v925_v37, %v971_v55  ;;  %v524_v36 = vmul.f32 %v2586_v7, %v499_v49  ;;  %v780_v16 = vsel %vm2631_vm6, 0, %v779_v14  ;;  %v3085_v55 = vpack.c.bf16 %v559_v18, %v559_v18 }
 0x142   : > { %v1182_v57 = vsel %vm2870_vm15, 0, %v1181_v63  ;;  %973 = vst [vmem:[#allocation2 + $0xc] sm:$0xf] %v972_v6  ;;  %v895_v63 = vrot.slane %v894_v11, 4  ;;  %v3096_v49 = vrot.slane %v898_v25, 4 }
 0x143   : > { %1183 = vst [vmem:[#allocation2 + $0x8] sm:$0x1] %v1182_v57  ;;  %v544_v22 = vadd.f32 %v2591_v8, %v524_v36  ;;  %v660_v48 = vshll.u32 %v3085_v55, 16 }
 0x144   : > { %1276 = vst.msk [vmem:[#allocation2 + $0x8] sm:$0xf] %vm1273_vm0, %v1230_v56 }
 0x145   : > { %1091 = vrot.lane.b32.xlu0 %v2892_v21, %s2488_s28  ;;  %1093 = vrot.lane.b32.xlu1 %v2896_v23, %s2488_s28  ;;  %778 = vst [vmem:[#allocation2 + $0x2c] sm:$0x1] %v777_v10  ;;  %v560_v27 = vmax.f32 %v544_v22, 0.0 }
 0x146   : > { %1243 = vrot.lane.b32.xlu2 %v2864_v3, %s2486_s26  ;;  %781 = vst [vmem:[#allocation2 + $0x30] sm:$0x1] %v780_v16  ;;  %v728_v16 = vld [vmem:[#allocation2 + $0x34] sm:$0xf] }
 0x147   : > { %v1689_v8 = vld [vmem:[#allocation2] sm:$0xf]  ;;  %v3079_v31 = vpop.permute.xlu1 %1304  ;;  %v814_v34 = vpop.permute.xlu0 %813  ;;  %v3087_v56 = vpack.c.bf16 %v560_v27, %v560_v27  ;;  %v731_v27 = vld [vmem:[#allocation2 + $0x38] sm:$0xf] }
 0x148   : > { %v1351_v51 = vld [vmem:[#allocation2 + $0x4] sm:$0xf]  ;;  %v1690_v21 = vsel %vm3069_vm2, %v2977_v29, %v1689_v8  ;;  %v812_v54 = vpop.permute.xlu2 %811  ;;  %852 = vst.msk [vmem:[#allocation2 + $0x14] sm:$0xf] %vm3851_vm7, %v814_v34  ;;  %v657_v29 = vshrl.u32 %v3085_v55, 16 }
 0x149   : > { %v1352_v37 = vsel %vm2922_vm12, %v2926_v2, %v1351_v51  ;;  %1691 = vst [vmem:[#allocation2] sm:$0xf] %v1690_v21  ;;  %v1022_v33 = vld [vmem:[#allocation2 + $0xc] sm:$0x8]  ;;  %v664_v6 = vshrl.u32 %v3087_v56, 16  ;;  %v667_v10 = vshll.u32 %v3087_v56, 16 }
 0x14a   : > { %1353 = vst [vmem:[#allocation2 + $0x4] sm:$0xf] %v1352_v37  ;;  %v1023_v5 = vsel %vm2799_vm11, 0, %v1022_v33  ;;  %v659_v57 = vrot.slane %v657_v29, 7  ;;  %v900_v21 = vrot.slane %v643_v46, 4 }
 0x14b   : > { %v1354_v43 = vld [vmem:[#allocation2 + $0x8] sm:$0xf]  ;;  %1024 = vst [vmem:[#allocation2 + $0xc] sm:$0x8] %v1023_v5  ;;  %v666_v36 = vrot.slane %v664_v6, 7 }
 0x14c   : > { %851 = vst.msk [vmem:[#allocation2 + $0x10] sm:$0xf] %vm3851_vm7, %v812_v54  ;;  %v1355_v2 = vsel %vm2922_vm12, %v2971_v38, %v1354_v43  ;;  %vm3112_vm7 = vmand %vm1734_vm1, %vm3874_vm5  ;;  %v3120_v38 = vor.u32 %v660_v48, %v659_v57  ;;  %v1804_v33 = vld [vmem:[%s3840_s4 + $0x10] sm:$0x3]  ;;  %v901_v43 = vrot.slane %v646_v61, 5  ;;  %vm1885_vm5 = vcmask 1041408  }
 0x14d   : > { %934 = vrot.lane.b32.xlu0 %v895_v63, %s2489_s29  ;;  %1316 = vrot.lane.b32.xlu1 %v3096_v49, %s2490_s30  ;;  %1356 = vst [vmem:[#allocation2 + $0x8] sm:$0xf] %v1355_v2  ;;  %v3129_v18 = vor.u32 %v667_v10, %v666_v36  ;;  %v1854_v57 = vunpack.c.l.b16 %v1804_v33 }
 0x14e   : > { %823 = vrot.lane.b32.xlu2 %v2973_v41, %s2487_s27  ;;  %v729_v11 = vsel %vm2603_vm3, %v3120_v38, %v728_v16 }
 0x14f   : > { %v927_v17 = vpop.permute.xlu0 %926  ;;  %v3122_v1 = vpop.permute.xlu1 %1083  ;;  %730 = vst [vmem:[#allocation2 + $0x34] sm:$0xf] %v729_v11  ;;  %v732_v46 = vsel %vm2603_vm3, %v3129_v18, %v731_v27  ;;  %v1857_v61 = vpack.c.b16 %v1854_v57, %v1854_v57  ;;  %v977_v36 = vld [vmem:[#allocation2 + $0x14] sm:$0xf]  ;;  %vm3877_vm3 = vcmask 60448  }
 0x150   : > { %v1736_v19 = vld [vmem:[#allocation2] sm:$0x8]  ;;  %v1232_v22 = vpop.permute.xlu2 %1231  ;;  %733 = vst [vmem:[#allocation2 + $0x38] sm:$0xf] %v732_v46  ;;  %vm3878_vm1 = vmmov %vm3877_vm3 }
 0x151   : > { %v1401_v8 = vld [vmem:[#allocation2 + $0x4] sm:$0x8]  ;;  %v1737_v34 = vsel %vm3112_vm7, 0, %v1736_v19  ;;  %v902_v19 = vor.u32 %v901_v43, %v900_v21  ;;  %v1887_v27 = vsel %vm1885_vm5, %v1857_v61, 0 }
 0x152   : > { %v1402_v25 = vsel %vm2953_vm9, 0, %v1401_v8  ;;  %1738 = vst [vmem:[#allocation2] sm:$0x8] %v1737_v34  ;;  %v1134_v51 = vld [vmem:[#allocation2 + $0xc] sm:$0xf]  ;;  %1894 = vmatpush.bf16.msra.mxu1 %v1887_v27  ;;  %2449 = vmatpush.bf16.msrb.mxu3 %v1887_v27 }
 0x153   : > { %1403 = vst [vmem:[#allocation2 + $0x4] sm:$0x8] %v1402_v25  ;;  %v1135_v54 = vsel %vm2847_vm13, %v3040_v47, %v1134_v51  ;;  %v974_v37 = vld [vmem:[#allocation2 + $0x10] sm:$0xf]  ;;  %v2408_v25 = vld [vmem:[%s3840_s4 + $0x8] sm:$0xff]  ;;  %v3174_v33 = vrot.slane %v902_v19, 4 }
 0x154   : > { %1136 = vst [vmem:[#allocation2 + $0xc] sm:$0xf] %v1135_v54  ;;  %v975_v5 = vsel %vm2900_vm4, %v927_v17, %v974_v37  ;;  %v1404_v2 = vld [vmem:[#allocation2 + $0x8] sm:$0x8] }
 0x155   : > { %976 = vst [vmem:[#allocation2 + $0x10] sm:$0xf] %v975_v5  ;;  %1314 = vrot.lane.b32.xlu0 %v895_v63, %s2490_s30  ;;  %1095 = vrot.lane.b32.xlu1 %v3006_v60, %s2488_s28  ;;  %v1405_v47 = vsel %vm2953_vm9, 0, %v1404_v2 }
 0x156   : > { %936 = vrot.lane.b32.xlu2 %v3096_v49, %s2489_s29  ;;  %1406 = vst [vmem:[#allocation2 + $0x8] sm:$0x8] %v1405_v47  ;;  %v782_v11 = vld [vmem:[#allocation2 + $0x34] sm:$0x1]  ;;  %1895 = vmatpush.bf16.msra.mxu1 %v2408_v25 }
 0x157   : > { %v3157_v17 = vpop.permute.xlu0 %1233  ;;  %v929_v24 = vpop.permute.xlu1 %928  ;;  %v783_v8 = vsel %vm2631_vm6, 0, %v782_v11  ;;  %v785_v43 = vld [vmem:[#allocation2 + $0x38] sm:$0x1]  ;;  %2450 = vmatpush.bf16.msrb.mxu3 %v2408_v25 }
 0x158   : > { %v3159_v16 = vpop.permute.xlu2 %1590  ;;  %v978_v63 = vsel %vm2900_vm4, %v929_v24, %v977_v36  ;;  %784 = vst [vmem:[#allocation2 + $0x34] sm:$0x1] %v783_v8  ;;  %v786_v46 = vsel %vm2631_vm6, 0, %v785_v43 }
 0x159   : > { %979 = vst [vmem:[#allocation2 + $0x14] sm:$0xf] %v978_v63 }
 0x15a   : > { %v1493_v34 = vld [vmem:[#allocation2 + $0x4] sm:$0xf]  ;;  %787 = vst [vmem:[#allocation2 + $0x38] sm:$0x1] %v786_v46 }
 0x15b   : > { %v1494_v51 = vsel %vm2981_vm8, %v2942_v59, %v1493_v34  ;;  %v1184_v21 = vld [vmem:[#allocation2 + $0xc] sm:$0x1]  ;;  %v2407_v59 = vld [vmem:[%s3840_s4] sm:$0xff] }
 0x15c   : > { %1495 = vst [vmem:[#allocation2 + $0x4] sm:$0xf] %v1494_v51  ;;  %v1185_v54 = vsel %vm2870_vm15, 0, %v1184_v21  ;;  %v1025_v37 = vld [vmem:[#allocation2 + $0x10] sm:$0x8]  ;;  %1896 = vmatpush.bf16.msra.mxu1 %v2407_v59  ;;  %2451 = vmatpush.bf16.msrb.mxu3 %v2407_v59 }
 0x15d   : > { %1186 = vst [vmem:[#allocation2 + $0xc] sm:$0x1] %v1185_v54  ;;  %v1026_v5 = vsel %vm2799_vm11, 0, %v1025_v37  ;;  %1245 = vrot.lane.b32.xlu0 %v2973_v41, %s2486_s26  ;;  %825 = vrot.lane.b32.xlu1 %v2975_v42, %s2487_s27  ;;  %v904_v54 = vrot.slane %v650_v50, 4 }
 0x15e   : > { %1277 = vst.msk [vmem:[#allocation2 + $0xc] sm:$0xf] %vm1273_vm0, %v1232_v22  ;;  %1318 = vrot.lane.b32.xlu2 %v3174_v33, %s2490_s30  ;;  %v1496_v22 = vld [vmem:[#allocation2 + $0x8] sm:$0xf] }
 0x15f   : > { %1027 = vst [vmem:[#allocation2 + $0x10] sm:$0x8] %v1026_v5  ;;  %v3188_v2 = vpop.permute.xlu0 %1592  ;;  %v3190_v57 = vpop.permute.xlu1 %1235  ;;  %v909_v5 = vrot.slane %v660_v48, 5 }
 0x160   : > { %v1028_v47 = vld [vmem:[#allocation2 + $0x14] sm:$0x8]  ;;  %v1451_v61 = vpop.permute.xlu2 %1450 }
 0x161   : > { %v1029_v36 = vsel %vm2799_vm11, 0, %v1028_v47  ;;  %v1497_v24 = vsel %vm2981_vm8, %v1451_v61, %v1496_v22 }
 0x162   : > { %1030 = vst [vmem:[#allocation2 + $0x14] sm:$0x8] %v1029_v36 }
 0x163   : > { %v1541_v63 = vld [vmem:[#allocation2 + $0x4] sm:$0x1]  ;;  %1498 = vst [vmem:[#allocation2 + $0x8] sm:$0xf] %v1497_v24 }
 0x164   : > { %v1542_v19 = vsel %vm3024_vm14, 0, %v1541_v63 }
 0x165   : > { %1543 = vst [vmem:[#allocation2 + $0x4] sm:$0x1] %v1542_v19  ;;  %v1357_v11 = vld [vmem:[#allocation2 + $0xc] sm:$0xf]  ;;  %938 = vrot.lane.b32.xlu0 %v3174_v33, %s2489_s29  ;;  %1247 = vrot.lane.b32.xlu1 %v2975_v42, %s2486_s26 }
 0x166   : > { %1630 = vst.msk [vmem:[#allocation2 + $0x4] sm:$0xf] %vm1628_vm10, %v2947_v62  ;;  %v1137_v27 = vld [vmem:[#allocation2 + $0x10] sm:$0xf]  ;;  %1097 = vrot.lane.b32.xlu2 %v3012_v15, %s2488_s28  ;;  %v1358_v8 = vsel %vm2922_vm12, %v3079_v31, %v1357_v11  ;;  %v905_v31 = vrot.slane %v653_v52, 5 }
 0x167   : > { %v1138_v34 = vsel %vm2847_vm13, %v3122_v1, %v1137_v27  ;;  %1359 = vst [vmem:[#allocation2 + $0xc] sm:$0xf] %v1358_v8  ;;  %v1453_v25 = vpop.permute.xlu0 %1452  ;;  %v818_v51 = vpop.permute.xlu1 %817  ;;  %v908_v1 = vrot.slane %v657_v29, 4 }
 0x168   : > { %1139 = vst [vmem:[#allocation2 + $0x10] sm:$0xf] %v1138_v34  ;;  %v1650_v21 = vpop.permute.xlu2 %1649 }
 0x169   : > { %854 = vst.msk [vmem:[#allocation2 + $0x1c] sm:$0xf] %vm3877_vm3, %v818_v51  ;;  %v910_v46 = vor.u32 %v909_v5, %v908_v1  ;;  %v1140_v22 = vld [vmem:[#allocation2 + $0x14] sm:$0xf]  ;;  %v913_v1 = vrot.slane %v667_v10, 5  ;;  %vm1860_vm3 = vcmask 293888  }
 0x16a   : > { %v1544_v62 = vld [vmem:[#allocation2 + $0x8] sm:$0x1]  ;;  %v2476_v5 = vld [vmem:[%s3838_s2] ss:$0 sm:$0xff] }
 0x16b   : > { %v1545_v37 = vsel %vm3024_vm14, 0, %v1544_v62  ;;  %v3249_v24 = vrot.slane %v910_v46, 4  ;;  %v504_v62 = vpop.f32.mrf.mxu3 }
 0x16c   : > { %1546 = vst [vmem:[#allocation2 + $0x8] sm:$0x1] %v1545_v37 }
 0x16d   : > { %v1692_v59 = vld [vmem:[#allocation2 + $0x4] sm:$0xf]  ;;  %1631 = vst.msk [vmem:[#allocation2 + $0x8] sm:$0xf] %vm1628_vm10, %v3159_v16  ;;  %1462 = vrot.lane.b32.xlu0 %v3006_v60, %s2491_s11  ;;  %1099 = vrot.lane.b32.xlu1 %v3120_v38, %s2488_s28  ;;  %v906_v60 = vor.u32 %v905_v31, %v904_v54 }
 0x16e   : > { %v1693_v50 = vsel %vm3069_vm2, %v3008_v12, %v1692_v59  ;;  %v1407_v52 = vld [vmem:[#allocation2 + $0xc] sm:$0x8]  ;;  %827 = vrot.lane.b32.xlu2 %v3085_v55, %s2487_s27 }
 0x16f   : > { %1694 = vst [vmem:[#allocation2 + $0x4] sm:$0xf] %v1693_v50  ;;  %v1187_v29 = vld [vmem:[#allocation2 + $0x10] sm:$0x1]  ;;  %v1408_v48 = vsel %vm2953_vm9, 0, %v1407_v52  ;;  %v816_v16 = vpop.permute.xlu0 %815  ;;  %v3238_v43 = vpop.permute.xlu1 %1308  ;;  %v3247_v36 = vrot.slane %v906_v60, 4 }
 0x170   : > { %v1188_v47 = vsel %vm2870_vm15, 0, %v1187_v29  ;;  %1409 = vst [vmem:[#allocation2 + $0xc] sm:$0x8] %v1408_v48  ;;  %v1086_v12 = vpop.permute.xlu2 %1085 }
 0x171   : > { %1189 = vst [vmem:[#allocation2 + $0x10] sm:$0x1] %v1188_v47  ;;  %v1141_v61 = vsel %vm2847_vm13, %v1086_v12, %v1140_v22  ;;  %v983_v22 = vld [vmem:[#allocation2 + $0x1c] sm:$0xf] }
 0x172   : > { %1278 = vst.msk [vmem:[#allocation2 + $0x10] sm:$0xf] %vm1273_vm0, %v3157_v17 }
 0x173   : > { %853 = vst.msk [vmem:[#allocation2 + $0x18] sm:$0xf] %vm3878_vm1, %v816_v16  ;;  %v2477_v16 = vld [vmem:[%s3839_s3] ss:$0 sm:$0xff] }
 0x174   : > { %v1695_v63 = vld [vmem:[#allocation2 + $0x8] sm:$0xf]  ;;  %1142 = vst [vmem:[#allocation2 + $0x14] sm:$0xf] %v1141_v61 }
 0x175   : > { %v1696_v19 = vsel %vm3069_vm2, %v1650_v21, %v1695_v63  ;;  %940 = vrot.lane.b32.xlu0 %v3247_v36, %s2489_s29  ;;  %942 = vrot.lane.b32.xlu1 %v3249_v24, %s2489_s29 }
 0x176   : > { %v1739_v11 = vld [vmem:[#allocation2 + $0x4] sm:$0x8]  ;;  %1697 = vst [vmem:[#allocation2 + $0x8] sm:$0xf] %v1696_v19  ;;  %1460 = vrot.lane.b32.xlu2 %v2896_v23, %s2491_s11  ;;  %v912_v23 = vrot.slane %v664_v6, 4 }
 0x177   : > { %v1740_v17 = vsel %vm3112_vm7, 0, %v1739_v11  ;;  %v1499_v27 = vld [vmem:[#allocation2 + $0xc] sm:$0xf]  ;;  %v1307_v8 = vpop.permute.xlu0 %1306  ;;  %v3261_v34 = vpop.permute.xlu1 %1237 }
 0x178   : > { %1741 = vst [vmem:[#allocation2 + $0x4] sm:$0x8] %v1740_v17  ;;  %v1500_v51 = vsel %vm2981_vm8, %v1453_v25, %v1499_v27  ;;  %v1455_v21 = vpop.permute.xlu2 %1454  ;;  %v526_v25 = vmul.f32 %v2476_v5, %v504_v62  ;;  %v914_v48 = vor.u32 %v913_v1, %v912_v23 }
 0x179   : > { %1501 = vst [vmem:[#allocation2 + $0xc] sm:$0xf] %v1500_v51  ;;  %v1360_v54 = vld [vmem:[#allocation2 + $0x10] sm:$0xf] }
 0x17a   : > { %v1361_v37 = vsel %vm2922_vm12, %v1307_v8, %v1360_v54  ;;  %v546_v60 = vadd.f32 %v2477_v16, %v526_v25  ;;  %v3300_v19 = vrot.slane %v914_v48, 4  ;;  %v767_v54 = vld [vmem:[#allocation2 + $0x20] sm:$0x1] }
 0x17b   : > { %v1190_v31 = vld [vmem:[#allocation2 + $0x14] sm:$0x1]  ;;  %1362 = vst [vmem:[#allocation2 + $0x10] sm:$0xf] %v1361_v37  ;;  %v768_v37 = vsel %vm2631_vm6, 0, %v767_v54  ;;  %vm3879_vm6 = vcmask 93248  }
 0x17c   : > { %v1191_v59 = vsel %vm2870_vm15, 0, %v1190_v31  ;;  %v562_v11 = vmax.f32 %v546_v60, 0.0  ;;  %769 = vst [vmem:[#allocation2 + $0x20] sm:$0x1] %v768_v37 }
 0x17d   : > { %v1742_v50 = vld [vmem:[#allocation2 + $0x8] sm:$0x8]  ;;  %1192 = vst [vmem:[#allocation2 + $0x14] sm:$0x1] %v1191_v59  ;;  %1320 = vrot.lane.b32.xlu0 %v3247_v36, %s2490_s30  ;;  %829 = vrot.lane.b32.xlu1 %v3087_v56, %s2487_s27 }
 0x17e   : > { %v1743_v6 = vsel %vm3112_vm7, 0, %v1742_v50  ;;  %1279 = vst.msk [vmem:[#allocation2 + $0x14] sm:$0xf] %vm1273_vm0, %v3190_v57  ;;  %1249 = vrot.lane.b32.xlu2 %v3085_v55, %s2486_s26  ;;  %v3313_v51 = vpack.c.bf16 %v562_v11, %v562_v11 }
 0x17f   : > { %1744 = vst [vmem:[#allocation2 + $0x8] sm:$0x8] %v1743_v6  ;;  %v2399_v10 = vld [vmem:[#allocation2] sm:$0xff]  ;;  %v1652_v52 = vpop.permute.xlu0 %1651  ;;  %v3286_v29 = vpop.permute.xlu1 %1596 }
 0x180   : > { %v1547_v46 = vld [vmem:[#allocation2 + $0xc] sm:$0x1]  ;;  %v933_v47 = vpop.permute.xlu2 %932  ;;  %2370 = vmatmul.msk.bf16.vlgmr.msra.gmra.mxu1 %vm1860_vm3, %v2399_v10  ;;  %863 = vst.msk [vmem:[#allocation2 + $0x20] sm:$0xf] %vm3878_vm1, %v2494_v13  ;;  %v1069_v25 = vshrl.u32 %v3313_v51, 16  ;;  %v1072_v16 = vshll.u32 %v3313_v51, 16 }
 0x181   : > { %v1548_v57 = vsel %vm3024_vm14, 0, %v1547_v46  ;;  %v984_v61 = vsel %vm2900_vm4, %v933_v47, %v983_v22  ;;  %1009 = vst.msk [vmem:[#allocation2 + $0x20] sm:$0xf] %vm3879_vm6, %v2494_v13  ;;  %vm3880_vm6 = vmmov %vm3878_vm1 }
 0x182   : > { %1549 = vst [vmem:[#allocation2 + $0xc] sm:$0x1] %v1548_v57  ;;  %v1410_v12 = vld [vmem:[#allocation2 + $0x10] sm:$0x8]  ;;  %v1071_v48 = vrot.slane %v1069_v25, 7 }
 0x183   : > { %1632 = vst.msk [vmem:[#allocation2 + $0xc] sm:$0xf] %vm1628_vm10, %v3188_v2  ;;  %v1411_v63 = vsel %vm2953_vm9, 0, %v1410_v12 }
 0x184   : > { %1412 = vst [vmem:[#allocation2 + $0x10] sm:$0x8] %v1411_v63  ;;  %v3346_v57 = vor.u32 %v1072_v16, %v1071_v48  ;;  %v1294_v48 = vrot.slane %v1069_v25, 4 }
 0x185   : > { %v1363_v17 = vld [vmem:[#allocation2 + $0x14] sm:$0xf]  ;;  %985 = vst [vmem:[#allocation2 + $0x1c] sm:$0xf] %v984_v61  ;;  %1251 = vrot.lane.b32.xlu0 %v3087_v56, %s2486_s26  ;;  %944 = vrot.lane.b32.xlu1 %v3300_v19, %s2489_s29 }
 0x186   : > { %v1364_v27 = vsel %vm2922_vm12, %v3238_v43, %v1363_v17  ;;  %1322 = vrot.lane.b32.xlu2 %v3249_v24, %s2490_s30 }
 0x187   : > { %1365 = vst [vmem:[#allocation2 + $0x14] sm:$0xf] %v1364_v27  ;;  %v1595_v2 = vpop.permute.xlu0 %1594  ;;  %v3311_v8 = vpop.permute.xlu1 %1310 }
 0x188   : > { %v1090_v62 = vpop.permute.xlu2 %1089  ;;  %v1037_v63 = vld [vmem:[#allocation2 + $0x20] sm:$0x8] }
 0x189   : > { %v1038_v27 = vsel %vm2799_vm11, 0, %v1037_v63 }
 0x18a   : > { %v1698_v31 = vld [vmem:[#allocation2 + $0xc] sm:$0xf]  ;;  %1039 = vst [vmem:[#allocation2 + $0x20] sm:$0x8] %v1038_v27 }
 0x18b   : > { %v1502_v23 = vld [vmem:[#allocation2 + $0x10] sm:$0xf]  ;;  %v1699_v43 = vsel %vm3069_vm2, %v1652_v52, %v1698_v31 }
 0x18c   : > { %v1503_v1 = vsel %vm2981_vm8, %v1455_v21, %v1502_v23  ;;  %1700 = vst [vmem:[#allocation2 + $0xc] sm:$0xf] %v1699_v43  ;;  %v1034_v5 = vld [vmem:[#allocation2 + $0x1c] sm:$0x8]  ;;  %v980_v21 = vld [vmem:[#allocation2 + $0x18] sm:$0xf] }
 0x18d   : > { %1504 = vst [vmem:[#allocation2 + $0x10] sm:$0xf] %v1503_v1  ;;  %v1035_v45 = vsel %vm2799_vm11, 0, %v1034_v5  ;;  %1326 = vrot.lane.b32.xlu0 %v2689_v28, %s2490_s30  ;;  %1657 = vrot.lane.b32.xlu1 %v3028_v35, %s2493_s14 }
 0x18e   : > { %v1413_v59 = vld [vmem:[#allocation2 + $0x14] sm:$0x8]  ;;  %1036 = vst [vmem:[#allocation2 + $0x1c] sm:$0x8] %v1035_v45  ;;  %1101 = vrot.lane.b32.xlu2 %v3129_v18, %s2488_s28 }
 0x18f   : > { %v1414_v50 = vsel %vm2953_vm9, 0, %v1413_v59  ;;  %v931_v6 = vpop.permute.xlu0 %930  ;;  %v3334_v10 = vpop.permute.xlu1 %1655 }
 0x190   : > { %1415 = vst [vmem:[#allocation2 + $0x14] sm:$0x8] %v1414_v50  ;;  %v981_v52 = vsel %vm2900_vm4, %v931_v6, %v980_v21  ;;  %v820_v35 = vpop.permute.xlu2 %819 }
 0x191   : > { %982 = vst [vmem:[#allocation2 + $0x18] sm:$0xf] %v981_v52 }
 0x192   : > { %855 = vst.msk [vmem:[#allocation2 + $0x24] sm:$0xf] %vm3878_vm1, %v820_v35 }
 0x193   : > { %v1745_v60 = vld [vmem:[#allocation2 + $0xc] sm:$0x8] }
 0x194   : > { %v1550_v46 = vld [vmem:[#allocation2 + $0x10] sm:$0x1]  ;;  %v1746_v47 = vsel %vm3112_vm7, 0, %v1745_v60  ;;  %v1295_v60 = vrot.slane %v1072_v16, 5 }
 0x195   : > { %v1551_v22 = vsel %vm3024_vm14, 0, %v1550_v46  ;;  %1747 = vst [vmem:[#allocation2 + $0xc] sm:$0x8] %v1746_v47  ;;  %v1146_v12 = vld [vmem:[#allocation2 + $0x1c] sm:$0xf]  ;;  %1324 = vrot.lane.b32.xlu0 %v3300_v19, %s2490_s30  ;;  %1468 = vrot.lane.b32.xlu1 %v3129_v18, %s2491_s11 }
 0x196   : > { %1552 = vst [vmem:[#allocation2 + $0x10] sm:$0x1] %v1551_v22  ;;  %v1147_v61 = vsel %vm2847_vm13, %v1090_v62, %v1146_v12  ;;  %1105 = vrot.lane.b32.xlu2 %v3346_v57, %s2488_s28  ;;  %v1296_v22 = vor.u32 %v1295_v60, %v1294_v48 }
 0x197   : > { %1633 = vst.msk [vmem:[#allocation2 + $0x10] sm:$0xf] %vm1628_vm10, %v1595_v2  ;;  %v1654_v11 = vpop.permute.xlu0 %1653  ;;  %v3359_v17 = vpop.permute.xlu1 %1598  ;;  %v1505_v59 = vld [vmem:[#allocation2 + $0x14] sm:$0xf] }
 0x198   : > { %1148 = vst [vmem:[#allocation2 + $0x1c] sm:$0xf] %v1147_v61  ;;  %v1031_v54 = vld [vmem:[#allocation2 + $0x18] sm:$0x8]  ;;  %v3363_v37 = vpop.permute.xlu2 %1312 }
 0x199   : > { %v1032_v18 = vsel %vm2799_vm11, 0, %v1031_v54 }
 0x19a   : > { %1033 = vst [vmem:[#allocation2 + $0x18] sm:$0x8] %v1032_v18 }
 0x19c   : > { %v2400_v62 = vld [vmem:[#allocation2 + $0x8] sm:$0xff] }
 0x19d   : > { %1600 = vrot.lane.b32.xlu0 %v2864_v3, %s2492_s12  ;;  %1602 = vrot.lane.b32.xlu1 %v2973_v41, %s2492_s12 }
 0x19e   : > { %v1701_v2 = vld [vmem:[#allocation2 + $0x10] sm:$0xf]  ;;  %1470 = vrot.lane.b32.xlu2 %v2624_v40, %s2491_s11  ;;  %2371 = vmatmul.msk.bf16.gmra.mxu1 %vm1860_vm3, %v2400_v62 }
 0x19f   : > { %v1196_v31 = vld [vmem:[#allocation2 + $0x1c] sm:$0x1]  ;;  %v1702_v23 = vsel %vm3069_vm2, %v1654_v11, %v1701_v2  ;;  %v1088_v43 = vpop.permute.xlu0 %1087  ;;  %v3376_v1 = vpop.permute.xlu1 %1458  ;;  %v986_v2 = vld [vmem:[#allocation2 + $0x24] sm:$0xf] }
 0x1a0   : > { %v1197_v5 = vsel %vm2870_vm15, 0, %v1196_v31  ;;  %1703 = vst [vmem:[#allocation2 + $0x10] sm:$0xf] %v1702_v23  ;;  %v3380_v3 = vpop.permute.xlu2 %1243 }
 0x1a1   : > { %1198 = vst [vmem:[#allocation2 + $0x1c] sm:$0x1] %v1197_v5  ;;  %v1143_v41 = vld [vmem:[#allocation2 + $0x18] sm:$0xf] }
 0x1a2   : > { %v1144_v40 = vsel %vm2847_vm13, %v1088_v43, %v1143_v41 }
 0x1a3   : > { %1145 = vst [vmem:[#allocation2 + $0x18] sm:$0xf] %v1144_v40 }
 0x1a5   : > { %1464 = vrot.lane.b32.xlu0 %v3012_v15, %s2491_s11  ;;  %1466 = vrot.lane.b32.xlu1 %v3120_v38, %s2491_s11 }
 0x1a6   : > { %1255 = vrot.lane.b32.xlu2 %v3313_v51, %s2486_s26 }
 0x1a7   : > { %v1748_v45 = vld [vmem:[#allocation2 + $0x10] sm:$0x8]  ;;  %v1457_v21 = vpop.permute.xlu0 %1456  ;;  %v3390_v50 = vpop.permute.xlu1 %1241 }
 0x1a8   : > { %v1749_v6 = vsel %vm3112_vm7, 0, %v1748_v45  ;;  %v1506_v52 = vsel %vm2981_vm8, %v1457_v21, %v1505_v59  ;;  %v824_v35 = vpop.permute.xlu2 %823 }
 0x1a9   : > { %1750 = vst [vmem:[#allocation2 + $0x10] sm:$0x8] %v1749_v6 }
 0x1aa   : > { %v1193_v15 = vld [vmem:[#allocation2 + $0x18] sm:$0x1]  ;;  %1507 = vst [vmem:[#allocation2 + $0x14] sm:$0xf] %v1506_v52 }
 0x1ab   : > { %v1194_v38 = vsel %vm2870_vm15, 0, %v1193_v15  ;;  %857 = vst.msk [vmem:[#allocation2 + $0x2c] sm:$0xf] %vm3880_vm6, %v824_v35  ;;  %vm3881_vm6 = vcmask 224448  }
 0x1ac   : > { %1195 = vst [vmem:[#allocation2 + $0x18] sm:$0x1] %v1194_v38 }
 0x1ad   : > { %1280 = vst.msk [vmem:[#allocation2 + $0x18] sm:$0xf] %vm1273_vm0, %v3261_v34  ;;  %1661 = vrot.lane.b32.xlu0 %v3174_v33, %s2493_s14  ;;  %1608 = vrot.lane.b32.xlu1 %v3087_v56, %s2492_s12  ;;  %v3413_v33 = vrot.slane %v1296_v22, 4 }
 0x1ae   : > { %1659 = vrot.lane.b32.xlu2 %v3096_v49, %s2493_s14  ;;  %v1149_v49 = vld [vmem:[#allocation2 + $0x20] sm:$0xf] }
 0x1af   : > { %v1240_v46 = vpop.permute.xlu0 %1239  ;;  %v822_v47 = vpop.permute.xlu1 %821 }
 0x1b0   : > { %1281 = vst.msk [vmem:[#allocation2 + $0x1c] sm:$0xf] %vm1273_vm0, %v1240_v46  ;;  %v937_v25 = vpop.permute.xlu2 %936 }
 0x1b1   : > { %v1553_v16 = vld [vmem:[#allocation2 + $0x14] sm:$0x1]  ;;  %856 = vst.msk [vmem:[#allocation2 + $0x28] sm:$0xf] %vm3878_vm1, %v822_v47 }
 0x1b2   : > { %v1554_v34 = vsel %vm3024_vm14, 0, %v1553_v16 }
 0x1b3   : > { %1555 = vst [vmem:[#allocation2 + $0x14] sm:$0x1] %v1554_v34 }
 0x1b4   : > { %v1366_v12 = vld [vmem:[#allocation2 + $0x18] sm:$0xf]  ;;  %1634 = vst.msk [vmem:[#allocation2 + $0x14] sm:$0xf] %vm1628_vm10, %v3286_v29 }
 0x1b5   : > { %v1367_v56 = vsel %vm2922_vm12, %v3311_v8, %v1366_v12  ;;  %1328 = vrot.lane.b32.xlu0 %v3413_v33, %s2490_s30  ;;  %1472 = vrot.lane.b32.xlu1 %v3346_v57, %s2491_s11 }
 0x1b6   : > { %1368 = vst [vmem:[#allocation2 + $0x18] sm:$0xf] %v1367_v56  ;;  %1610 = vrot.lane.b32.xlu2 %v2607_v26, %s2492_s12 }
 0x1b7   : > { %v1369_v61 = vld [vmem:[#allocation2 + $0x1c] sm:$0xf]  ;;  %v1092_v63 = vpop.permute.xlu0 %1091  ;;  %v3426_v11 = vpop.permute.xlu1 %1093 }
 0x1b8   : > { %v1370_v29 = vsel %vm2922_vm12, %v3363_v37, %v1369_v61  ;;  %v989_v8 = vld [vmem:[#allocation2 + $0x28] sm:$0xf]  ;;  %v1150_v27 = vsel %vm2847_vm13, %v1092_v63, %v1149_v49  ;;  %v3433_v54 = vpop.permute.xlu2 %1318  ;;  %v992_v49 = vld [vmem:[#allocation2 + $0x2c] sm:$0xf] }
 0x1b9   : > { %1371 = vst [vmem:[#allocation2 + $0x1c] sm:$0xf] %v1370_v29  ;;  %v990_v57 = vsel %vm2900_vm4, %v937_v25, %v989_v8 }
 0x1ba   : > { %991 = vst [vmem:[#allocation2 + $0x28] sm:$0xf] %v990_v57 }
 0x1bb   : > { %1151 = vst [vmem:[#allocation2 + $0x20] sm:$0xf] %v1150_v27  ;;  %v1704_v26 = vld [vmem:[#allocation2 + $0x14] sm:$0xf] }
 0x1bc   : > { %v1705_v18 = vsel %vm3069_vm2, %v3334_v10, %v1704_v26 }
 0x1bd   : > { %v1416_v62 = vld [vmem:[#allocation2 + $0x18] sm:$0x8]  ;;  %1606 = vrot.lane.b32.xlu0 %v3085_v55, %s2492_s12  ;;  %1667 = vrot.lane.b32.xlu1 %v3300_v19, %s2493_s14  ;;  %1706 = vst [vmem:[#allocation2 + $0x14] sm:$0xf] %v1705_v18 }
 0x1be   : > { %v1417_v37 = vsel %vm2953_vm9, 0, %v1416_v62  ;;  %1604 = vrot.lane.b32.xlu2 %v2975_v42, %s2492_s12 }
 0x1bf   : > { %1418 = vst [vmem:[#allocation2 + $0x18] sm:$0x8] %v1417_v37  ;;  %v935_v31 = vpop.permute.xlu0 %934  ;;  %v3448_v23 = vpop.permute.xlu1 %1316 }
 0x1c0   : > { %v987_v10 = vsel %vm2900_vm4, %v935_v31, %v986_v2  ;;  %v3452_v43 = vpop.permute.xlu2 %1097  ;;  %v1419_v55 = vld [vmem:[#allocation2 + $0x1c] sm:$0x8] }
 0x1c1   : > { %v1043_v5 = vld [vmem:[#allocation2 + $0x28] sm:$0x8]  ;;  %988 = vst [vmem:[#allocation2 + $0x24] sm:$0xf] %v987_v10  ;;  %v1420_v19 = vsel %vm2953_vm9, 0, %v1419_v55 }
 0x1c2   : > { %v1044_v41 = vsel %vm2799_vm11, 0, %v1043_v5  ;;  %v1199_v42 = vld [vmem:[#allocation2 + $0x20] sm:$0x1]  ;;  %1421 = vst [vmem:[#allocation2 + $0x1c] sm:$0x8] %v1420_v19 }
 0x1c3   : > { %1045 = vst [vmem:[#allocation2 + $0x28] sm:$0x8] %v1044_v41  ;;  %v1200_v40 = vsel %vm2870_vm15, 0, %v1199_v42 }
 0x1c4   : > { %1201 = vst [vmem:[#allocation2 + $0x20] sm:$0x1] %v1200_v40  ;;  %v1751_v45 = vld [vmem:[#allocation2 + $0x14] sm:$0x8] }
 0x1c5   : > { %1282 = vst.msk [vmem:[#allocation2 + $0x20] sm:$0xf] %vm1273_vm0, %v3390_v50  ;;  %1663 = vrot.lane.b32.xlu0 %v3247_v36, %s2493_s14  ;;  %1665 = vrot.lane.b32.xlu1 %v3249_v24, %s2493_s14  ;;  %v1752_v59 = vsel %vm3112_vm7, 0, %v1751_v45 }
 0x1c6   : > { %v1508_v21 = vld [vmem:[#allocation2 + $0x18] sm:$0xf]  ;;  %1669 = vrot.lane.b32.xlu2 %v2689_v28, %s2493_s14  ;;  %1753 = vst [vmem:[#allocation2 + $0x14] sm:$0x8] %v1752_v59 }
 0x1c7   : > { %v1509_v6 = vsel %vm2981_vm8, %v3376_v1, %v1508_v21  ;;  %v1315_v52 = vpop.permute.xlu0 %1314  ;;  %v1096_v50 = vpop.permute.xlu1 %1095  ;;  %1534 = vst.msk [vmem:[#allocation2 + $0x1c] sm:$0xf] %vm3881_vm6, %v2494_v13  ;;  %vm3882_vm6 = vmmov %vm3878_vm1 }
 0x1c8   : > { %1510 = vst [vmem:[#allocation2 + $0x18] sm:$0xf] %v1509_v6  ;;  %v1040_v36 = vld [vmem:[#allocation2 + $0x24] sm:$0x8]  ;;  %v828_v24 = vpop.permute.xlu2 %827 }
 0x1c9   : > { %v1041_v35 = vsel %vm2799_vm11, 0, %v1040_v36  ;;  %859 = vst.msk [vmem:[#allocation2 + $0x34] sm:$0xf] %vm3878_vm1, %v828_v24  ;;  %vm3883_vm1 = vcmask 290048  }
 0x1ca   : > { %1042 = vst [vmem:[#allocation2 + $0x24] sm:$0x8] %v1041_v35  ;;  %v1155_v28 = vld [vmem:[#allocation2 + $0x28] sm:$0xf]  ;;  %v2002_v35 = vld [vmem:[%s3843_s7] sm:$0x3] }
 0x1cb   : > { %v1156_v15 = vsel %vm2847_vm13, %v1096_v50, %v1155_v28  ;;  %v2029_v28 = vsel %vm1885_vm5, %v2002_v35, 0 }
 0x1cc   : > { %v1372_v38 = vld [vmem:[#allocation2 + $0x20] sm:$0xf]  ;;  %1157 = vst [vmem:[#allocation2 + $0x28] sm:$0xf] %v1156_v15  ;;  %2038 = vmatpush.bf16.msra.mxu2 %v2029_v28  ;;  %2452 = vmatpush.bf16.msra.mxu3 %v2029_v28 }
 0x1cd   : > { %v1373_v1 = vsel %vm2922_vm12, %v1315_v52, %v1372_v38  ;;  %1671 = vrot.lane.b32.xlu0 %v3413_v33, %s2493_s14  ;;  %v2401_v48 = vld [vmem:[#allocation2 + $0x10] sm:$0xff] }
 0x1ce   : > { %1374 = vst [vmem:[#allocation2 + $0x20] sm:$0xf] %v1373_v1  ;;  %1612 = vrot.lane.b32.xlu2 %v3313_v51, %s2492_s12  ;;  %2372 = vmatmul.msk.bf16.gmra.mxu1 %vm1860_vm3, %v2401_v48  ;;  %v1559_v10 = vld [vmem:[#allocation2 + $0x1c] sm:$0x1] }
 0x1cf   : > { %v1556_v60 = vld [vmem:[#allocation2 + $0x18] sm:$0x1]  ;;  %v1246_v46 = vpop.permute.xlu0 %1245  ;;  %v826_v47 = vpop.permute.xlu1 %825 }
 0x1d0   : > { %v1557_v22 = vsel %vm3024_vm14, 0, %v1556_v60  ;;  %858 = vst.msk [vmem:[#allocation2 + $0x30] sm:$0xf] %vm3882_vm6, %v826_v47  ;;  %v1461_v25 = vpop.permute.xlu2 %1460  ;;  %v998_v21 = vld [vmem:[#allocation2 + $0x34] sm:$0xf] }
 0x1d1   : > { %1558 = vst [vmem:[#allocation2 + $0x18] sm:$0x1] %v1557_v22  ;;  %v1152_v16 = vld [vmem:[#allocation2 + $0x24] sm:$0xf] }
 0x1d2   : > { %1635 = vst.msk [vmem:[#allocation2 + $0x18] sm:$0xf] %vm1628_vm10, %v3359_v17  ;;  %v1153_v51 = vsel %vm2847_vm13, %v3426_v11, %v1152_v16 }
 0x1d3   : > { %1154 = vst [vmem:[#allocation2 + $0x24] sm:$0xf] %v1153_v51  ;;  %v1205_v34 = vld [vmem:[#allocation2 + $0x28] sm:$0x1] }
 0x1d4   : > { %v1206_v33 = vsel %vm2870_vm15, 0, %v1205_v34 }
 0x1d5   : > { %v1422_v12 = vld [vmem:[#allocation2 + $0x20] sm:$0x8]  ;;  %1207 = vst [vmem:[#allocation2 + $0x28] sm:$0x1] %v1206_v33 }
 0x1d6   : > { %v1423_v56 = vsel %vm2953_vm9, 0, %v1422_v12  ;;  %1284 = vst.msk [vmem:[#allocation2 + $0x28] sm:$0xf] %vm1273_vm0, %v1246_v46  ;;  %v1170_v46 = vld [vmem:[#allocation2 + $0x3c] sm:$0xf] }
 0x1d7   : > { %1424 = vst [vmem:[#allocation2 + $0x20] sm:$0x8] %v1423_v56  ;;  %v939_v61 = vpop.permute.xlu0 %938  ;;  %v3500_v17 = vpop.permute.xlu1 %1247  ;;  %v995_v19 = vld [vmem:[#allocation2 + $0x30] sm:$0xf] }
 0x1d8   : > { %v993_v63 = vsel %vm2900_vm4, %v939_v61, %v992_v49  ;;  %v3504_v11 = vpop.permute.xlu2 %1249 }
 0x1d9   : > { %994 = vst [vmem:[#allocation2 + $0x2c] sm:$0xf] %v993_v63 }
 0x1da   : > { %v1202_v29 = vld [vmem:[#allocation2 + $0x24] sm:$0x1] }
 0x1db   : > { %v1203_v8 = vsel %vm2870_vm15, 0, %v1202_v29 }
 0x1dc   : > { %1204 = vst [vmem:[#allocation2 + $0x24] sm:$0x1] %v1203_v8 }
 0x1dd   : > { %1283 = vst.msk [vmem:[#allocation2 + $0x24] sm:$0xf] %vm1273_vm0, %v3380_v3  ;;  %v1378_v27 = vld [vmem:[#allocation2 + $0x28] sm:$0xf] }
 0x1de   : > { %v1511_v57 = vld [vmem:[#allocation2 + $0x20] sm:$0xf]  ;;  %v1379_v26 = vsel %vm2922_vm12, %v3433_v54, %v1378_v27  ;;  %v1560_v54 = vsel %vm3024_vm14, 0, %v1559_v10 }
 0x1df   : > { %v1512_v18 = vsel %vm2981_vm8, %v1461_v25, %v1511_v57  ;;  %v3515_v62 = vpop.permute.xlu0 %1462  ;;  %v3517_v37 = vpop.permute.xlu1 %1099  ;;  %1380 = vst [vmem:[#allocation2 + $0x28] sm:$0xf] %v1379_v26 }
 0x1e0   : > { %1513 = vst [vmem:[#allocation2 + $0x20] sm:$0xf] %v1512_v18  ;;  %v1046_v2 = vld [vmem:[#allocation2 + $0x2c] sm:$0x8]  ;;  %v3519_v31 = vpop.permute.xlu2 %1322 }
 0x1e1   : > { %v1047_v3 = vsel %vm2799_vm11, 0, %v1046_v2  ;;  %1561 = vst [vmem:[#allocation2 + $0x1c] sm:$0x1] %v1560_v54  ;;  %v1707_v54 = vld [vmem:[#allocation2 + $0x18] sm:$0xf] }
 0x1e2   : > { %1048 = vst [vmem:[#allocation2 + $0x2c] sm:$0x8] %v1047_v3 }
 0x1e3   : > { %1643 = vst.msk [vmem:[#allocation2 + $0x1c] sm:$0xf] %vm1628_vm10, %v2494_v13 }
 0x1e4   : > { %v1375_v55 = vld [vmem:[#allocation2 + $0x24] sm:$0xf]  ;;  %1732 = vst.msk [vmem:[#allocation2 + $0x1c] sm:$0xf] %vm3883_vm1, %v2494_v13 }
 0x1e5   : > { %v1376_v5 = vsel %vm2922_vm12, %v3448_v23, %v1375_v55 }
 0x1e6   : > { %1377 = vst [vmem:[#allocation2 + $0x24] sm:$0xf] %v1376_v5  ;;  %v1428_v41 = vld [vmem:[#allocation2 + $0x28] sm:$0x8]  ;;  %v3581_v5 = vld [vmem:[%s3841_s5] ss:$0 sm:$0xff] }
 0x1e7   : > { %v1562_v42 = vld [vmem:[#allocation2 + $0x20] sm:$0x1]  ;;  %v941_v40 = vpop.permute.xlu0 %940  ;;  %v943_v45 = vpop.permute.xlu1 %942  ;;  %v1429_v59 = vsel %vm2953_vm9, 0, %v1428_v41 }
 0x1e8   : > { %v1563_v6 = vsel %vm3024_vm14, 0, %v1562_v42  ;;  %v996_v23 = vsel %vm2900_vm4, %v941_v40, %v995_v19  ;;  %v1102_v52 = vpop.permute.xlu2 %1101  ;;  %1430 = vst [vmem:[#allocation2 + $0x28] sm:$0x8] %v1429_v59  ;;  %v999_v36 = vsel %vm2900_vm4, %v943_v45, %v998_v21 }
 0x1e9   : > { %1564 = vst [vmem:[#allocation2 + $0x20] sm:$0x1] %v1563_v6  ;;  %v1158_v50 = vld [vmem:[#allocation2 + $0x2c] sm:$0xf] }
 0x1ea   : > { %v1159_v24 = vsel %vm2847_vm13, %v3452_v43, %v1158_v50  ;;  %997 = vst [vmem:[#allocation2 + $0x30] sm:$0xf] %v996_v23  ;;  %v3595_v23 = vld [vmem:[%s3842_s6] ss:$0 sm:$0xff] }
 0x1eb   : > { %1160 = vst [vmem:[#allocation2 + $0x2c] sm:$0xf] %v1159_v24  ;;  %v1757_v1 = vld [vmem:[#allocation2 + $0x1c] sm:$0x8] }
 0x1ec   : > { %1000 = vst [vmem:[#allocation2 + $0x34] sm:$0xf] %v999_v36  ;;  %v1758_v43 = vsel %vm3112_vm7, 0, %v1757_v1 }
 0x1ed   : > { %v1425_v15 = vld [vmem:[#allocation2 + $0x24] sm:$0x8]  ;;  %1759 = vst [vmem:[#allocation2 + $0x1c] sm:$0x8] %v1758_v43 }
 0x1ee   : > { %v1426_v38 = vsel %vm2953_vm9, 0, %v1425_v15 }
 0x1ef   : > { %1427 = vst [vmem:[#allocation2 + $0x24] sm:$0x8] %v1426_v38  ;;  %v1321_v48 = vpop.permute.xlu0 %1320  ;;  %v830_v60 = vpop.permute.xlu1 %829 }
 0x1f0   : > { %860 = vst.msk [vmem:[#allocation2 + $0x38] sm:$0xf] %vm3882_vm6, %v830_v60  ;;  %v1106_v47 = vpop.permute.xlu2 %1105 }
 0x1f1   : > { %v1049_v22 = vld [vmem:[#allocation2 + $0x30] sm:$0x8]  ;;  %v1171_v25 = vsel %vm2847_vm13, %v1106_v47, %v1170_v46 }
 0x1f2   : > { %v1208_v16 = vld [vmem:[#allocation2 + $0x2c] sm:$0x1]  ;;  %v1050_v51 = vsel %vm2799_vm11, 0, %v1049_v22  ;;  %1172 = vst [vmem:[#allocation2 + $0x3c] sm:$0xf] %v1171_v25 }
 0x1f3   : > { %v1209_v34 = vsel %vm2870_vm15, 0, %v1208_v16  ;;  %1051 = vst [vmem:[#allocation2 + $0x30] sm:$0x8] %v1050_v51  ;;  %v1052_v33 = vld [vmem:[#allocation2 + $0x34] sm:$0x8] }
 0x1f4   : > { %1210 = vst [vmem:[#allocation2 + $0x2c] sm:$0x1] %v1209_v34  ;;  %v1053_v12 = vsel %vm2799_vm11, 0, %v1052_v33 }
 0x1f5   : > { %1285 = vst.msk [vmem:[#allocation2 + $0x2c] sm:$0xf] %vm1273_vm0, %v3500_v17 }
 0x1f6   : > { %v1514_v56 = vld [vmem:[#allocation2 + $0x24] sm:$0xf]  ;;  %1054 = vst [vmem:[#allocation2 + $0x34] sm:$0x8] %v1053_v12 }
 0x1f7   : > { %v1515_v49 = vsel %vm2981_vm8, %v3515_v62, %v1514_v56  ;;  %v1001_v61 = vld [vmem:[#allocation2 + $0x38] sm:$0xf]  ;;  %v1252_v63 = vpop.permute.xlu0 %1251  ;;  %v945_v29 = vpop.permute.xlu1 %944 }
 0x1f8   : > { %1516 = vst [vmem:[#allocation2 + $0x24] sm:$0xf] %v1515_v49  ;;  %v1002_v8 = vsel %vm2900_vm4, %v945_v29, %v1001_v61  ;;  %v3567_v27 = vpop.permute.xlu2 %1470 }
 0x1f9   : > { %v1220_v57 = vld [vmem:[#allocation2 + $0x3c] sm:$0x1]  ;;  %1003 = vst [vmem:[#allocation2 + $0x38] sm:$0xf] %v1002_v8 }
 0x1fa   : > { %v1161_v26 = vld [vmem:[#allocation2 + $0x30] sm:$0xf]  ;;  %v1221_v17 = vsel %vm2870_vm15, 0, %v1220_v57 }
 0x1fb   : > { %v1162_v18 = vsel %vm2847_vm13, %v3517_v37, %v1161_v26  ;;  %1222 = vst [vmem:[#allocation2 + $0x3c] sm:$0x1] %v1221_v17 }
 0x1fc   : > { %1163 = vst [vmem:[#allocation2 + $0x30] sm:$0xf] %v1162_v18  ;;  %v1381_v62 = vld [vmem:[#allocation2 + $0x2c] sm:$0xf] }
 0x1fd   : > { %v1164_v2 = vld [vmem:[#allocation2 + $0x34] sm:$0xf]  ;;  %v1382_v30 = vsel %vm2922_vm12, %v1321_v48, %v1381_v62  ;;  %v1898_v10 = vpop.f32.mrf.mxu1 }
 0x1fe   : > { %v1165_v3 = vsel %vm2847_vm13, %v1102_v52, %v1164_v2  ;;  %1383 = vst [vmem:[#allocation2 + $0x2c] sm:$0xf] %v1382_v30  ;;  %v1942_v6 = vmul.f32 %v3581_v5, %v1898_v10 }
 0x1ff   : > { %v1565_v55 = vld [vmem:[#allocation2 + $0x24] sm:$0x1]  ;;  %1166 = vst [vmem:[#allocation2 + $0x34] sm:$0xf] %v1165_v3  ;;  %v3583_v37 = vpop.permute.xlu0 %1326  ;;  %v1658_v19 = vpop.permute.xlu1 %1657 }
 0x200   : > { %v1566_v41 = vsel %vm3024_vm14, 0, %v1565_v55  ;;  %v1055_v42 = vld [vmem:[#allocation2 + $0x38] sm:$0x8]  ;;  %v1708_v40 = vsel %vm3069_vm2, %v1658_v19, %v1707_v54  ;;  %v1256_v59 = vpop.permute.xlu2 %1255  ;;  %v1962_v28 = vadd.f32 %v3595_v23, %v1942_v6 }
 0x201   : > { %1567 = vst [vmem:[#allocation2 + $0x24] sm:$0x1] %v1566_v41  ;;  %v1056_v45 = vsel %vm2799_vm11, 0, %v1055_v42  ;;  %vm2003_vm11 = vcmask 31744  }
 0x202   : > { %1057 = vst [vmem:[#allocation2 + $0x38] sm:$0x8] %v1056_v45  ;;  %v1978_v46 = vmax.f32 %v1962_v28, 0.0 }
 0x203   : > { %v1211_v21 = vld [vmem:[#allocation2 + $0x30] sm:$0x1]  ;;  %1709 = vst [vmem:[#allocation2 + $0x18] sm:$0xf] %v1708_v40 }
 0x204   : > { %v1212_v52 = vsel %vm2870_vm15, 0, %v1211_v21  ;;  %1289 = vst.msk [vmem:[#allocation2 + $0x3c] sm:$0xf] %vm1273_vm0, %v1256_v59 }
 0x205   : > { %1213 = vst [vmem:[#allocation2 + $0x30] sm:$0x1] %v1212_v52  ;;  %v1431_v50 = vld [vmem:[#allocation2 + $0x2c] sm:$0x8]  ;;  %v1900_v24 = vpop.f32.mrf.mxu1 }
 0x206   : > { %1286 = vst.msk [vmem:[#allocation2 + $0x30] sm:$0xf] %vm1273_vm0, %v3504_v11  ;;  %v1214_v0 = vld [vmem:[#allocation2 + $0x34] sm:$0x1]  ;;  %v1432_v36 = vsel %vm2953_vm9, 0, %v1431_v50  ;;  %v1943_v15 = vmul.f32 %v3581_v5, %v1900_v24 }
 0x207   : > { %v1215_v35 = vsel %vm2870_vm15, 0, %v1214_v0  ;;  %1433 = vst [vmem:[#allocation2 + $0x2c] sm:$0x8] %v1432_v36  ;;  %v1325_v38 = vpop.permute.xlu0 %1324  ;;  %v1469_v1 = vpop.permute.xlu1 %1468 }
 0x208   : > { %1216 = vst [vmem:[#allocation2 + $0x34] sm:$0x1] %v1215_v35  ;;  %v1963_v11 = vadd.f32 %v3595_v23, %v1943_v15  ;;  %v1660_v33 = vpop.permute.xlu2 %1659 }
 0x209   : > { %1287 = vst.msk [vmem:[#allocation2 + $0x34] sm:$0xf] %vm1273_vm0, %v1252_v63  ;;  %v1167_v48 = vld [vmem:[#allocation2 + $0x38] sm:$0xf]  ;;  %v1517_v63 = vld [vmem:[#allocation2 + $0x28] sm:$0xf] }
 0x20a   : > { %v1168_v60 = vsel %vm2847_vm13, %v2831_v39, %v1167_v48  ;;  %v1754_v43 = vld [vmem:[#allocation2 + $0x18] sm:$0x8]  ;;  %v1979_v22 = vmax.f32 %v1963_v11, 0.0  ;;  %vm3884_vm13 = vcmask 224448  }
 0x20b   : > { %1169 = vst [vmem:[#allocation2 + $0x38] sm:$0xf] %v1168_v60  ;;  %v1755_v47 = vsel %vm3112_vm7, 0, %v1754_v43  ;;  %v1393_v60 = vld [vmem:[#allocation2 + $0x3c] sm:$0xf] }
 0x20c   : > { %1756 = vst [vmem:[#allocation2 + $0x18] sm:$0x8] %v1755_v47  ;;  %v1994_v16 = vpack.c.bf16 %v1979_v22, %v1978_v46 }
 0x20d   : > { %v1384_v25 = vld [vmem:[#allocation2 + $0x30] sm:$0xf] }
 0x20e   : > { %v1385_v51 = vsel %vm2922_vm12, %v3519_v31, %v1384_v25  ;;  %2378 = vmatmul.msk.bf16.vlgmr.msra.gmra.mxu2 %vm2003_vm11, %v1994_v16  ;;  %v1520_v57 = vld [vmem:[#allocation2 + $0x2c] sm:$0xf] }
 0x20f   : > { %1386 = vst [vmem:[#allocation2 + $0x30] sm:$0xf] %v1385_v51  ;;  %v1601_v20 = vpop.permute.xlu0 %1600  ;;  %v1603_v39 = vpop.permute.xlu1 %1602 }
 0x210   : > { %v1387_v34 = vld [vmem:[#allocation2 + $0x34] sm:$0xf]  ;;  %1636 = vst.msk [vmem:[#allocation2 + $0x20] sm:$0xf] %vm1628_vm10, %v1601_v20  ;;  %v1611_v30 = vpop.permute.xlu2 %1610 }
 0x211   : > { %v1388_v12 = vsel %vm2922_vm12, %v1325_v38, %v1387_v34  ;;  %1637 = vst.msk [vmem:[#allocation2 + $0x24] sm:$0xf] %vm1628_vm10, %v1603_v39 }
 0x212   : > { %v1217_v56 = vld [vmem:[#allocation2 + $0x38] sm:$0x1]  ;;  %1389 = vst [vmem:[#allocation2 + $0x34] sm:$0xf] %v1388_v12 }
 0x213   : > { %v1218_v49 = vsel %vm2870_vm15, 0, %v1217_v56  ;;  %v2402_v31 = vld [vmem:[#allocation2 + $0x18] sm:$0xff] }
 0x214   : > { %1219 = vst [vmem:[#allocation2 + $0x38] sm:$0x1] %v1218_v49  ;;  %2373 = vmatmul.msk.bf16.gmra.mxu1 %vm1860_vm3, %v2402_v31 }
 0x215   : > { %1288 = vst.msk [vmem:[#allocation2 + $0x38] sm:$0xf] %vm1273_vm0, %v2855_v53 }
 0x216   : > { %v1434_v61 = vld [vmem:[#allocation2 + $0x30] sm:$0x8] }
 0x217   : > { %v1435_v29 = vsel %vm2953_vm9, 0, %v1434_v61  ;;  %v1465_v8 = vpop.permute.xlu0 %1464  ;;  %v1467_v26 = vpop.permute.xlu1 %1466  ;;  %v1710_v17 = vld [vmem:[#allocation2 + $0x20] sm:$0xf] }
 0x218   : > { %1436 = vst [vmem:[#allocation2 + $0x30] sm:$0x8] %v1435_v29  ;;  %v1518_v4 = vsel %vm2981_vm8, %v1465_v8, %v1517_v63  ;;  %v1521_v18 = vsel %vm2981_vm8, %v1467_v26, %v1520_v57  ;;  %v1711_v53 = vsel %vm3069_vm2, %v1660_v33, %v1710_v17  ;;  %v1713_v59 = vld [vmem:[#allocation2 + $0x24] sm:$0xf]  ;;  %v1605_v35 = vpop.permute.xlu2 %1604 }
 0x219   : > { %v1437_v62 = vld [vmem:[#allocation2 + $0x34] sm:$0x8]  ;;  %1519 = vst [vmem:[#allocation2 + $0x28] sm:$0xf] %v1518_v4 }
 0x21a   : > { %v1438_v2 = vsel %vm2953_vm9, 0, %v1437_v62  ;;  %1522 = vst [vmem:[#allocation2 + $0x2c] sm:$0xf] %v1521_v18 }
 0x21b   : > { %1439 = vst [vmem:[#allocation2 + $0x34] sm:$0x8] %v1438_v2  ;;  %v1903_v3 = vpop.f32.mrf.mxu1 }
 0x21c   : > { %v1390_v10 = vld [vmem:[#allocation2 + $0x38] sm:$0xf]  ;;  %1712 = vst [vmem:[#allocation2 + $0x20] sm:$0xf] %v1711_v53  ;;  %v1944_v45 = vmul.f32 %v3581_v5, %v1903_v3 }
 0x21d   : > { %v1391_v54 = vsel %vm2922_vm12, %v3583_v37, %v1390_v10 }
 0x21e   : > { %1392 = vst [vmem:[#allocation2 + $0x38] sm:$0xf] %v1391_v54  ;;  %v1964_v28 = vadd.f32 %v3595_v23, %v1944_v45 }
 0x21f   : > { %v1523_v55 = vld [vmem:[#allocation2 + $0x30] sm:$0xf]  ;;  %v1662_v19 = vpop.permute.xlu0 %1661  ;;  %v1609_v41 = vpop.permute.xlu1 %1608 }
 0x220   : > { %v1524_v42 = vsel %vm2981_vm8, %v1469_v1, %v1523_v55  ;;  %v1568_v40 = vld [vmem:[#allocation2 + $0x28] sm:$0x1]  ;;  %v1714_v0 = vsel %vm3069_vm2, %v1662_v19, %v1713_v59  ;;  %v1980_v47 = vmax.f32 %v1964_v28, 0.0  ;;  %v1670_v12 = vpop.permute.xlu2 %1669 }
 0x221   : > { %1525 = vst [vmem:[#allocation2 + $0x30] sm:$0xf] %v1524_v42  ;;  %v1569_v21 = vsel %vm3024_vm14, 0, %v1568_v40  ;;  %v1571_v6 = vld [vmem:[#allocation2 + $0x2c] sm:$0x1] }
 0x222   : > { %v1526_v52 = vld [vmem:[#allocation2 + $0x34] sm:$0xf]  ;;  %1570 = vst [vmem:[#allocation2 + $0x28] sm:$0x1] %v1569_v21  ;;  %v1572_v37 = vsel %vm3024_vm14, 0, %v1571_v6 }
 0x223   : > { %v1527_v50 = vsel %vm2981_vm8, %v3567_v27, %v1526_v52  ;;  %1573 = vst [vmem:[#allocation2 + $0x2c] sm:$0x1] %v1572_v37  ;;  %v1905_v36 = vpop.f32.mrf.mxu1  ;;  %v1760_v24 = vld [vmem:[#allocation2 + $0x20] sm:$0x8] }
 0x224   : > { %1528 = vst [vmem:[#allocation2 + $0x34] sm:$0xf] %v1527_v50  ;;  %v1945_v15 = vmul.f32 %v3581_v5, %v1905_v36  ;;  %v1761_v1 = vsel %vm3112_vm7, 0, %v1760_v24 }
 0x225   : > { %v1440_v38 = vld [vmem:[#allocation2 + $0x38] sm:$0x8]  ;;  %1638 = vst.msk [vmem:[#allocation2 + $0x28] sm:$0xf] %vm1628_vm10, %v1605_v35 }
 0x226   : > { %v1441_v27 = vsel %vm2953_vm9, 0, %v1440_v38  ;;  %1715 = vst [vmem:[#allocation2 + $0x24] sm:$0xf] %v1714_v0  ;;  %v1965_v48 = vadd.f32 %v3595_v23, %v1945_v15 }
 0x227   : > { %1442 = vst [vmem:[#allocation2 + $0x38] sm:$0x8] %v1441_v27  ;;  %v1329_v11 = vpop.permute.xlu0 %1328  ;;  %v1473_v43 = vpop.permute.xlu1 %1472 }
 0x228   : > { %v1574_v46 = vld [vmem:[#allocation2 + $0x30] sm:$0x1]  ;;  %v1981_v22 = vmax.f32 %v1965_v48, 0.0  ;;  %v1394_v25 = vsel %vm2922_vm12, %v1329_v11, %v1393_v60  ;;  %1762 = vst [vmem:[#allocation2 + $0x20] sm:$0x8] %v1761_v1  ;;  %v1613_v53 = vpop.permute.xlu2 %1612 }
 0x229   : > { %v1575_v16 = vsel %vm3024_vm14, 0, %v1574_v46  ;;  %1395 = vst [vmem:[#allocation2 + $0x3c] sm:$0xf] %v1394_v25  ;;  %v3722_v60 = vld [vmem:[%s3844_s8] ss:$0 sm:$0xff] }
 0x22a   : > { %1576 = vst [vmem:[#allocation2 + $0x30] sm:$0x1] %v1575_v16  ;;  %v1995_v51 = vpack.c.bf16 %v1981_v22, %v1980_v47  ;;  %v3728_v46 = vld [vmem:[%s3845_s9] ss:$0 sm:$0xff] }
 0x22b   : > { %v1577_v20 = vld [vmem:[#allocation2 + $0x34] sm:$0x1]  ;;  %1640 = vst.msk [vmem:[#allocation2 + $0x30] sm:$0xf] %vm1628_vm10, %v1609_v41 }
 0x22c   : > { %v1578_v39 = vsel %vm3024_vm14, 0, %v1577_v20  ;;  %2379 = vmatmul.msk.bf16.gmra.mxu2 %vm2003_vm11, %v1995_v51  ;;  %v1716_v4 = vld [vmem:[#allocation2 + $0x28] sm:$0xf] }
 0x22d   : > { %1579 = vst [vmem:[#allocation2 + $0x34] sm:$0x1] %v1578_v39  ;;  %v1763_v34 = vld [vmem:[#allocation2 + $0x24] sm:$0x8] }
 0x22e   : > { %1641 = vst.msk [vmem:[#allocation2 + $0x34] sm:$0xf] %vm1628_vm10, %v1611_v30  ;;  %v1764_v58 = vsel %vm3112_vm7, 0, %v1763_v34  ;;  %v1529_v33 = vld [vmem:[#allocation2 + $0x38] sm:$0xf] }
 0x22f   : > { %1765 = vst [vmem:[#allocation2 + $0x24] sm:$0x8] %v1764_v58  ;;  %v1530_v56 = vsel %vm2981_vm8, %v1473_v43, %v1529_v33  ;;  %v1607_v49 = vpop.permute.xlu0 %1606  ;;  %v1668_v63 = vpop.permute.xlu1 %1667  ;;  %vm3885_vm8 = vmmov %vm3883_vm1  ;;  %v2410_v43 = vld [vmem:[%s2569_s21] sm:$0xff]  }
 0x230   : > { %v1443_v31 = vld [vmem:[#allocation2 + $0x3c] sm:$0x8]  ;;  %1531 = vst [vmem:[#allocation2 + $0x38] sm:$0xf] %v1530_v56  ;;  %v2411_v25 = vunpack.c.l.bf16 %v2410_v43  ;;  %v2412_v33 = vunpack.c.h.bf16 %v2410_v43 }
 0x231   : > { %v1444_v61 = vsel %vm2953_vm9, 0, %v1443_v31  ;;  %1639 = vst.msk [vmem:[#allocation2 + $0x2c] sm:$0xf] %vm1628_vm10, %v1607_v49 }
 0x232   : > { %1445 = vst [vmem:[#allocation2 + $0x3c] sm:$0x8] %v1444_v61  ;;  %v1722_v29 = vld [vmem:[#allocation2 + $0x30] sm:$0xf] }
 0x233   : > { %1535 = vst.msk [vmem:[#allocation2 + $0x3c] sm:$0xf] %vm3884_vm13, %v2494_v13  ;;  %v1723_v8 = vsel %vm3069_vm2, %v1668_v63, %v1722_v29 }
 0x234   : > { %1724 = vst [vmem:[#allocation2 + $0x30] sm:$0xf] %v1723_v8 }
 0x235   : > { %v1725_v44 = vld [vmem:[#allocation2 + $0x34] sm:$0xf] }
 0x236   : > { %v1726_v57 = vsel %vm3069_vm2, %v1670_v12, %v1725_v44  ;;  %v2403_v26 = vld [vmem:[#allocation2 + $0x20] sm:$0xff] }
 0x237   : > { %1727 = vst [vmem:[#allocation2 + $0x34] sm:$0xf] %v1726_v57  ;;  %v1580_v9 = vld [vmem:[#allocation2 + $0x38] sm:$0x1]  ;;  %v1664_v17 = vpop.permute.xlu0 %1663  ;;  %2374 = vmatmul.msk.bf16.gmra.mxu1 %vm1860_vm3, %v2403_v26  ;;  %v1666_v54 = vpop.permute.xlu1 %1665 }
 0x238   : > { %v1581_v18 = vsel %vm3024_vm14, 0, %v1580_v9  ;;  %v1717_v62 = vsel %vm3069_vm2, %v1664_v17, %v1716_v4  ;;  %v1719_v30 = vld [vmem:[#allocation2 + $0x2c] sm:$0xf] }
 0x239   : > { %1582 = vst [vmem:[#allocation2 + $0x38] sm:$0x1] %v1581_v18  ;;  %v1720_v41 = vsel %vm3069_vm2, %v1666_v54, %v1719_v30  ;;  %v2441_v4 = vld [vmem:[%s2569_s21 + $0x8] sm:$0xff]  }
 0x23a   : > { %v1583_v2 = vld [vmem:[#allocation2 + $0x3c] sm:$0x1]  ;;  %1642 = vst.msk [vmem:[#allocation2 + $0x38] sm:$0xf] %vm1628_vm10, %v1613_v53 }
 0x23b   : > { %v1584_v3 = vsel %vm3024_vm14, 0, %v1583_v2  ;;  %v1772_v10 = vld [vmem:[#allocation2 + $0x30] sm:$0x8]  ;;  %1718 = vst [vmem:[#allocation2 + $0x28] sm:$0xf] %v1717_v62  ;;  %v2415_v62 = vunpack.c.l.bf16 %v2441_v4 }
 0x23c   : > { %1585 = vst [vmem:[#allocation2 + $0x3c] sm:$0x1] %v1584_v3  ;;  %v1773_v55 = vsel %vm3112_vm7, 0, %v1772_v10 }
 0x23d   : > { %1644 = vst.msk [vmem:[#allocation2 + $0x3c] sm:$0xf] %vm1628_vm10, %v2494_v13 }
 0x23e   : > { %v1775_v19 = vld [vmem:[#allocation2 + $0x34] sm:$0x8]  ;;  %1733 = vst.msk [vmem:[#allocation2 + $0x3c] sm:$0xf] %vm3885_vm8, %v2494_v13 }
 0x23f   : > { %v1776_v32 = vsel %vm3112_vm7, 0, %v1775_v19  ;;  %1774 = vst [vmem:[#allocation2 + $0x30] sm:$0x8] %v1773_v55  ;;  %v1672_v42 = vpop.permute.xlu0 %1671  ;;  %v2416_v19 = vunpack.c.h.bf16 %v2441_v4 }
 0x240   : > { %1777 = vst [vmem:[#allocation2 + $0x34] sm:$0x8] %v1776_v32 }
 0x241   : > { %1721 = vst [vmem:[#allocation2 + $0x2c] sm:$0xf] %v1720_v41  ;;  %v1728_v40 = vld [vmem:[#allocation2 + $0x38] sm:$0xf] }
 0x242   : > { %v1766_v45 = vld [vmem:[#allocation2 + $0x28] sm:$0x8]  ;;  %v1729_v59 = vsel %vm3069_vm2, %v1672_v42, %v1728_v40 }
 0x243   : > { %v1767_v21 = vsel %vm3112_vm7, 0, %v1766_v45  ;;  %1730 = vst [vmem:[#allocation2 + $0x38] sm:$0xf] %v1729_v59 }
 0x244   : > { %1768 = vst [vmem:[#allocation2 + $0x28] sm:$0x8] %v1767_v21 }
 0x245   : > { %v1781_v13 = vld [vmem:[#allocation2 + $0x3c] sm:$0x8] }
 0x246   : > { %v1782_v6 = vsel %vm3112_vm7, 0, %v1781_v13 }
 0x247   : > { %v2405_v52 = vld [vmem:[#allocation2 + $0x30] sm:$0xff]  ;;  %1783 = vst [vmem:[#allocation2 + $0x3c] sm:$0x8] %v1782_v6 }
 0x248   : > { %v1769_v37 = vld [vmem:[#allocation2 + $0x2c] sm:$0x8]  ;;  %2376 = vmatmul.msk.bf16.vlgmr.msrb.gmra.mxu3 %vm1860_vm3, %v2405_v52 }
 0x249   : > { %v1770_v50 = vsel %vm3112_vm7, 0, %v1769_v37 }
 0x24a   : > { %1771 = vst [vmem:[#allocation2 + $0x2c] sm:$0x8] %v1770_v50  ;;  %v1778_v7 = vld [vmem:[#allocation2 + $0x38] sm:$0x8] }
 0x24b   : > { %v1779_v0 = vsel %vm3112_vm7, 0, %v1778_v7  ;;  %v1908_v36 = vpop.f32.mrf.mxu1  ;;  %vm2200_vm7 = vcmask 125952  }
 0x24c   : > { %1780 = vst [vmem:[#allocation2 + $0x38] sm:$0x8] %v1779_v0  ;;  %v1946_v24 = vmul.f32 %v3581_v5, %v1908_v36 }
 0x24e   : > { %v1966_v15 = vadd.f32 %v3595_v23, %v1946_v24 }
 0x250   : > { %v1982_v48 = vmax.f32 %v1966_v15, 0.0 }
 0x251   : > { %v2404_v35 = vld [vmem:[#allocation2 + $0x28] sm:$0xff] }
 0x252   : > { %2375 = vmatmul.msk.bf16.gmra.mxu1 %vm1860_vm3, %v2404_v35 }
 0x253   : > { %v1910_v28 = vpop.f32.mrf.mxu1  ;;  %v2406_v1 = vld [vmem:[#allocation2 + $0x38] sm:$0xff] }
 0x254   : > { %v1947_v38 = vmul.f32 %v3581_v5, %v1910_v28 }
 0x256   : > { %v1967_v27 = vadd.f32 %v3595_v23, %v1947_v38 }
 0x258   : > { %v1983_v14 = vmax.f32 %v1967_v27, 0.0  ;;  %2377 = vmatmul.msk.bf16.gmra.mxu3 %vm1860_vm3, %v2406_v1 }
 0x25a   : > { %v1996_v11 = vpack.c.bf16 %v1983_v14, %v1982_v48 }
 0x25c   : > { %2380 = vmatmul.msk.bf16.gmra.mxu2 %vm2003_vm11, %v1996_v11  ;;  %v2442_v11 = vld [vmem:[%s2569_s21 + $0x10] sm:$0xff]  }
 0x291   : > { %v2040_v47 = vpop.f32.mrf.mxu2  ;;  %v1913_v22 = vpop.f32.mrf.mxu1 }
 0x292   : > { %v2116_v16 = vmul.f32 %v3722_v60, %v2040_v47  ;;  %v1948_v39 = vmul.f32 %v3581_v5, %v1913_v22 }
 0x294   : > { %v2136_v51 = vadd.f32 %v3728_v46, %v2116_v16  ;;  %v1968_v49 = vadd.f32 %v3595_v23, %v1948_v39 }
 0x296   : > { %v2152_v20 = vadd.f32 %v2411_v25, %v2136_v51  ;;  %v1984_v8 = vmax.f32 %v1968_v49, 0.0  ;;  %v2419_v25 = vunpack.c.l.bf16 %v2442_v11 }
 0x298   : > { %v2168_v34 = vmax.f32 %v2152_v20, 0.0 }
 0x299   : > { %v2042_v58 = vpop.f32.mrf.mxu2  ;;  %v1915_v12 = vpop.f32.mrf.mxu1 }
 0x29a   : > { %v2184_v56 = vpack.c.bf16 %v2168_v34, %v2168_v34  ;;  %v2117_v31 = vmul.f32 %v3722_v60, %v2042_v58  ;;  %v1949_v61 = vmul.f32 %v3581_v5, %v1915_v12 }
 0x29c   : > { %2201 = vst.msk [vmem:[%s3738_s24] sm:$0xf] %vm2200_vm7, %v2184_v56  ;;  %v2137_v63 = vadd.f32 %v3728_v46, %v2117_v31  ;;  %v1969_v29 = vadd.f32 %v3595_v23, %v1949_v61 }
 0x29e   : > { %v2153_v44 = vadd.f32 %v2412_v33, %v2137_v63  ;;  %v1985_v57 = vmax.f32 %v1969_v29, 0.0  ;;  %v2420_v29 = vunpack.c.h.bf16 %v2442_v11 }
 0x2a0   : > { %v2169_v26 = vmax.f32 %v2153_v44, 0.0  ;;  %v1997_v9 = vpack.c.bf16 %v1985_v57, %v1984_v8 }
 0x2a2   : > { %v2185_v17 = vpack.c.bf16 %v2169_v26, %v2169_v26  ;;  %2381 = vmatmul.msk.bf16.gmra.mxu2 %vm2003_vm11, %v1997_v9 }
 0x2a4   : > { %2202 = vst.msk [vmem:[%s3738_s24 + $0x4] sm:$0xf] %vm2200_vm7, %v2185_v17 }
 0x2af   : > { %v2045_v18 = vpop.f32.mrf.mxu2 }
 0x2b0   : > { %v2118_v53 = vmul.f32 %v3722_v60, %v2045_v18 }
 0x2b2   : > { %v2138_v2 = vadd.f32 %v3728_v46, %v2118_v53 }
 0x2b4   : > { %v2154_v30 = vadd.f32 %v2415_v62, %v2138_v2  ;;  %v1918_v3 = vpop.f32.mrf.mxu1  ;;  %v2443_v2 = vld [vmem:[%s2569_s21 + $0x18] sm:$0xff]  }
 0x2b5   : > { %v1950_v32 = vmul.f32 %v3581_v5, %v1918_v3  ;;  %v2423_v3 = vunpack.c.l.bf16 %v2443_v2 }
 0x2b6   : > { %v2170_v10 = vmax.f32 %v2154_v30, 0.0 }
 0x2b7   : > { %v2047_v54 = vpop.f32.mrf.mxu2  ;;  %v1970_v59 = vadd.f32 %v3595_v23, %v1950_v32 }
 0x2b8   : > { %v2186_v55 = vpack.c.bf16 %v2170_v10, %v2170_v10  ;;  %v2119_v41 = vmul.f32 %v3722_v60, %v2047_v54 }
 0x2b9   : > { %v1986_v37 = vmax.f32 %v1970_v59, 0.0 }
 0x2ba   : > { %2203 = vst.msk [vmem:[%s3738_s24 + $0x8] sm:$0xf] %vm2200_vm7, %v2186_v55  ;;  %v2139_v42 = vadd.f32 %v3728_v46, %v2119_v41 }
 0x2bc   : > { %v2155_v40 = vadd.f32 %v2416_v19, %v2139_v42  ;;  %v1920_v45 = vpop.f32.mrf.mxu1  ;;  %v2424_v42 = vunpack.c.h.bf16 %v2443_v2 }
 0x2bd   : > { %v1951_v13 = vmul.f32 %v3581_v5, %v1920_v45 }
 0x2be   : > { %v2171_v21 = vmax.f32 %v2155_v40, 0.0 }
 0x2bf   : > { %v1971_v52 = vadd.f32 %v3595_v23, %v1951_v13 }
 0x2c0   : > { %v2187_v6 = vpack.c.bf16 %v2171_v21, %v2171_v21 }
 0x2c1   : > { %v1987_v50 = vmax.f32 %v1971_v52, 0.0 }
 0x2c2   : > { %2204 = vst.msk [vmem:[%s3738_s24 + $0xc] sm:$0xf] %vm2200_vm7, %v2187_v6  ;;  %v2444_v6 = vld [vmem:[%s2569_s21 + $0x20] sm:$0xff]  }
 0x2c3   : > { %v1998_v7 = vpack.c.bf16 %v1987_v50, %v1986_v37  ;;  %v2427_v37 = vunpack.c.l.bf16 %v2444_v6 }
 0x2c5   : > { %2382 = vmatmul.msk.bf16.gmra.mxu2 %vm2003_vm11, %v1998_v7 }
 0x2cb   : > { %v1928_v0 = vpop.f32.mrf.mxu3 }
 0x2cc   : > { %v1954_v39 = vmul.f32 %v3581_v5, %v1928_v0 }
 0x2ce   : > { %v1974_v61 = vadd.f32 %v3595_v23, %v1954_v39 }
 0x2cf   : > { %v1923_v36 = vpop.f32.mrf.mxu1 }
 0x2d0   : > { %v1952_v35 = vmul.f32 %v3581_v5, %v1923_v36  ;;  %v1990_v4 = vmax.f32 %v1974_v61, 0.0  ;;  %v2446_v61 = vld [vmem:[%s2569_s21 + $0x30] sm:$0xff]  }
 0x2d2   : > { %v1972_v15 = vadd.f32 %v3595_v23, %v1952_v35 }
 0x2d3   : > { %v1930_v24 = vpop.f32.mrf.mxu3 }
 0x2d4   : > { %v1988_v48 = vmax.f32 %v1972_v15, 0.0  ;;  %v1955_v51 = vmul.f32 %v3581_v5, %v1930_v24 }
 0x2d6   : > { %v1975_v56 = vadd.f32 %v3595_v23, %v1955_v51 }
 0x2d7   : > { %v1925_v28 = vpop.f32.mrf.mxu1 }
 0x2d8   : > { %v1953_v38 = vmul.f32 %v3581_v5, %v1925_v28  ;;  %v1991_v9 = vmax.f32 %v1975_v56, 0.0  ;;  %v2428_v28 = vunpack.c.h.bf16 %v2444_v6 }
 0x2da   : > { %v1973_v1 = vadd.f32 %v3595_v23, %v1953_v38  ;;  %v2000_v62 = vpack.c.bf16 %v1991_v9, %v1990_v4 }
 0x2db   : > { %v1933_v27 = vpop.f32.mrf.mxu3 }
 0x2dc   : > { %v1989_v14 = vmax.f32 %v1973_v1, 0.0  ;;  %v1956_v22 = vmul.f32 %v3581_v5, %v1933_v27 }
 0x2de   : > { %v1999_v43 = vpack.c.bf16 %v1989_v14, %v1988_v48  ;;  %v1976_v58 = vadd.f32 %v3595_v23, %v1956_v22  ;;  %v2445_v14 = vld [vmem:[%s2569_s21 + $0x28] sm:$0xff]  }
 0x2df   : > { %v2050_v47 = vpop.f32.mrf.mxu2  ;;  %v2432_v39 = vunpack.c.h.bf16 %v2445_v14 }
 0x2e0   : > { %2383 = vmatmul.msk.bf16.gmra.mxu2 %vm2003_vm11, %v1999_v43  ;;  %v2120_v16 = vmul.f32 %v3722_v60, %v2050_v47  ;;  %v1992_v8 = vmax.f32 %v1976_v58, 0.0  ;;  %v2431_v43 = vunpack.c.l.bf16 %v2445_v14  ;;  %v2447_v58 = vld [vmem:[%s2569_s21 + $0x38] sm:$0xff]  }
 0x2e2   : > { %v2140_v20 = vadd.f32 %v3728_v46, %v2120_v16 }
 0x2e3   : > { %v1935_v34 = vpop.f32.mrf.mxu3 }
 0x2e4   : > { %v2156_v33 = vadd.f32 %v2419_v25, %v2140_v20  ;;  %v1957_v12 = vmul.f32 %v3581_v5, %v1935_v34 }
 0x2e6   : > { %v2172_v49 = vmax.f32 %v2156_v33, 0.0  ;;  %v1977_v31 = vadd.f32 %v3595_v23, %v1957_v12 }
 0x2e7   : > { %v2052_v63 = vpop.f32.mrf.mxu2 }
 0x2e8   : > { %v2188_v44 = vpack.c.bf16 %v2172_v49, %v2172_v49  ;;  %v1993_v57 = vmax.f32 %v1977_v31, 0.0  ;;  %v2121_v26 = vmul.f32 %v3722_v60, %v2052_v63  ;;  %v2439_v49 = vunpack.c.l.bf16 %v2447_v58 }
 0x2ea   : > { %2205 = vst.msk [vmem:[%s3738_s24 + $0x10] sm:$0xf] %vm2200_vm7, %v2188_v44  ;;  %v2001_v5 = vpack.c.bf16 %v1993_v57, %v1992_v8  ;;  %v2141_v17 = vadd.f32 %v3728_v46, %v2121_v26  ;;  %v2435_v57 = vunpack.c.l.bf16 %v2446_v61 }
 0x2ec   : > { %v2157_v18 = vadd.f32 %v2420_v29, %v2141_v17  ;;  %2385 = vmatmul.msk.bf16.vlgmr.msra.gmra.mxu3 %vm2003_vm11, %v2001_v5 }
 0x2ee   : > { %v2173_v23 = vmax.f32 %v2157_v18, 0.0 }
 0x2f0   : > { %v2189_v53 = vpack.c.bf16 %v2173_v23, %v2173_v23  ;;  %2384 = vmatmul.msk.bf16.gmra.mxu2 %vm2003_vm11, %v2000_v62  ;;  %v2440_v62 = vunpack.c.h.bf16 %v2447_v58 }
 0x2f2   : > { %2206 = vst.msk [vmem:[%s3738_s24 + $0x14] sm:$0xf] %vm2200_vm7, %v2189_v53 }
 0x325   : > { %v2055_v30 = vpop.f32.mrf.mxu2 }
 0x326   : > { %v2122_v10 = vmul.f32 %v3722_v60, %v2055_v30 }
 0x328   : > { %v2142_v54 = vadd.f32 %v3728_v46, %v2122_v10 }
 0x32a   : > { %v2158_v55 = vadd.f32 %v2423_v3, %v2142_v54  ;;  %v2436_v54 = vunpack.c.h.bf16 %v2446_v61 }
 0x32c   : > { %v2174_v19 = vmax.f32 %v2158_v55, 0.0 }
 0x32d   : > { %v2057_v41 = vpop.f32.mrf.mxu2 }
 0x32e   : > { %v2190_v32 = vpack.c.bf16 %v2174_v19, %v2174_v19  ;;  %v2123_v40 = vmul.f32 %v3722_v60, %v2057_v41 }
 0x330   : > { %2207 = vst.msk [vmem:[%s3738_s24 + $0x18] sm:$0xf] %vm2200_vm7, %v2190_v32  ;;  %v2143_v45 = vadd.f32 %v3728_v46, %v2123_v40 }
 0x332   : > { %v2159_v59 = vadd.f32 %v2424_v42, %v2143_v45 }
 0x334   : > { %v2175_v21 = vmax.f32 %v2159_v59, 0.0 }
 0x336   : > { %v2191_v13 = vpack.c.bf16 %v2175_v21, %v2175_v21 }
 0x338   : > { %2208 = vst.msk [vmem:[%s3738_s24 + $0x1c] sm:$0xf] %vm2200_vm7, %v2191_v13 }
 0x348   : > { %v2060_v52 = vpop.f32.mrf.mxu2 }
 0x349   : > { %v2124_v50 = vmul.f32 %v3722_v60, %v2060_v52 }
 0x34b   : > { %v2144_v7 = vadd.f32 %v3728_v46, %v2124_v50 }
 0x34d   : > { %v2160_v0 = vadd.f32 %v2427_v37, %v2144_v7 }
 0x34f   : > { %v2176_v36 = vmax.f32 %v2160_v0, 0.0 }
 0x350   : > { %v2062_v24 = vpop.f32.mrf.mxu2 }
 0x351   : > { %v2192_v35 = vpack.c.bf16 %v2176_v36, %v2176_v36  ;;  %v2125_v15 = vmul.f32 %v3722_v60, %v2062_v24 }
 0x353   : > { %2209 = vst.msk [vmem:[%s3738_s24 + $0x20] sm:$0xf] %vm2200_vm7, %v2192_v35  ;;  %v2145_v38 = vadd.f32 %v3728_v46, %v2125_v15 }
 0x355   : > { %v2161_v1 = vadd.f32 %v2428_v28, %v2145_v38 }
 0x357   : > { %v2177_v27 = vmax.f32 %v2161_v1, 0.0 }
 0x359   : > { %v2193_v48 = vpack.c.bf16 %v2177_v27, %v2177_v27 }
 0x35b   : > { %2210 = vst.msk [vmem:[%s3738_s24 + $0x24] sm:$0xf] %vm2200_vm7, %v2193_v48 }
 0x363   : > { %v2065_v11 = vpop.f32.mrf.mxu2 }
 0x364   : > { %v2126_v47 = vmul.f32 %v3722_v60, %v2065_v11 }
 0x366   : > { %v2146_v22 = vadd.f32 %v3728_v46, %v2126_v47 }
 0x368   : > { %v2162_v25 = vadd.f32 %v2431_v43, %v2146_v22 }
 0x36a   : > { %v2178_v16 = vmax.f32 %v2162_v25, 0.0 }
 0x36b   : > { %v2067_v51 = vpop.f32.mrf.mxu2 }
 0x36c   : > { %v2194_v20 = vpack.c.bf16 %v2178_v16, %v2178_v16  ;;  %v2127_v34 = vmul.f32 %v3722_v60, %v2067_v51 }
 0x36e   : > { %2211 = vst.msk [vmem:[%s3738_s24 + $0x28] sm:$0xf] %vm2200_vm7, %v2194_v20  ;;  %v2147_v33 = vadd.f32 %v3728_v46, %v2127_v34 }
 0x36f   : > { %v2075_v12 = vpop.f32.mrf.mxu3 }
 0x370   : > { %v2163_v56 = vadd.f32 %v2432_v39, %v2147_v33  ;;  %v2130_v31 = vmul.f32 %v3722_v60, %v2075_v12 }
 0x372   : > { %v2179_v63 = vmax.f32 %v2163_v56, 0.0  ;;  %v2150_v29 = vadd.f32 %v3728_v46, %v2130_v31 }
 0x373   : > { %v2070_v8 = vpop.f32.mrf.mxu2 }
 0x374   : > { %v2195_v44 = vpack.c.bf16 %v2179_v63, %v2179_v63  ;;  %v2128_v26 = vmul.f32 %v3722_v60, %v2070_v8  ;;  %v2166_v9 = vadd.f32 %v2439_v49, %v2150_v29 }
 0x376   : > { %2212 = vst.msk [vmem:[%s3738_s24 + $0x2c] sm:$0xf] %vm2200_vm7, %v2195_v44  ;;  %v2148_v5 = vadd.f32 %v3728_v46, %v2128_v26  ;;  %v2182_v17 = vmax.f32 %v2166_v9, 0.0 }
 0x377   : > { %v2077_v4 = vpop.f32.mrf.mxu3 }
 0x378   : > { %v2164_v18 = vadd.f32 %v2435_v57, %v2148_v5  ;;  %v2198_v23 = vpack.c.bf16 %v2182_v17, %v2182_v17  ;;  %v2131_v53 = vmul.f32 %v3722_v60, %v2077_v4 }
 0x37a   : > { %v2180_v2 = vmax.f32 %v2164_v18, 0.0  ;;  %2215 = vst.msk [vmem:[%s3738_s24 + $0x38] sm:$0xf] %vm2200_vm7, %v2198_v23  ;;  %v2151_v30 = vadd.f32 %v3728_v46, %v2131_v53 }
 0x37b   : > { %v2072_v3 = vpop.f32.mrf.mxu2 }
 0x37c   : > { %v2196_v10 = vpack.c.bf16 %v2180_v2, %v2180_v2  ;;  %v2129_v55 = vmul.f32 %v3722_v60, %v2072_v3  ;;  %v2167_v19 = vadd.f32 %v2440_v62, %v2151_v30 }
 0x37e   : > { %2213 = vst.msk [vmem:[%s3738_s24 + $0x30] sm:$0xf] %vm2200_vm7, %v2196_v10  ;;  %v2149_v41 = vadd.f32 %v3728_v46, %v2129_v55  ;;  %v2183_v32 = vmax.f32 %v2167_v19, 0.0 }
 0x380   : > { %v2165_v42 = vadd.f32 %v2436_v54, %v2149_v41  ;;  %v2199_v40 = vpack.c.bf16 %v2183_v32, %v2183_v32 }
 0x382   : > { %v2181_v45 = vmax.f32 %v2165_v42, 0.0  ;;  %2216 = vst.msk [vmem:[%s3738_s24 + $0x3c] sm:$0xf] %vm2200_vm7, %v2199_v40 }
 0x384   : > { %v2197_v59 = vpack.c.bf16 %v2181_v45, %v2181_v45 }
 0x386   : > { %2214 = vst.msk [vmem:[%s3738_s24 + $0x34] sm:$0xf] %vm2200_vm7, %v2197_v59 }
 0x387 PF: > { %s20_s13 = sadd.s32 1, %s2484_s13  }
 0x388   : > { %p17_p4 = scmp.ge.s32.totalorder %s20_s13, 4  }
 0x38a   :  { %19 = sbr.rel (!%p17_p4) target bundleno = 1 (0x1), region = 92 }

// kernel: tpu_custom_call.1
= control target key start
LH: loop header
LB: loop body
LE: loop exit
PB: predicated region body
PF: predicated region fallthrough
CT: control target
= control target key end

     0   :  { %s2550_s13 = smov 0   ;;  %s3836_s0 = inlined_call_operand.vmem [shape: bf16[4,64,16], index: 0, kind: input, shape index: {}]   ;;  %s3837_s1 = inlined_call_operand.vmem [shape: bf16[16,4], index: 1, kind: input, shape index: {}]   ;;  %s3838_s2 = inlined_call_operand.vmem [shape: f32[1,4], index: 2, kind: input, shape index: {}]   ;;  %s3839_s3 = inlined_call_operand.vmem [shape: f32[1,4], index: 3, kind: input, shape index: {}]   ;;  %s3840_s4 = inlined_call_operand.vmem [shape: bf16[36,4], index: 4, kind: input, shape index: {}]   ;;  %s3841_s5 = inlined_call_operand.vmem [shape: f32[1,4], index: 5, kind: input, shape index: {}]   ;;  %s3842_s6 = inlined_call_operand.vmem [shape: f32[1,4], index: 6, kind: input, shape index: {}]   ;;  %s3843_s7 = inlined_call_operand.vmem [shape: bf16[4,16], index: 7, kind: input, shape index: {}]   ;;  %s3844_s8 = inlined_call_operand.vmem [shape: f32[1,16], index: 8, kind: input, shape index: {}]   ;;  %s3845_s9 = inlined_call_operand.vmem [shape: f32[1,16], index: 9, kind: input, shape index: {}]   ;;  %s3846_s10 = inlined_call_operand.vmem [shape: bf16[4,64,16], index: 10, kind: output, shape index: {}]  }
   0x1 LB: > { %s2275_s14 = sadd.s32 4294967295, %s2484_s13   ;;  %p2279_p0 = scmp.ge.s32.totalorder %s2484_s13, 1  ;;  %s2484_s13 = sphi %s2550_s13, %s20_s13  }
   0x2   : > { %p314_p1 = scmp.lt.s32.totalorder %s2484_s13, 3 }
   0x4   : > { %p315_p2 = pnand %p2279_p0, %p314_p1 }
   0x5   : > { %s2280_s17 = sshll.u32 (!%p315_p2), %s2275_s14, 1  ;;  %s2486_s26 = smov (!%p315_p2), 16  }
   0x6   : > { %318 = sbr.rel (%p315_p2) target bundleno = 903 (0x387), region = 60  ;;  %p355_p3 = scmp.lt.s32.totalorder (!%p315_p2), %s2280_s17, 3 }
   0x7   : > { %s2487_s27 = smov (!%p315_p2), 4   ;;  %s2488_s28 = smov (!%p315_p2), 12  }
   0x8   : > { %s2489_s29 = smov (!%p315_p2), 8   ;;  %s2490_s30 = smov (!%p315_p2), 20  }
   0x9   : > { %s2491_s11 = smov (!%p315_p2), 24   ;;  %s2492_s12 = smov (!%p315_p2), 28  }
   0xa   : > { %s2493_s14 = smov (!%p315_p2), 32  }
   0xb   : > { %v2398_v0 = vld [vmem:[%s3837_s1] sm:$0xff]  ;;  %s3887_s17 = smov (!%p355_p3, %s2280_s17), 3  ;;  %vm433_vm0 = vcmask 130048   ;;  %vm692_vm1 = vcmask 27648   ;;  %vm693_vm2 = vsmask.f32 7938 }
   0xc   : > { %465 = vmatpush.bf16.msra.mxu0 %v2398_v0  ;;  %2448 = vmatpush.bf16.msra.mxu3 %v2398_v0  ;;  %s2388_s18 = sshll.u32 %s3887_s17, 5  ;;  %v2586_v7 = vld [vmem:[%s3838_s2] ss:$0 sm:$0xff]  ;;  %vm2603_vm3 = vmand %vm692_vm1, %vm693_vm2  ;;  %v695_v25 = vld [vmem:[#allocation2 + $0x4] sm:$0xf]  ;;  %vm740_vm4 = vcmask 24576  }
   0xd   : > { %s2569_s21 = scalar_lea.vmem %s3836_s0, %s2388_s18  ;;  %v2591_v8 = vld [vmem:[%s3839_s3] ss:$0 sm:$0xff]  ;;  %vm741_vm5 = vsmask.f32 256  ;;  %v734_v37 = vld [vmem:[#allocation2 + $0x3c] sm:$0xf]  ;;  %s3738_s24 = scalar_lea.vmem %s3846_s10, %s2388_s18 }
   0xe   : > { %v2390_v1 = vld [vmem:[%s2569_s21] sm:$0xff]  ;;  %v2397_v2 = vld [vmem:[%s2569_s21 + $0x38] sm:$0xff]  ;;  %v2391_v3 = vld [vmem:[%s2569_s21 + $0x8] sm:$0xff]  ;;  %vm3851_vm7 = vcmask 60448   ;;  %vm3847_vm8 = vcmask 93248   ;;  %vm1010_vm9 = vcmask 93251  }
   0xf   : > { %2322 = vmatmul.msk.bf16.vlgmr.msra.gmra.mxu0 %vm433_vm0, %v2390_v1  ;;  %2329 = vmatmul.msk.bf16.vlgmr.msra.gmra.mxu3 %vm433_vm0, %v2397_v2  ;;  %v2392_v4 = vld [vmem:[%s2569_s21 + $0x10] sm:$0xff]  ;;  %v2393_v5 = vld [vmem:[%s2569_s21 + $0x18] sm:$0xff]  ;;  %v2394_v6 = vld [vmem:[%s2569_s21 + $0x20] sm:$0xff]  ;;  %vm3849_vm10 = vsmask.f32 7950  ;;  %vm1123_vm12 = vcmask 126048  }
  0x10   : > { %v2395_v38 = vld [vmem:[%s2569_s21 + $0x28] sm:$0xff]  ;;  %vm2631_vm6 = vmand %vm740_vm4, %vm741_vm5  ;;  %vm1173_vm14 = vcmask 122976  }
  0x11   : > { %v698_v43 = vld [vmem:[#allocation2 + $0x8] sm:$0xf]  ;;  %v701_v61 = vld [vmem:[#allocation2 + $0xc] sm:$0xf]  ;;  %vm2799_vm11 = vmand %vm1010_vm9, %vm3849_vm10  ;;  %vm1346_vm9 = vcmask 191648  }
  0x12   : > { %vm2847_vm13 = vmand %vm1123_vm12, %vm693_vm2 }
  0x13   : > { %vm2870_vm15 = vmand %vm1173_vm14, %vm741_vm5  ;;  %vm1396_vm14 = vcmask 191651  }
  0x1f   : > { %2323 = vmatmul.msk.bf16.gmra.mxu0 %vm433_vm0, %v2391_v3 }
  0x2f   : > { %2324 = vmatmul.msk.bf16.gmra.mxu0 %vm433_vm0, %v2392_v4 }
  0x3f   : > { %2325 = vmatmul.msk.bf16.gmra.mxu0 %vm433_vm0, %v2393_v5 }
  0x4f   : > { %2326 = vmatmul.msk.bf16.gmra.mxu0 %vm433_vm0, %v2394_v6 }
  0x5f   : > { %2327 = vmatmul.msk.bf16.gmra.mxu0 %vm433_vm0, %v2395_v38 }
  0x8c   : > { %v467_v9 = vpop.f32.mrf.mxu0 }
  0x8d   : > { %v511_v10 = vmul.f32 %v2586_v7, %v467_v9 }
  0x8f   : > { %v531_v11 = vadd.f32 %v2591_v8, %v511_v10 }
  0x91   : > { %v547_v12 = vmax.f32 %v531_v11, 0.0 }
  0x92   : > { %v502_v13 = vpop.f32.mrf.mxu3 }
  0x93   : > { %v563_v14 = vpack.c.bf16 %v547_v12, %v547_v12  ;;  %v525_v15 = vmul.f32 %v2586_v7, %v502_v13 }
  0x94   : > { %v469_v16 = vpop.f32.mrf.mxu0 }
  0x95   : > { %v545_v17 = vadd.f32 %v2591_v8, %v525_v15  ;;  %v512_v18 = vmul.f32 %v2586_v7, %v469_v16  ;;  %1225 = vrot.lane.b32.xlu1 %v563_v14, %s2486_s26  ;;  %805 = vrot.lane.b32.xlu0 %v563_v14, %s2487_s27  ;;  %v580_v19 = vshrl.u32 %v563_v14, 16  ;;  %v583_v23 = vshll.u32 %v563_v14, 16 }
  0x97   : > { %v561_v20 = vmax.f32 %v545_v17, 0.0  ;;  %v532_v21 = vadd.f32 %v2591_v8, %v512_v18  ;;  %v582_v22 = vrot.slane %v580_v19, 7  ;;  %v864_v50 = vrot.slane %v580_v19, 4  ;;  %v704_v18 = vld [vmem:[#allocation2 + $0x10] sm:$0xf] }
  0x98   : > { %v865_v51 = vrot.slane %v583_v23, 5 }
  0x99   : > { %v2607_v26 = vpack.c.bf16 %v561_v20, %v561_v20  ;;  %v548_v27 = vmax.f32 %v532_v21, 0.0  ;;  %v585_v28 = vor.u32 %v583_v23, %v582_v22 }
  0x9a   : > { %v866_v59 = vor.u32 %v865_v51, %v864_v50 }
  0x9b   : > { %v2609_v29 = vpack.c.bf16 %v548_v27, %v548_v27  ;;  %v696_v30 = vsel %vm2603_vm3, %v585_v28, %v695_v25  ;;  %v671_v31 = vshrl.u32 %v2607_v26, 16  ;;  %v674_v33 = vshll.u32 %v2607_v26, 16 }
  0x9c   : > { %v472_v32 = vpop.f32.mrf.mxu0  ;;  %697 = vst [vmem:[#allocation2 + $0x4] sm:$0xf] %v696_v30  ;;  %v867_v3 = vrot.slane %v866_v59, 4 }
  0x9d   : > { %v513_v34 = vmul.f32 %v2586_v7, %v472_v32  ;;  %1253 = vrot.lane.b32.xlu1 %v2607_v26, %s2486_s26  ;;  %1075 = vrot.lane.b32.xlu0 %v585_v28, %s2488_s28  ;;  %v673_v35 = vrot.slane %v671_v31, 7  ;;  %v587_v36 = vshrl.u32 %v2609_v29, 16  ;;  %v590_v42 = vshll.u32 %v2609_v29, 16 }
  0x9e   : > { %1227 = vrot.lane.b32.xlu2 %v2609_v29, %s2486_s26  ;;  %v916_v9 = vrot.slane %v671_v31, 4  ;;  %v917_v10 = vrot.slane %v674_v33, 5 }
  0x9f   : > { %v533_v39 = vadd.f32 %v2591_v8, %v513_v34  ;;  %v2624_v40 = vor.u32 %v674_v33, %v673_v35  ;;  %v589_v41 = vrot.slane %v587_v36, 7  ;;  %v868_v31 = vrot.slane %v587_v36, 4  ;;  %v2396_v36 = vld [vmem:[%s2569_s21 + $0x30] sm:$0xff] }
  0xa0   : > { %v918_v17 = vor.u32 %v917_v10, %v916_v9  ;;  %v869_v32 = vrot.slane %v590_v42, 5  ;;  %2328 = vmatmul.msk.bf16.gmra.mxu0 %vm433_vm0, %v2396_v36  ;;  %vm1273_vm0 = vcmask 158848  }
  0xa1   : > { %v549_v44 = vmax.f32 %v533_v39, 0.0  ;;  %v735_v46 = vsel %vm2603_vm3, %v2624_v40, %v734_v37  ;;  %v2640_v47 = vor.u32 %v590_v42, %v589_v41 }
  0xa2   : > { %736 = vst [vmem:[#allocation2 + $0x3c] sm:$0xf] %v735_v46  ;;  %v2689_v28 = vrot.slane %v918_v17, 4  ;;  %v870_v42 = vor.u32 %v869_v32, %v868_v31 }
  0xa3   : > { %v2642_v48 = vpack.c.bf16 %v549_v44, %v549_v44  ;;  %v746_v49 = vld [vmem:[#allocation2 + $0x4] sm:$0x1]  ;;  %v699_v52 = vsel %vm2603_vm3, %v2640_v47, %v698_v43  ;;  %v707_v44 = vld [vmem:[#allocation2 + $0x14] sm:$0xf] }
  0xa4   : > { %v747_v53 = vsel %vm2631_vm6, 0, %v746_v49  ;;  %v474_v54 = vpop.f32.mrf.mxu0  ;;  %700 = vst [vmem:[#allocation2 + $0x8] sm:$0xf] %v699_v52  ;;  %v871_v52 = vrot.slane %v870_v42, 4 }
  0xa5   : > { %748 = vst [vmem:[#allocation2 + $0x4] sm:$0x1] %v747_v53  ;;  %v514_v55 = vmul.f32 %v2586_v7, %v474_v54  ;;  %831 = vrot.lane.b32.xlu0 %v2607_v26, %s2487_s27  ;;  %807 = vrot.lane.b32.xlu1 %v2609_v29, %s2487_s27  ;;  %v594_v56 = vshrl.u32 %v2642_v48, 16  ;;  %v597_v57 = vshll.u32 %v2642_v48, 16 }
  0xa6   : > { %1103 = vrot.lane.b32.xlu2 %v2624_v40, %s2488_s28 }
  0xa7   : > { %v534_v58 = vadd.f32 %v2591_v8, %v514_v55  ;;  %v596_v60 = vrot.slane %v594_v56, 7  ;;  %v872_v22 = vrot.slane %v594_v56, 4  ;;  %v873_v23 = vrot.slane %v597_v57, 5 }
  0xa9   : > { %v550_v62 = vmax.f32 %v534_v58, 0.0  ;;  %v788_v63 = vld [vmem:[#allocation2 + $0x3c] sm:$0x1]  ;;  %v2659_v0 = vor.u32 %v597_v57, %v596_v60  ;;  %v874_v38 = vor.u32 %v873_v23, %v872_v22  ;;  %v710_v57 = vld [vmem:[#allocation2 + $0x18] sm:$0xf] }
  0xaa   : > { %v789_v1 = vsel %vm2631_vm6, 0, %v788_v63 }
  0xab   : > { %v2663_v2 = vpack.c.bf16 %v550_v62, %v550_v62  ;;  %790 = vst [vmem:[#allocation2 + $0x3c] sm:$0x1] %v789_v1  ;;  %v749_v4 = vld [vmem:[#allocation2 + $0x8] sm:$0x1]  ;;  %v702_v5 = vsel %vm2603_vm3, %v2659_v0, %v701_v61  ;;  %v2711_v46 = vrot.slane %v874_v38, 4 }
  0xac   : > { %v750_v6 = vsel %vm2631_vm6, 0, %v749_v4  ;;  %703 = vst [vmem:[#allocation2 + $0xc] sm:$0xf] %v702_v5  ;;  %v477_v11 = vpop.f32.mrf.mxu0 }
  0xad   : > { %920 = vrot.lane.b32.xlu0 %v867_v3, %s2489_s29  ;;  %1298 = vrot.lane.b32.xlu1 %v867_v3, %s2490_s30  ;;  %751 = vst [vmem:[#allocation2 + $0x8] sm:$0x1] %v750_v6  ;;  %v515_v12 = vmul.f32 %v2586_v7, %v477_v11  ;;  %v601_v13 = vshrl.u32 %v2663_v2, 16  ;;  %v604_v14 = vshll.u32 %v2663_v2, 16 }
  0xae   : > { %1446 = vrot.lane.b32.xlu2 %v2640_v47, %s2491_s11 }
  0xaf   : > { %v535_v15 = vadd.f32 %v2591_v8, %v515_v12  ;;  %v603_v16 = vrot.slane %v601_v13, 7  ;;  %v876_v1 = vrot.slane %v601_v13, 4  ;;  %v877_v3 = vrot.slane %v604_v14, 5 }
  0xb0   : > { %v2494_v13 = vmov 0  }
  0xb1   : > { %v551_v19 = vmax.f32 %v535_v15, 0.0  ;;  %v2682_v20 = vor.u32 %v604_v14, %v603_v16  ;;  %v878_v9 = vor.u32 %v877_v3, %v876_v1  ;;  %738 = vst.msk [vmem:[#allocation2] sm:$0xf] %vm692_vm1, %v2494_v13  ;;  %v713_v16 = vld [vmem:[#allocation2 + $0x1c] sm:$0xf] }
  0xb2   : > { %739 = vst.msk [vmem:[#allocation2 + $0x20] sm:$0xf] %vm692_vm1, %v2494_v13  ;;  %vm963_vm1 = vsmask.f32 3328 }
  0xb3   : > { %v752_v21 = vld [vmem:[#allocation2 + $0xc] sm:$0x1]  ;;  %v2684_v25 = vpack.c.bf16 %v551_v19, %v551_v19  ;;  %v705_v27 = vsel %vm2603_vm3, %v2682_v20, %v704_v18  ;;  %v2759_v11 = vrot.slane %v878_v9, 4  ;;  %vm2900_vm4 = vmand %vm3847_vm8, %vm963_vm1 }
  0xb4   : > { %v753_v30 = vsel %vm2631_vm6, 0, %v752_v21  ;;  %v479_v33 = vpop.f32.mrf.mxu0  ;;  %706 = vst [vmem:[#allocation2 + $0x10] sm:$0xf] %v705_v27  ;;  %vm2922_vm12 = vmand %vm1346_vm9, %vm963_vm1 }
  0xb5   : > { %1586 = vrot.lane.b32.xlu1 %v2609_v29, %s2492_s12  ;;  %1448 = vrot.lane.b32.xlu0 %v2659_v0, %s2491_s11  ;;  %754 = vst [vmem:[#allocation2 + $0xc] sm:$0x1] %v753_v30  ;;  %v516_v34 = vmul.f32 %v2586_v7, %v479_v33  ;;  %v608_v35 = vshrl.u32 %v2684_v25, 16  ;;  %v611_v37 = vshll.u32 %v2684_v25, 16  ;;  %vm2953_vm9 = vmand %vm1396_vm14, %vm3849_vm10  ;;  %vm3848_vm14 = vcmask 224448  }
  0xb6   : > { %946 = vrot.lane.b32.xlu2 %v2689_v28, %s2489_s29  ;;  %vm1628_vm10 = vcmask 257248  }
  0xb7   : > { %v536_v39 = vadd.f32 %v2591_v8, %v516_v34  ;;  %v610_v41 = vrot.slane %v608_v35, 7  ;;  %v880_v17 = vrot.slane %v608_v35, 4  ;;  %v881_v18 = vrot.slane %v611_v37, 5 }
  0xb8   : > { %v743_v21 = vld [vmem:[#allocation2] sm:$0x1] }
  0xb9   : > { %v552_v29 = vmax.f32 %v536_v39, 0.0  ;;  %v2709_v43 = vor.u32 %v611_v37, %v610_v41  ;;  %v744_v22 = vsel %vm2631_vm6, 0, %v743_v21  ;;  %v882_v23 = vor.u32 %v881_v18, %v880_v17 }
  0xba   : > { %745 = vst [vmem:[#allocation2] sm:$0x1] %v744_v22  ;;  %v716_v22 = vld [vmem:[#allocation2 + $0x24] sm:$0xf] }
  0xbb   : > { %v2713_v49 = vpack.c.bf16 %v552_v29, %v552_v29  ;;  %v755_v50 = vld [vmem:[#allocation2 + $0x10] sm:$0x1]  ;;  %v708_v51 = vsel %vm2603_vm3, %v2709_v43, %v707_v44  ;;  %862 = vst.msk [vmem:[#allocation2] sm:$0xf] %vm3851_vm7, %v2494_v13  ;;  %v883_v27 = vrot.slane %v882_v23, 4 }
  0xbc   : > { %v756_v53 = vsel %vm2631_vm6, 0, %v755_v50  ;;  %709 = vst [vmem:[#allocation2 + $0x14] sm:$0xf] %v708_v51 }
  0xbd   : > { %1077 = vrot.lane.b32.xlu1 %v2640_v47, %s2488_s28  ;;  %1302 = vrot.lane.b32.xlu0 %v2711_v46, %s2490_s30  ;;  %757 = vst [vmem:[#allocation2 + $0x10] sm:$0x1] %v756_v53  ;;  %v615_v54 = vshrl.u32 %v2713_v49, 16  ;;  %v618_v55 = vshll.u32 %v2713_v49, 16  ;;  %v482_v47 = vpop.f32.mrf.mxu0 }
  0xbe   : > { %922 = vrot.lane.b32.xlu2 %v871_v52, %s2489_s29  ;;  %v517_v62 = vmul.f32 %v2586_v7, %v482_v47  ;;  %1008 = vst.msk [vmem:[#allocation2] sm:$0xf] %vm3847_vm8, %v2494_v13  ;;  %vm2981_vm8 = vmand %vm3848_vm14, %vm693_vm2  ;;  %vm1536_vm2 = vcmask 221376  }
  0xbf   : > { %v617_v56 = vrot.slane %v615_v54, 7  ;;  %v884_v34 = vrot.slane %v615_v54, 4  ;;  %v885_v35 = vrot.slane %v618_v55, 5  ;;  %vm3024_vm14 = vmand %vm1536_vm2, %vm741_vm5  ;;  %vm3850_vm5 = vcmask 290048  }
  0xc0   : > { %v537_v63 = vadd.f32 %v2591_v8, %v517_v62  ;;  %vm3069_vm2 = vmand %vm3850_vm5, %vm963_vm1  ;;  %vm1734_vm1 = vcmask 290051   ;;  %vm3874_vm5 = vsmask.f32 7950 }
  0xc1   : > { %v2731_v58 = vor.u32 %v618_v55, %v617_v56 }
  0xc2   : > { %v553_v5 = vmax.f32 %v537_v63, 0.0 }
  0xc3   : > { %v758_v59 = vld [vmem:[#allocation2 + $0x14] sm:$0x1]  ;;  %v711_v60 = vsel %vm2603_vm3, %v2731_v58, %v710_v57 }
  0xc4   : > { %v759_v61 = vsel %vm2631_vm6, 0, %v758_v59  ;;  %712 = vst [vmem:[#allocation2 + $0x18] sm:$0xf] %v711_v60  ;;  %v2757_v10 = vpack.c.bf16 %v553_v5, %v553_v5 }
  0xc5   : > { %809 = vrot.lane.b32.xlu1 %v2642_v48, %s2487_s27  ;;  %1647 = vrot.lane.b32.xlu0 %v2711_v46, %s2493_s14  ;;  %760 = vst [vmem:[#allocation2 + $0x14] sm:$0x1] %v759_v61  ;;  %v1013_v32 = vld [vmem:[#allocation2] sm:$0x8]  ;;  %v484_v38 = vpop.f32.mrf.mxu0 }
  0xc6   : > { %1300 = vrot.lane.b32.xlu2 %v871_v52, %s2490_s30  ;;  %v622_v12 = vshrl.u32 %v2757_v10, 16  ;;  %v1014_v33 = vsel %vm2799_vm11, 0, %v1013_v32  ;;  %v518_v62 = vmul.f32 %v2586_v7, %v484_v38 }
  0xc7   : > { %1015 = vst [vmem:[#allocation2] sm:$0x8] %v1014_v33 }
  0xc8   : > { %v624_v14 = vrot.slane %v622_v12, 7  ;;  %v538_v5 = vadd.f32 %v2591_v8, %v518_v62 }
  0xcb   : > { %v761_v4 = vld [vmem:[#allocation2 + $0x18] sm:$0x1] }
  0xcc   : > { %v762_v6 = vsel %vm2631_vm6, 0, %v761_v4 }
  0xcd   : > { %1229 = vrot.lane.b32.xlu1 %v2642_v48, %s2486_s26  ;;  %1081 = vrot.lane.b32.xlu0 %v2682_v20, %s2488_s28  ;;  %763 = vst [vmem:[#allocation2 + $0x18] sm:$0x1] %v762_v6  ;;  %v487_v41 = vpop.f32.mrf.mxu0 }
  0xce   : > { %1588 = vrot.lane.b32.xlu2 %v2642_v48, %s2492_s12  ;;  %v625_v48 = vshll.u32 %v2757_v10, 16  ;;  %v1125_v50 = vld [vmem:[#allocation2] sm:$0xf]  ;;  %v519_v51 = vmul.f32 %v2586_v7, %v487_v41 }
  0xd0   : > { %v2774_v15 = vor.u32 %v625_v48, %v624_v14  ;;  %v889_v44 = vrot.slane %v625_v48, 5  ;;  %v539_v56 = vadd.f32 %v2591_v8, %v519_v51 }
  0xd2   : > { %v714_v19 = vsel %vm2603_vm3, %v2774_v15, %v713_v16  ;;  %v555_v60 = vmax.f32 %v539_v56, 0.0 }
  0xd3   : > { %715 = vst [vmem:[#allocation2 + $0x1c] sm:$0xf] %v714_v19  ;;  %v554_v19 = vmax.f32 %v538_v5, 0.0 }
  0xd4   : > { %v2862_v1 = vpack.c.bf16 %v555_v60, %v555_v60 }
  0xd5   : > { %1304 = vrot.lane.b32.xlu1 %v2759_v11, %s2490_s30  ;;  %813 = vrot.lane.b32.xlu0 %v2684_v25, %s2487_s27  ;;  %v2915_v33 = vpack.c.bf16 %v554_v19, %v554_v19 }
  0xd6   : > { %1645 = vrot.lane.b32.xlu2 %v871_v52, %s2493_s14  ;;  %v632_v16 = vshll.u32 %v2862_v1, 16 }
  0xd7   : > { %v1065_v60 = vshll.u32 %v2915_v33, 16 }
  0xda   : > { %v764_v30 = vld [vmem:[#allocation2 + $0x1c] sm:$0x1] }
  0xdb   : > { %v765_v31 = vsel %vm2631_vm6, 0, %v764_v30 }
  0xdc   : > { %766 = vst [vmem:[#allocation2 + $0x1c] sm:$0x1] %v765_v31 }
  0xdd   : > { %926 = vrot.lane.b32.xlu0 %v2759_v11, %s2489_s29  ;;  %1083 = vrot.lane.b32.xlu1 %v2709_v43, %s2488_s28 }
  0xde   : > { %1079 = vrot.lane.b32.xlu2 %v2659_v0, %s2488_s28 }
  0xe5   : > { %1233 = vrot.lane.b32.xlu0 %v2684_v25, %s2486_s26  ;;  %928 = vrot.lane.b32.xlu1 %v883_v27, %s2489_s29 }
  0xe6   : > { %924 = vrot.lane.b32.xlu2 %v2711_v46, %s2489_s29  ;;  %v489_v46 = vpop.f32.mrf.mxu0 }
  0xe7   : > { %v520_v52 = vmul.f32 %v2586_v7, %v489_v46 }
  0xe9   : > { %v540_v57 = vadd.f32 %v2591_v8, %v520_v52  ;;  %v1062_v52 = vshrl.u32 %v2915_v33, 16 }
  0xeb   : > { %v556_v61 = vmax.f32 %v540_v57, 0.0 }
  0xed   : > { %1592 = vrot.lane.b32.xlu0 %v2684_v25, %s2492_s12  ;;  %1235 = vrot.lane.b32.xlu1 %v2713_v49, %s2486_s26  ;;  %v886_v25 = vor.u32 %v885_v35, %v884_v34  ;;  %v2864_v3 = vpack.c.bf16 %v556_v61, %v556_v61 }
  0xee   : > { %811 = vrot.lane.b32.xlu2 %v2663_v2, %s2487_s27 }
  0xef   : > { %v2823_v37 = vrot.slane %v886_v25, 4  ;;  %v639_v18 = vshll.u32 %v2864_v3, 16 }
  0xf5   : > { %1452 = vrot.lane.b32.xlu0 %v2709_v43, %s2491_s11  ;;  %817 = vrot.lane.b32.xlu1 %v2757_v10, %s2487_s27 }
  0xf6   : > { %1231 = vrot.lane.b32.xlu2 %v2663_v2, %s2486_s26 }
  0xf8   : > { %v2821_v36 = vpop.permute.xlu2 %1227 }
  0xfd   : > { %815 = vrot.lane.b32.xlu0 %v2713_v49, %s2487_s27  ;;  %1308 = vrot.lane.b32.xlu1 %v2823_v37, %s2490_s30 }
  0xfe   : > { %1590 = vrot.lane.b32.xlu2 %v2663_v2, %s2492_s12  ;;  %v888_v2 = vrot.slane %v622_v12, 4 }
 0x100   : > { %v2831_v39 = vpop.permute.xlu2 %1103  ;;  %v890_v55 = vor.u32 %v889_v44, %v888_v2  ;;  %v492_v44 = vpop.f32.mrf.mxu0 }
 0x102   : > { %v891_v63 = vrot.slane %v890_v55, 4 }
 0x105   : > { %1306 = vrot.lane.b32.xlu0 %v883_v27, %s2490_s30  ;;  %1237 = vrot.lane.b32.xlu1 %v2757_v10, %s2486_s26 }
 0x106   : > { %1450 = vrot.lane.b32.xlu2 %v2682_v20, %s2491_s11 }
 0x107   : > { %v1226_v42 = vpop.permute.xlu1 %1225  ;;  %v806_v29 = vpop.permute.xlu0 %805 }
 0x108   : > { %848 = vst.msk [vmem:[#allocation2 + $0x4] sm:$0xf] %vm3851_vm7, %v806_v29  ;;  %v2839_v43 = vpop.permute.xlu2 %1446  ;;  %v494_v5 = vpop.f32.mrf.mxu0 }
 0x10d   : > { %1651 = vrot.lane.b32.xlu0 %v883_v27, %s2493_s14  ;;  %1596 = vrot.lane.b32.xlu1 %v2757_v10, %s2492_s12  ;;  %v629_v10 = vshrl.u32 %v2862_v1, 16  ;;  %v719_v27 = vld [vmem:[#allocation2 + $0x28] sm:$0xf] }
 0x10e   : > { %1649 = vrot.lane.b32.xlu2 %v2759_v11, %s2493_s14  ;;  %v636_v11 = vshrl.u32 %v2864_v3, 16 }
 0x10f   : > { %v2855_v53 = vpop.permute.xlu1 %1253  ;;  %v1076_v54 = vpop.permute.xlu0 %1075  ;;  %v631_v14 = vrot.slane %v629_v10, 7  ;;  %v965_v34 = vld [vmem:[#allocation2 + $0x4] sm:$0xf] }
 0x110   : > { %v1126_v59 = vsel %vm2847_vm13, %v1076_v54, %v1125_v50  ;;  %v947_v47 = vpop.permute.xlu2 %946  ;;  %v638_v17 = vrot.slane %v636_v11, 7 }
 0x111   : > { %1127 = vst [vmem:[#allocation2] sm:$0xf] %v1126_v59  ;;  %v2892_v21 = vor.u32 %v632_v16, %v631_v14 }
 0x112   : > { %v2896_v23 = vor.u32 %v639_v18, %v638_v17 }
 0x113   : > { %v717_v31 = vsel %vm2603_vm3, %v2892_v21, %v716_v22 }
 0x114   : > { %718 = vst [vmem:[#allocation2 + $0x24] sm:$0xf] %v717_v31  ;;  %v720_v32 = vsel %vm2603_vm3, %v2896_v23, %v719_v27 }
 0x115   : > { %1594 = vrot.lane.b32.xlu0 %v2713_v49, %s2492_s12  ;;  %1310 = vrot.lane.b32.xlu1 %v891_v63, %s2490_s30  ;;  %721 = vst [vmem:[#allocation2 + $0x28] sm:$0xf] %v720_v32 }
 0x116   : > { %1085 = vrot.lane.b32.xlu2 %v2731_v58, %s2488_s28 }
 0x117   : > { %v832_v6 = vpop.permute.xlu0 %831  ;;  %v808_v9 = vpop.permute.xlu1 %807 }
 0x118   : > { %v1175_v12 = vld [vmem:[#allocation2] sm:$0x1]  ;;  %861 = vst.msk [vmem:[#allocation2 + $0x3c] sm:$0xf] %vm3851_vm7, %v832_v6  ;;  %v923_v49 = vpop.permute.xlu2 %922 }
 0x119   : > { %v1176_v48 = vsel %vm2870_vm15, 0, %v1175_v12  ;;  %849 = vst.msk [vmem:[#allocation2 + $0x8] sm:$0xf] %vm3851_vm7, %v808_v9  ;;  %v521_v12 = vmul.f32 %v2586_v7, %v492_v44 }
 0x11a   : > { %1177 = vst [vmem:[#allocation2] sm:$0x1] %v1176_v48 }
 0x11b   : > { %1274 = vst.msk [vmem:[#allocation2] sm:$0xf] %vm1273_vm0, %v1226_v42  ;;  %v770_v54 = vld [vmem:[#allocation2 + $0x24] sm:$0x1]  ;;  %v541_v27 = vadd.f32 %v2591_v8, %v521_v12 }
 0x11c   : > { %v771_v55 = vsel %vm2631_vm6, 0, %v770_v54  ;;  %v773_v56 = vld [vmem:[#allocation2 + $0x28] sm:$0x1]  ;;  %v1290_v54 = vrot.slane %v1062_v52, 4 }
 0x11d   : > { %930 = vrot.lane.b32.xlu0 %v2823_v37, %s2489_s29  ;;  %1655 = vrot.lane.b32.xlu1 %v891_v63, %s2493_s14  ;;  %772 = vst [vmem:[#allocation2 + $0x24] sm:$0x1] %v771_v55  ;;  %v1291_v55 = vrot.slane %v1065_v60, 5 }
 0x11e   : > { %1454 = vrot.lane.b32.xlu2 %v2731_v58, %s2491_s11 }
 0x11f   : > { %v1004_v35 = vld [vmem:[#allocation2 + $0x3c] sm:$0xf]  ;;  %v921_v25 = vpop.permute.xlu0 %920  ;;  %v1299_v38 = vpop.permute.xlu1 %1298 }
 0x120   : > { %v1005_v41 = vsel %vm2900_vm4, %v947_v47, %v1004_v35  ;;  %v968_v42 = vld [vmem:[#allocation2 + $0x8] sm:$0xf]  ;;  %v966_v29 = vsel %vm2900_vm4, %v921_v25, %v965_v34  ;;  %v2926_v2 = vpop.permute.xlu2 %1300  ;;  %v1064_v47 = vrot.slane %v1062_v52, 7  ;;  %v557_v34 = vmax.f32 %v541_v27, 0.0  ;;  %v497_v27 = vpop.f32.mrf.mxu0 }
 0x121   : > { %1006 = vst [vmem:[#allocation2 + $0x3c] sm:$0xf] %v1005_v41  ;;  %v969_v46 = vsel %vm2900_vm4, %v923_v49, %v968_v42  ;;  %v522_v49 = vmul.f32 %v2586_v7, %v494_v5 }
 0x122   : > { %970 = vst [vmem:[#allocation2 + $0x8] sm:$0xf] %v969_v46  ;;  %v1348_v50 = vld [vmem:[#allocation2] sm:$0xf]  ;;  %v1067_v22 = vor.u32 %v1065_v60, %v1064_v47  ;;  %v2973_v41 = vpack.c.bf16 %v557_v34, %v557_v34 }
 0x123   : > { %967 = vst [vmem:[#allocation2 + $0x4] sm:$0xf] %v966_v29  ;;  %v1349_v51 = vsel %vm2922_vm12, %v1299_v38, %v1348_v50  ;;  %v542_v31 = vadd.f32 %v2591_v8, %v522_v49  ;;  %v725_v49 = vld [vmem:[#allocation2 + $0x30] sm:$0xf] }
 0x124   : > { %1350 = vst [vmem:[#allocation2] sm:$0xf] %v1349_v51  ;;  %v643_v46 = vshrl.u32 %v2973_v41, 16 }
 0x125   : > { %1653 = vrot.lane.b32.xlu0 %v2823_v37, %s2493_s14  ;;  %1598 = vrot.lane.b32.xlu1 %v2915_v33, %s2492_s12  ;;  %v774_v37 = vsel %vm2631_vm6, 0, %v773_v56  ;;  %v558_v35 = vmax.f32 %v542_v31, 0.0 }
 0x126   : > { %932 = vrot.lane.b32.xlu2 %v891_v63, %s2489_s29  ;;  %775 = vst [vmem:[#allocation2 + $0x28] sm:$0x1] %v774_v37  ;;  %v645_v37 = vrot.slane %v643_v46, 7 }
 0x127   : > { %v2940_v57 = vpop.permute.xlu1 %1586  ;;  %v2942_v59 = vpop.permute.xlu0 %1448  ;;  %v2975_v42 = vpack.c.bf16 %v558_v35, %v558_v35 }
 0x128   : > { %v1058_v61 = vld [vmem:[#allocation2 + $0x3c] sm:$0x8]  ;;  %v2947_v62 = vpop.permute.xlu2 %1588 }
 0x129   : > { %v1059_v63 = vsel %vm2799_vm11, 0, %v1058_v61  ;;  %v1019_v6 = vld [vmem:[#allocation2 + $0x8] sm:$0x8]  ;;  %v650_v50 = vshrl.u32 %v2975_v42, 16  ;;  %v646_v61 = vshll.u32 %v2973_v41, 16  ;;  %v653_v52 = vshll.u32 %v2975_v42, 16 }
 0x12a   : > { %1060 = vst [vmem:[#allocation2 + $0x3c] sm:$0x8] %v1059_v63  ;;  %v1020_v48 = vsel %vm2799_vm11, 0, %v1019_v6  ;;  %v1016_v14 = vld [vmem:[#allocation2 + $0x4] sm:$0x8] }
 0x12b   : > { %1021 = vst [vmem:[#allocation2 + $0x8] sm:$0x8] %v1020_v48  ;;  %v1017_v17 = vsel %vm2799_vm11, 0, %v1016_v14  ;;  %v1398_v19 = vld [vmem:[#allocation2] sm:$0x8]  ;;  %v652_v5 = vrot.slane %v650_v50, 7  ;;  %v3006_v60 = vor.u32 %v646_v61, %v645_v37 }
 0x12c   : > { %1018 = vst [vmem:[#allocation2 + $0x4] sm:$0x8] %v1017_v17  ;;  %v1399_v32 = vsel %vm2953_vm9, 0, %v1398_v19  ;;  %v1292_v17 = vor.u32 %v1291_v55, %v1290_v54 }
 0x12d   : > { %1400 = vst [vmem:[#allocation2] sm:$0x8] %v1399_v32  ;;  %1087 = vrot.lane.b32.xlu0 %v2774_v15, %s2488_s28  ;;  %1458 = vrot.lane.b32.xlu1 %v1067_v22, %s2491_s11 }
 0x12e   : > { %1089 = vrot.lane.b32.xlu2 %v1067_v22, %s2488_s28  ;;  %v3028_v35 = vrot.slane %v1292_v17, 4  ;;  %v896_v17 = vrot.slane %v636_v11, 4 }
 0x12f   : > { %v1078_v25 = vpop.permute.xlu1 %1077  ;;  %v2971_v38 = vpop.permute.xlu0 %1302 }
 0x130   : > { %v2977_v29 = vpop.permute.xlu2 %1645 }
 0x132   : > { %v1131_v48 = vld [vmem:[#allocation2 + $0x8] sm:$0xf] }
 0x133   : > { %v1128_v51 = vld [vmem:[#allocation2 + $0x4] sm:$0xf] }
 0x134   : > { %v1490_v56 = vld [vmem:[#allocation2] sm:$0xf]  ;;  %v1129_v47 = vsel %vm2847_vm13, %v1078_v25, %v1128_v51 }
 0x135   : > { %v1491_v63 = vsel %vm2981_vm8, %v2839_v43, %v1490_v56  ;;  %1130 = vst [vmem:[#allocation2 + $0x4] sm:$0xf] %v1129_v47  ;;  %1456 = vrot.lane.b32.xlu0 %v2774_v15, %s2491_s11  ;;  %1241 = vrot.lane.b32.xlu1 %v2862_v1, %s2486_s26  ;;  %v722_v43 = vld [vmem:[#allocation2 + $0x2c] sm:$0xf]  ;;  %v3012_v15 = vor.u32 %v653_v52, %v652_v5 }
 0x136   : > { %1492 = vst [vmem:[#allocation2] sm:$0xf] %v1491_v63  ;;  %819 = vrot.lane.b32.xlu2 %v2862_v1, %s2487_s27  ;;  %v723_v19 = vsel %vm2603_vm3, %v3006_v60, %v722_v43  ;;  %v893_v43 = vrot.slane %v632_v16, 5  ;;  %v897_v1 = vrot.slane %v639_v18, 5 }
 0x137   : > { %v810_v6 = vpop.permute.xlu1 %809  ;;  %v3008_v12 = vpop.permute.xlu0 %1647  ;;  %724 = vst [vmem:[#allocation2 + $0x2c] sm:$0xf] %v723_v19  ;;  %v726_v31 = vsel %vm2603_vm3, %v3012_v15, %v725_v49 }
 0x138   : > { %850 = vst.msk [vmem:[#allocation2 + $0xc] sm:$0xf] %vm3851_vm7, %v810_v6  ;;  %v1080_v14 = vpop.permute.xlu2 %1079  ;;  %v499_v49 = vpop.f32.mrf.mxu0 }
 0x139   : > { %v1132_v22 = vsel %vm2847_vm13, %v1080_v14, %v1131_v48  ;;  %727 = vst [vmem:[#allocation2 + $0x30] sm:$0xf] %v726_v31  ;;  %v523_v48 = vmul.f32 %v2586_v7, %v497_v27 }
 0x13a   : > { %1133 = vst [vmem:[#allocation2 + $0x8] sm:$0xf] %v1132_v22 }
 0x13b   : > { %v543_v19 = vadd.f32 %v2591_v8, %v523_v48 }
 0x13c   : > { %v1178_v34 = vld [vmem:[#allocation2 + $0x4] sm:$0x1] }
 0x13d   : > { %v1538_v25 = vld [vmem:[#allocation2] sm:$0x1]  ;;  %v1179_v51 = vsel %vm2870_vm15, 0, %v1178_v34  ;;  %1239 = vrot.lane.b32.xlu0 %v2915_v33, %s2486_s26  ;;  %821 = vrot.lane.b32.xlu1 %v2864_v3, %s2487_s27  ;;  %v892_v33 = vrot.slane %v629_v10, 4  ;;  %v559_v18 = vmax.f32 %v543_v19, 0.0 }
 0x13e   : > { %v1539_v54 = vsel %vm3024_vm14, 0, %v1538_v25  ;;  %1180 = vst [vmem:[#allocation2 + $0x4] sm:$0x1] %v1179_v51  ;;  %1312 = vrot.lane.b32.xlu2 %v3028_v35, %s2490_s30  ;;  %v776_v5 = vld [vmem:[#allocation2 + $0x2c] sm:$0x1]  ;;  %v898_v25 = vor.u32 %v897_v1, %v896_v17 }
 0x13f   : > { %1540 = vst [vmem:[#allocation2] sm:$0x1] %v1539_v54  ;;  %v971_v55 = vld [vmem:[#allocation2 + $0xc] sm:$0xf]  ;;  %v1230_v56 = vpop.permute.xlu1 %1229  ;;  %v3040_v47 = vpop.permute.xlu0 %1081  ;;  %v777_v10 = vsel %vm2631_vm6, 0, %v776_v5  ;;  %v894_v11 = vor.u32 %v893_v43, %v892_v33 }
 0x140   : > { %1629 = vst.msk [vmem:[#allocation2] sm:$0xf] %vm1628_vm10, %v2940_v57  ;;  %v925_v37 = vpop.permute.xlu2 %924  ;;  %v779_v14 = vld [vmem:[#allocation2 + $0x30] sm:$0x1] }
 0x141   : > { %1275 = vst.msk [vmem:[#allocation2 + $0x4] sm:$0xf] %vm1273_vm0, %v2821_v36  ;;  %v1181_v63 = vld [vmem:[#allocation2 + $0x8] sm:$0x1]  ;;  %v972_v6 = vsel %vm2900_vm4, %v925_v37, %v971_v55  ;;  %v524_v36 = vmul.f32 %v2586_v7, %v499_v49  ;;  %v780_v16 = vsel %vm2631_vm6, 0, %v779_v14  ;;  %v3085_v55 = vpack.c.bf16 %v559_v18, %v559_v18 }
 0x142   : > { %v1182_v57 = vsel %vm2870_vm15, 0, %v1181_v63  ;;  %973 = vst [vmem:[#allocation2 + $0xc] sm:$0xf] %v972_v6  ;;  %v895_v63 = vrot.slane %v894_v11, 4  ;;  %v3096_v49 = vrot.slane %v898_v25, 4 }
 0x143   : > { %1183 = vst [vmem:[#allocation2 + $0x8] sm:$0x1] %v1182_v57  ;;  %v544_v22 = vadd.f32 %v2591_v8, %v524_v36  ;;  %v660_v48 = vshll.u32 %v3085_v55, 16 }
 0x144   : > { %1276 = vst.msk [vmem:[#allocation2 + $0x8] sm:$0xf] %vm1273_vm0, %v1230_v56 }
 0x145   : > { %1091 = vrot.lane.b32.xlu0 %v2892_v21, %s2488_s28  ;;  %1093 = vrot.lane.b32.xlu1 %v2896_v23, %s2488_s28  ;;  %778 = vst [vmem:[#allocation2 + $0x2c] sm:$0x1] %v777_v10  ;;  %v560_v27 = vmax.f32 %v544_v22, 0.0 }
 0x146   : > { %1243 = vrot.lane.b32.xlu2 %v2864_v3, %s2486_s26  ;;  %781 = vst [vmem:[#allocation2 + $0x30] sm:$0x1] %v780_v16  ;;  %v728_v16 = vld [vmem:[#allocation2 + $0x34] sm:$0xf] }
 0x147   : > { %v1689_v8 = vld [vmem:[#allocation2] sm:$0xf]  ;;  %v3079_v31 = vpop.permute.xlu1 %1304  ;;  %v814_v34 = vpop.permute.xlu0 %813  ;;  %v3087_v56 = vpack.c.bf16 %v560_v27, %v560_v27  ;;  %v731_v27 = vld [vmem:[#allocation2 + $0x38] sm:$0xf] }
 0x148   : > { %v1351_v51 = vld [vmem:[#allocation2 + $0x4] sm:$0xf]  ;;  %v1690_v21 = vsel %vm3069_vm2, %v2977_v29, %v1689_v8  ;;  %v812_v54 = vpop.permute.xlu2 %811  ;;  %852 = vst.msk [vmem:[#allocation2 + $0x14] sm:$0xf] %vm3851_vm7, %v814_v34  ;;  %v657_v29 = vshrl.u32 %v3085_v55, 16 }
 0x149   : > { %v1352_v37 = vsel %vm2922_vm12, %v2926_v2, %v1351_v51  ;;  %1691 = vst [vmem:[#allocation2] sm:$0xf] %v1690_v21  ;;  %v1022_v33 = vld [vmem:[#allocation2 + $0xc] sm:$0x8]  ;;  %v664_v6 = vshrl.u32 %v3087_v56, 16  ;;  %v667_v10 = vshll.u32 %v3087_v56, 16 }
 0x14a   : > { %1353 = vst [vmem:[#allocation2 + $0x4] sm:$0xf] %v1352_v37  ;;  %v1023_v5 = vsel %vm2799_vm11, 0, %v1022_v33  ;;  %v659_v57 = vrot.slane %v657_v29, 7  ;;  %v900_v21 = vrot.slane %v643_v46, 4 }
 0x14b   : > { %v1354_v43 = vld [vmem:[#allocation2 + $0x8] sm:$0xf]  ;;  %1024 = vst [vmem:[#allocation2 + $0xc] sm:$0x8] %v1023_v5  ;;  %v666_v36 = vrot.slane %v664_v6, 7 }
 0x14c   : > { %851 = vst.msk [vmem:[#allocation2 + $0x10] sm:$0xf] %vm3851_vm7, %v812_v54  ;;  %v1355_v2 = vsel %vm2922_vm12, %v2971_v38, %v1354_v43  ;;  %vm3112_vm7 = vmand %vm1734_vm1, %vm3874_vm5  ;;  %v3120_v38 = vor.u32 %v660_v48, %v659_v57  ;;  %v1804_v33 = vld [vmem:[%s3840_s4 + $0x10] sm:$0x3]  ;;  %v901_v43 = vrot.slane %v646_v61, 5  ;;  %vm1885_vm5 = vcmask 1041408  }
 0x14d   : > { %934 = vrot.lane.b32.xlu0 %v895_v63, %s2489_s29  ;;  %1316 = vrot.lane.b32.xlu1 %v3096_v49, %s2490_s30  ;;  %1356 = vst [vmem:[#allocation2 + $0x8] sm:$0xf] %v1355_v2  ;;  %v3129_v18 = vor.u32 %v667_v10, %v666_v36  ;;  %v1854_v57 = vunpack.c.l.b16 %v1804_v33 }
 0x14e   : > { %823 = vrot.lane.b32.xlu2 %v2973_v41, %s2487_s27  ;;  %v729_v11 = vsel %vm2603_vm3, %v3120_v38, %v728_v16 }
 0x14f   : > { %v927_v17 = vpop.permute.xlu0 %926  ;;  %v3122_v1 = vpop.permute.xlu1 %1083  ;;  %730 = vst [vmem:[#allocation2 + $0x34] sm:$0xf] %v729_v11  ;;  %v732_v46 = vsel %vm2603_vm3, %v3129_v18, %v731_v27  ;;  %v1857_v61 = vpack.c.b16 %v1854_v57, %v1854_v57  ;;  %v977_v36 = vld [vmem:[#allocation2 + $0x14] sm:$0xf]  ;;  %vm3877_vm3 = vcmask 60448  }
 0x150   : > { %v1736_v19 = vld [vmem:[#allocation2] sm:$0x8]  ;;  %v1232_v22 = vpop.permute.xlu2 %1231  ;;  %733 = vst [vmem:[#allocation2 + $0x38] sm:$0xf] %v732_v46  ;;  %vm3878_vm1 = vmmov %vm3877_vm3 }
 0x151   : > { %v1401_v8 = vld [vmem:[#allocation2 + $0x4] sm:$0x8]  ;;  %v1737_v34 = vsel %vm3112_vm7, 0, %v1736_v19  ;;  %v902_v19 = vor.u32 %v901_v43, %v900_v21  ;;  %v1887_v27 = vsel %vm1885_vm5, %v1857_v61, 0 }
 0x152   : > { %v1402_v25 = vsel %vm2953_vm9, 0, %v1401_v8  ;;  %1738 = vst [vmem:[#allocation2] sm:$0x8] %v1737_v34  ;;  %v1134_v51 = vld [vmem:[#allocation2 + $0xc] sm:$0xf]  ;;  %1894 = vmatpush.bf16.msra.mxu1 %v1887_v27  ;;  %2449 = vmatpush.bf16.msrb.mxu3 %v1887_v27 }
 0x153   : > { %1403 = vst [vmem:[#allocation2 + $0x4] sm:$0x8] %v1402_v25  ;;  %v1135_v54 = vsel %vm2847_vm13, %v3040_v47, %v1134_v51  ;;  %v974_v37 = vld [vmem:[#allocation2 + $0x10] sm:$0xf]  ;;  %v2408_v25 = vld [vmem:[%s3840_s4 + $0x8] sm:$0xff]  ;;  %v3174_v33 = vrot.slane %v902_v19, 4 }
 0x154   : > { %1136 = vst [vmem:[#allocation2 + $0xc] sm:$0xf] %v1135_v54  ;;  %v975_v5 = vsel %vm2900_vm4, %v927_v17, %v974_v37  ;;  %v1404_v2 = vld [vmem:[#allocation2 + $0x8] sm:$0x8] }
 0x155   : > { %976 = vst [vmem:[#allocation2 + $0x10] sm:$0xf] %v975_v5  ;;  %1314 = vrot.lane.b32.xlu0 %v895_v63, %s2490_s30  ;;  %1095 = vrot.lane.b32.xlu1 %v3006_v60, %s2488_s28  ;;  %v1405_v47 = vsel %vm2953_vm9, 0, %v1404_v2 }
 0x156   : > { %936 = vrot.lane.b32.xlu2 %v3096_v49, %s2489_s29  ;;  %1406 = vst [vmem:[#allocation2 + $0x8] sm:$0x8] %v1405_v47  ;;  %v782_v11 = vld [vmem:[#allocation2 + $0x34] sm:$0x1]  ;;  %1895 = vmatpush.bf16.msra.mxu1 %v2408_v25 }
 0x157   : > { %v3157_v17 = vpop.permute.xlu0 %1233  ;;  %v929_v24 = vpop.permute.xlu1 %928  ;;  %v783_v8 = vsel %vm2631_vm6, 0, %v782_v11  ;;  %v785_v43 = vld [vmem:[#allocation2 + $0x38] sm:$0x1]  ;;  %2450 = vmatpush.bf16.msrb.mxu3 %v2408_v25 }
 0x158   : > { %v3159_v16 = vpop.permute.xlu2 %1590  ;;  %v978_v63 = vsel %vm2900_vm4, %v929_v24, %v977_v36  ;;  %784 = vst [vmem:[#allocation2 + $0x34] sm:$0x1] %v783_v8  ;;  %v786_v46 = vsel %vm2631_vm6, 0, %v785_v43 }
 0x159   : > { %979 = vst [vmem:[#allocation2 + $0x14] sm:$0xf] %v978_v63 }
 0x15a   : > { %v1493_v34 = vld [vmem:[#allocation2 + $0x4] sm:$0xf]  ;;  %787 = vst [vmem:[#allocation2 + $0x38] sm:$0x1] %v786_v46 }
 0x15b   : > { %v1494_v51 = vsel %vm2981_vm8, %v2942_v59, %v1493_v34  ;;  %v1184_v21 = vld [vmem:[#allocation2 + $0xc] sm:$0x1]  ;;  %v2407_v59 = vld [vmem:[%s3840_s4] sm:$0xff] }
 0x15c   : > { %1495 = vst [vmem:[#allocation2 + $0x4] sm:$0xf] %v1494_v51  ;;  %v1185_v54 = vsel %vm2870_vm15, 0, %v1184_v21  ;;  %v1025_v37 = vld [vmem:[#allocation2 + $0x10] sm:$0x8]  ;;  %1896 = vmatpush.bf16.msra.mxu1 %v2407_v59  ;;  %2451 = vmatpush.bf16.msrb.mxu3 %v2407_v59 }
 0x15d   : > { %1186 = vst [vmem:[#allocation2 + $0xc] sm:$0x1] %v1185_v54  ;;  %v1026_v5 = vsel %vm2799_vm11, 0, %v1025_v37  ;;  %1245 = vrot.lane.b32.xlu0 %v2973_v41, %s2486_s26  ;;  %825 = vrot.lane.b32.xlu1 %v2975_v42, %s2487_s27  ;;  %v904_v54 = vrot.slane %v650_v50, 4 }
 0x15e   : > { %1277 = vst.msk [vmem:[#allocation2 + $0xc] sm:$0xf] %vm1273_vm0, %v1232_v22  ;;  %1318 = vrot.lane.b32.xlu2 %v3174_v33, %s2490_s30  ;;  %v1496_v22 = vld [vmem:[#allocation2 + $0x8] sm:$0xf] }
 0x15f   : > { %1027 = vst [vmem:[#allocation2 + $0x10] sm:$0x8] %v1026_v5  ;;  %v3188_v2 = vpop.permute.xlu0 %1592  ;;  %v3190_v57 = vpop.permute.xlu1 %1235  ;;  %v909_v5 = vrot.slane %v660_v48, 5 }
 0x160   : > { %v1028_v47 = vld [vmem:[#allocation2 + $0x14] sm:$0x8]  ;;  %v1451_v61 = vpop.permute.xlu2 %1450 }
 0x161   : > { %v1029_v36 = vsel %vm2799_vm11, 0, %v1028_v47  ;;  %v1497_v24 = vsel %vm2981_vm8, %v1451_v61, %v1496_v22 }
 0x162   : > { %1030 = vst [vmem:[#allocation2 + $0x14] sm:$0x8] %v1029_v36 }
 0x163   : > { %v1541_v63 = vld [vmem:[#allocation2 + $0x4] sm:$0x1]  ;;  %1498 = vst [vmem:[#allocation2 + $0x8] sm:$0xf] %v1497_v24 }
 0x164   : > { %v1542_v19 = vsel %vm3024_vm14, 0, %v1541_v63 }
 0x165   : > { %1543 = vst [vmem:[#allocation2 + $0x4] sm:$0x1] %v1542_v19  ;;  %v1357_v11 = vld [vmem:[#allocation2 + $0xc] sm:$0xf]  ;;  %938 = vrot.lane.b32.xlu0 %v3174_v33, %s2489_s29  ;;  %1247 = vrot.lane.b32.xlu1 %v2975_v42, %s2486_s26 }
 0x166   : > { %1630 = vst.msk [vmem:[#allocation2 + $0x4] sm:$0xf] %vm1628_vm10, %v2947_v62  ;;  %v1137_v27 = vld [vmem:[#allocation2 + $0x10] sm:$0xf]  ;;  %1097 = vrot.lane.b32.xlu2 %v3012_v15, %s2488_s28  ;;  %v1358_v8 = vsel %vm2922_vm12, %v3079_v31, %v1357_v11  ;;  %v905_v31 = vrot.slane %v653_v52, 5 }
 0x167   : > { %v1138_v34 = vsel %vm2847_vm13, %v3122_v1, %v1137_v27  ;;  %1359 = vst [vmem:[#allocation2 + $0xc] sm:$0xf] %v1358_v8  ;;  %v1453_v25 = vpop.permute.xlu0 %1452  ;;  %v818_v51 = vpop.permute.xlu1 %817  ;;  %v908_v1 = vrot.slane %v657_v29, 4 }
 0x168   : > { %1139 = vst [vmem:[#allocation2 + $0x10] sm:$0xf] %v1138_v34  ;;  %v1650_v21 = vpop.permute.xlu2 %1649 }
 0x169   : > { %854 = vst.msk [vmem:[#allocation2 + $0x1c] sm:$0xf] %vm3877_vm3, %v818_v51  ;;  %v910_v46 = vor.u32 %v909_v5, %v908_v1  ;;  %v1140_v22 = vld [vmem:[#allocation2 + $0x14] sm:$0xf]  ;;  %v913_v1 = vrot.slane %v667_v10, 5  ;;  %vm1860_vm3 = vcmask 293888  }
 0x16a   : > { %v1544_v62 = vld [vmem:[#allocation2 + $0x8] sm:$0x1]  ;;  %v2476_v5 = vld [vmem:[%s3838_s2] ss:$0 sm:$0xff] }
 0x16b   : > { %v1545_v37 = vsel %vm3024_vm14, 0, %v1544_v62  ;;  %v3249_v24 = vrot.slane %v910_v46, 4  ;;  %v504_v62 = vpop.f32.mrf.mxu3 }
 0x16c   : > { %1546 = vst [vmem:[#allocation2 + $0x8] sm:$0x1] %v1545_v37 }
 0x16d   : > { %v1692_v59 = vld [vmem:[#allocation2 + $0x4] sm:$0xf]  ;;  %1631 = vst.msk [vmem:[#allocation2 + $0x8] sm:$0xf] %vm1628_vm10, %v3159_v16  ;;  %1462 = vrot.lane.b32.xlu0 %v3006_v60, %s2491_s11  ;;  %1099 = vrot.lane.b32.xlu1 %v3120_v38, %s2488_s28  ;;  %v906_v60 = vor.u32 %v905_v31, %v904_v54 }
 0x16e   : > { %v1693_v50 = vsel %vm3069_vm2, %v3008_v12, %v1692_v59  ;;  %v1407_v52 = vld [vmem:[#allocation2 + $0xc] sm:$0x8]  ;;  %827 = vrot.lane.b32.xlu2 %v3085_v55, %s2487_s27 }
 0x16f   : > { %1694 = vst [vmem:[#allocation2 + $0x4] sm:$0xf] %v1693_v50  ;;  %v1187_v29 = vld [vmem:[#allocation2 + $0x10] sm:$0x1]  ;;  %v1408_v48 = vsel %vm2953_vm9, 0, %v1407_v52  ;;  %v816_v16 = vpop.permute.xlu0 %815  ;;  %v3238_v43 = vpop.permute.xlu1 %1308  ;;  %v3247_v36 = vrot.slane %v906_v60, 4 }
 0x170   : > { %v1188_v47 = vsel %vm2870_vm15, 0, %v1187_v29  ;;  %1409 = vst [vmem:[#allocation2 + $0xc] sm:$0x8] %v1408_v48  ;;  %v1086_v12 = vpop.permute.xlu2 %1085 }
 0x171   : > { %1189 = vst [vmem:[#allocation2 + $0x10] sm:$0x1] %v1188_v47  ;;  %v1141_v61 = vsel %vm2847_vm13, %v1086_v12, %v1140_v22  ;;  %v983_v22 = vld [vmem:[#allocation2 + $0x1c] sm:$0xf] }
 0x172   : > { %1278 = vst.msk [vmem:[#allocation2 + $0x10] sm:$0xf] %vm1273_vm0, %v3157_v17 }
 0x173   : > { %853 = vst.msk [vmem:[#allocation2 + $0x18] sm:$0xf] %vm3878_vm1, %v816_v16  ;;  %v2477_v16 = vld [vmem:[%s3839_s3] ss:$0 sm:$0xff] }
 0x174   : > { %v1695_v63 = vld [vmem:[#allocation2 + $0x8] sm:$0xf]  ;;  %1142 = vst [vmem:[#allocation2 + $0x14] sm:$0xf] %v1141_v61 }
 0x175   : > { %v1696_v19 = vsel %vm3069_vm2, %v1650_v21, %v1695_v63  ;;  %940 = vrot.lane.b32.xlu0 %v3247_v36, %s2489_s29  ;;  %942 = vrot.lane.b32.xlu1 %v3249_v24, %s2489_s29 }
 0x176   : > { %v1739_v11 = vld [vmem:[#allocation2 + $0x4] sm:$0x8]  ;;  %1697 = vst [vmem:[#allocation2 + $0x8] sm:$0xf] %v1696_v19  ;;  %1460 = vrot.lane.b32.xlu2 %v2896_v23, %s2491_s11  ;;  %v912_v23 = vrot.slane %v664_v6, 4 }
 0x177   : > { %v1740_v17 = vsel %vm3112_vm7, 0, %v1739_v11  ;;  %v1499_v27 = vld [vmem:[#allocation2 + $0xc] sm:$0xf]  ;;  %v1307_v8 = vpop.permute.xlu0 %1306  ;;  %v3261_v34 = vpop.permute.xlu1 %1237 }
 0x178   : > { %1741 = vst [vmem:[#allocation2 + $0x4] sm:$0x8] %v1740_v17  ;;  %v1500_v51 = vsel %vm2981_vm8, %v1453_v25, %v1499_v27  ;;  %v1455_v21 = vpop.permute.xlu2 %1454  ;;  %v526_v25 = vmul.f32 %v2476_v5, %v504_v62  ;;  %v914_v48 = vor.u32 %v913_v1, %v912_v23 }
 0x179   : > { %1501 = vst [vmem:[#allocation2 + $0xc] sm:$0xf] %v1500_v51  ;;  %v1360_v54 = vld [vmem:[#allocation2 + $0x10] sm:$0xf] }
 0x17a   : > { %v1361_v37 = vsel %vm2922_vm12, %v1307_v8, %v1360_v54  ;;  %v546_v60 = vadd.f32 %v2477_v16, %v526_v25  ;;  %v3300_v19 = vrot.slane %v914_v48, 4  ;;  %v767_v54 = vld [vmem:[#allocation2 + $0x20] sm:$0x1] }
 0x17b   : > { %v1190_v31 = vld [vmem:[#allocation2 + $0x14] sm:$0x1]  ;;  %1362 = vst [vmem:[#allocation2 + $0x10] sm:$0xf] %v1361_v37  ;;  %v768_v37 = vsel %vm2631_vm6, 0, %v767_v54  ;;  %vm3879_vm6 = vcmask 93248  }
 0x17c   : > { %v1191_v59 = vsel %vm2870_vm15, 0, %v1190_v31  ;;  %v562_v11 = vmax.f32 %v546_v60, 0.0  ;;  %769 = vst [vmem:[#allocation2 + $0x20] sm:$0x1] %v768_v37 }
 0x17d   : > { %v1742_v50 = vld [vmem:[#allocation2 + $0x8] sm:$0x8]  ;;  %1192 = vst [vmem:[#allocation2 + $0x14] sm:$0x1] %v1191_v59  ;;  %1320 = vrot.lane.b32.xlu0 %v3247_v36, %s2490_s30  ;;  %829 = vrot.lane.b32.xlu1 %v3087_v56, %s2487_s27 }
 0x17e   : > { %v1743_v6 = vsel %vm3112_vm7, 0, %v1742_v50  ;;  %1279 = vst.msk [vmem:[#allocation2 + $0x14] sm:$0xf] %vm1273_vm0, %v3190_v57  ;;  %1249 = vrot.lane.b32.xlu2 %v3085_v55, %s2486_s26  ;;  %v3313_v51 = vpack.c.bf16 %v562_v11, %v562_v11 }
 0x17f   : > { %1744 = vst [vmem:[#allocation2 + $0x8] sm:$0x8] %v1743_v6  ;;  %v2399_v10 = vld [vmem:[#allocation2] sm:$0xff]  ;;  %v1652_v52 = vpop.permute.xlu0 %1651  ;;  %v3286_v29 = vpop.permute.xlu1 %1596 }
 0x180   : > { %v1547_v46 = vld [vmem:[#allocation2 + $0xc] sm:$0x1]  ;;  %v933_v47 = vpop.permute.xlu2 %932  ;;  %2370 = vmatmul.msk.bf16.vlgmr.msra.gmra.mxu1 %vm1860_vm3, %v2399_v10  ;;  %863 = vst.msk [vmem:[#allocation2 + $0x20] sm:$0xf] %vm3878_vm1, %v2494_v13  ;;  %v1069_v25 = vshrl.u32 %v3313_v51, 16  ;;  %v1072_v16 = vshll.u32 %v3313_v51, 16 }
 0x181   : > { %v1548_v57 = vsel %vm3024_vm14, 0, %v1547_v46  ;;  %v984_v61 = vsel %vm2900_vm4, %v933_v47, %v983_v22  ;;  %1009 = vst.msk [vmem:[#allocation2 + $0x20] sm:$0xf] %vm3879_vm6, %v2494_v13  ;;  %vm3880_vm6 = vmmov %vm3878_vm1 }
 0x182   : > { %1549 = vst [vmem:[#allocation2 + $0xc] sm:$0x1] %v1548_v57  ;;  %v1410_v12 = vld [vmem:[#allocation2 + $0x10] sm:$0x8]  ;;  %v1071_v48 = vrot.slane %v1069_v25, 7 }
 0x183   : > { %1632 = vst.msk [vmem:[#allocation2 + $0xc] sm:$0xf] %vm1628_vm10, %v3188_v2  ;;  %v1411_v63 = vsel %vm2953_vm9, 0, %v1410_v12 }
 0x184   : > { %1412 = vst [vmem:[#allocation2 + $0x10] sm:$0x8] %v1411_v63  ;;  %v3346_v57 = vor.u32 %v1072_v16, %v1071_v48  ;;  %v1294_v48 = vrot.slane %v1069_v25, 4 }
 0x185   : > { %v1363_v17 = vld [vmem:[#allocation2 + $0x14] sm:$0xf]  ;;  %985 = vst [vmem:[#allocation2 + $0x1c] sm:$0xf] %v984_v61  ;;  %1251 = vrot.lane.b32.xlu0 %v3087_v56, %s2486_s26  ;;  %944 = vrot.lane.b32.xlu1 %v3300_v19, %s2489_s29 }
 0x186   : > { %v1364_v27 = vsel %vm2922_vm12, %v3238_v43, %v1363_v17  ;;  %1322 = vrot.lane.b32.xlu2 %v3249_v24, %s2490_s30 }
 0x187   : > { %1365 = vst [vmem:[#allocation2 + $0x14] sm:$0xf] %v1364_v27  ;;  %v1595_v2 = vpop.permute.xlu0 %1594  ;;  %v3311_v8 = vpop.permute.xlu1 %1310 }
 0x188   : > { %v1090_v62 = vpop.permute.xlu2 %1089  ;;  %v1037_v63 = vld [vmem:[#allocation2 + $0x20] sm:$0x8] }
 0x189   : > { %v1038_v27 = vsel %vm2799_vm11, 0, %v1037_v63 }
 0x18a   : > { %v1698_v31 = vld [vmem:[#allocation2 + $0xc] sm:$0xf]  ;;  %1039 = vst [vmem:[#allocation2 + $0x20] sm:$0x8] %v1038_v27 }
 0x18b   : > { %v1502_v23 = vld [vmem:[#allocation2 + $0x10] sm:$0xf]  ;;  %v1699_v43 = vsel %vm3069_vm2, %v1652_v52, %v1698_v31 }
 0x18c   : > { %v1503_v1 = vsel %vm2981_vm8, %v1455_v21, %v1502_v23  ;;  %1700 = vst [vmem:[#allocation2 + $0xc] sm:$0xf] %v1699_v43  ;;  %v1034_v5 = vld [vmem:[#allocation2 + $0x1c] sm:$0x8]  ;;  %v980_v21 = vld [vmem:[#allocation2 + $0x18] sm:$0xf] }
 0x18d   : > { %1504 = vst [vmem:[#allocation2 + $0x10] sm:$0xf] %v1503_v1  ;;  %v1035_v45 = vsel %vm2799_vm11, 0, %v1034_v5  ;;  %1326 = vrot.lane.b32.xlu0 %v2689_v28, %s2490_s30  ;;  %1657 = vrot.lane.b32.xlu1 %v3028_v35, %s2493_s14 }
 0x18e   : > { %v1413_v59 = vld [vmem:[#allocation2 + $0x14] sm:$0x8]  ;;  %1036 = vst [vmem:[#allocation2 + $0x1c] sm:$0x8] %v1035_v45  ;;  %1101 = vrot.lane.b32.xlu2 %v3129_v18, %s2488_s28 }
 0x18f   : > { %v1414_v50 = vsel %vm2953_vm9, 0, %v1413_v59  ;;  %v931_v6 = vpop.permute.xlu0 %930  ;;  %v3334_v10 = vpop.permute.xlu1 %1655 }
 0x190   : > { %1415 = vst [vmem:[#allocation2 + $0x14] sm:$0x8] %v1414_v50  ;;  %v981_v52 = vsel %vm2900_vm4, %v931_v6, %v980_v21  ;;  %v820_v35 = vpop.permute.xlu2 %819 }
 0x191   : > { %982 = vst [vmem:[#allocation2 + $0x18] sm:$0xf] %v981_v52 }
 0x192   : > { %855 = vst.msk [vmem:[#allocation2 + $0x24] sm:$0xf] %vm3878_vm1, %v820_v35 }
 0x193   : > { %v1745_v60 = vld [vmem:[#allocation2 + $0xc] sm:$0x8] }
 0x194   : > { %v1550_v46 = vld [vmem:[#allocation2 + $0x10] sm:$0x1]  ;;  %v1746_v47 = vsel %vm3112_vm7, 0, %v1745_v60  ;;  %v1295_v60 = vrot.slane %v1072_v16, 5 }
 0x195   : > { %v1551_v22 = vsel %vm3024_vm14, 0, %v1550_v46  ;;  %1747 = vst [vmem:[#allocation2 + $0xc] sm:$0x8] %v1746_v47  ;;  %v1146_v12 = vld [vmem:[#allocation2 + $0x1c] sm:$0xf]  ;;  %1324 = vrot.lane.b32.xlu0 %v3300_v19, %s2490_s30  ;;  %1468 = vrot.lane.b32.xlu1 %v3129_v18, %s2491_s11 }
 0x196   : > { %1552 = vst [vmem:[#allocation2 + $0x10] sm:$0x1] %v1551_v22  ;;  %v1147_v61 = vsel %vm2847_vm13, %v1090_v62, %v1146_v12  ;;  %1105 = vrot.lane.b32.xlu2 %v3346_v57, %s2488_s28  ;;  %v1296_v22 = vor.u32 %v1295_v60, %v1294_v48 }
 0x197   : > { %1633 = vst.msk [vmem:[#allocation2 + $0x10] sm:$0xf] %vm1628_vm10, %v1595_v2  ;;  %v1654_v11 = vpop.permute.xlu0 %1653  ;;  %v3359_v17 = vpop.permute.xlu1 %1598  ;;  %v1505_v59 = vld [vmem:[#allocation2 + $0x14] sm:$0xf] }
 0x198   : > { %1148 = vst [vmem:[#allocation2 + $0x1c] sm:$0xf] %v1147_v61  ;;  %v1031_v54 = vld [vmem:[#allocation2 + $0x18] sm:$0x8]  ;;  %v3363_v37 = vpop.permute.xlu2 %1312 }
 0x199   : > { %v1032_v18 = vsel %vm2799_vm11, 0, %v1031_v54 }
 0x19a   : > { %1033 = vst [vmem:[#allocation2 + $0x18] sm:$0x8] %v1032_v18 }
 0x19c   : > { %v2400_v62 = vld [vmem:[#allocation2 + $0x8] sm:$0xff] }
 0x19d   : > { %1600 = vrot.lane.b32.xlu0 %v2864_v3, %s2492_s12  ;;  %1602 = vrot.lane.b32.xlu1 %v2973_v41, %s2492_s12 }
 0x19e   : > { %v1701_v2 = vld [vmem:[#allocation2 + $0x10] sm:$0xf]  ;;  %1470 = vrot.lane.b32.xlu2 %v2624_v40, %s2491_s11  ;;  %2371 = vmatmul.msk.bf16.gmra.mxu1 %vm1860_vm3, %v2400_v62 }
 0x19f   : > { %v1196_v31 = vld [vmem:[#allocation2 + $0x1c] sm:$0x1]  ;;  %v1702_v23 = vsel %vm3069_vm2, %v1654_v11, %v1701_v2  ;;  %v1088_v43 = vpop.permute.xlu0 %1087  ;;  %v3376_v1 = vpop.permute.xlu1 %1458  ;;  %v986_v2 = vld [vmem:[#allocation2 + $0x24] sm:$0xf] }
 0x1a0   : > { %v1197_v5 = vsel %vm2870_vm15, 0, %v1196_v31  ;;  %1703 = vst [vmem:[#allocation2 + $0x10] sm:$0xf] %v1702_v23  ;;  %v3380_v3 = vpop.permute.xlu2 %1243 }
 0x1a1   : > { %1198 = vst [vmem:[#allocation2 + $0x1c] sm:$0x1] %v1197_v5  ;;  %v1143_v41 = vld [vmem:[#allocation2 + $0x18] sm:$0xf] }
 0x1a2   : > { %v1144_v40 = vsel %vm2847_vm13, %v1088_v43, %v1143_v41 }
 0x1a3   : > { %1145 = vst [vmem:[#allocation2 + $0x18] sm:$0xf] %v1144_v40 }
 0x1a5   : > { %1464 = vrot.lane.b32.xlu0 %v3012_v15, %s2491_s11  ;;  %1466 = vrot.lane.b32.xlu1 %v3120_v38, %s2491_s11 }
 0x1a6   : > { %1255 = vrot.lane.b32.xlu2 %v3313_v51, %s2486_s26 }
 0x1a7   : > { %v1748_v45 = vld [vmem:[#allocation2 + $0x10] sm:$0x8]  ;;  %v1457_v21 = vpop.permute.xlu0 %1456  ;;  %v3390_v50 = vpop.permute.xlu1 %1241 }
 0x1a8   : > { %v1749_v6 = vsel %vm3112_vm7, 0, %v1748_v45  ;;  %v1506_v52 = vsel %vm2981_vm8, %v1457_v21, %v1505_v59  ;;  %v824_v35 = vpop.permute.xlu2 %823 }
 0x1a9   : > { %1750 = vst [vmem:[#allocation2 + $0x10] sm:$0x8] %v1749_v6 }
 0x1aa   : > { %v1193_v15 = vld [vmem:[#allocation2 + $0x18] sm:$0x1]  ;;  %1507 = vst [vmem:[#allocation2 + $0x14] sm:$0xf] %v1506_v52 }
 0x1ab   : > { %v1194_v38 = vsel %vm2870_vm15, 0, %v1193_v15  ;;  %857 = vst.msk [vmem:[#allocation2 + $0x2c] sm:$0xf] %vm3880_vm6, %v824_v35  ;;  %vm3881_vm6 = vcmask 224448  }
 0x1ac   : > { %1195 = vst [vmem:[#allocation2 + $0x18] sm:$0x1] %v1194_v38 }
 0x1ad   : > { %1280 = vst.msk [vmem:[#allocation2 + $0x18] sm:$0xf] %vm1273_vm0, %v3261_v34  ;;  %1661 = vrot.lane.b32.xlu0 %v3174_v33, %s2493_s14  ;;  %1608 = vrot.lane.b32.xlu1 %v3087_v56, %s2492_s12  ;;  %v3413_v33 = vrot.slane %v1296_v22, 4 }
 0x1ae   : > { %1659 = vrot.lane.b32.xlu2 %v3096_v49, %s2493_s14  ;;  %v1149_v49 = vld [vmem:[#allocation2 + $0x20] sm:$0xf] }
 0x1af   : > { %v1240_v46 = vpop.permute.xlu0 %1239  ;;  %v822_v47 = vpop.permute.xlu1 %821 }
 0x1b0   : > { %1281 = vst.msk [vmem:[#allocation2 + $0x1c] sm:$0xf] %vm1273_vm0, %v1240_v46  ;;  %v937_v25 = vpop.permute.xlu2 %936 }
 0x1b1   : > { %v1553_v16 = vld [vmem:[#allocation2 + $0x14] sm:$0x1]  ;;  %856 = vst.msk [vmem:[#allocation2 + $0x28] sm:$0xf] %vm3878_vm1, %v822_v47 }
 0x1b2   : > { %v1554_v34 = vsel %vm3024_vm14, 0, %v1553_v16 }
 0x1b3   : > { %1555 = vst [vmem:[#allocation2 + $0x14] sm:$0x1] %v1554_v34 }
 0x1b4   : > { %v1366_v12 = vld [vmem:[#allocation2 + $0x18] sm:$0xf]  ;;  %1634 = vst.msk [vmem:[#allocation2 + $0x14] sm:$0xf] %vm1628_vm10, %v3286_v29 }
 0x1b5   : > { %v1367_v56 = vsel %vm2922_vm12, %v3311_v8, %v1366_v12  ;;  %1328 = vrot.lane.b32.xlu0 %v3413_v33, %s2490_s30  ;;  %1472 = vrot.lane.b32.xlu1 %v3346_v57, %s2491_s11 }
 0x1b6   : > { %1368 = vst [vmem:[#allocation2 + $0x18] sm:$0xf] %v1367_v56  ;;  %1610 = vrot.lane.b32.xlu2 %v2607_v26, %s2492_s12 }
 0x1b7   : > { %v1369_v61 = vld [vmem:[#allocation2 + $0x1c] sm:$0xf]  ;;  %v1092_v63 = vpop.permute.xlu0 %1091  ;;  %v3426_v11 = vpop.permute.xlu1 %1093 }
 0x1b8   : > { %v1370_v29 = vsel %vm2922_vm12, %v3363_v37, %v1369_v61  ;;  %v989_v8 = vld [vmem:[#allocation2 + $0x28] sm:$0xf]  ;;  %v1150_v27 = vsel %vm2847_vm13, %v1092_v63, %v1149_v49  ;;  %v3433_v54 = vpop.permute.xlu2 %1318  ;;  %v992_v49 = vld [vmem:[#allocation2 + $0x2c] sm:$0xf] }
 0x1b9   : > { %1371 = vst [vmem:[#allocation2 + $0x1c] sm:$0xf] %v1370_v29  ;;  %v990_v57 = vsel %vm2900_vm4, %v937_v25, %v989_v8 }
 0x1ba   : > { %991 = vst [vmem:[#allocation2 + $0x28] sm:$0xf] %v990_v57 }
 0x1bb   : > { %1151 = vst [vmem:[#allocation2 + $0x20] sm:$0xf] %v1150_v27  ;;  %v1704_v26 = vld [vmem:[#allocation2 + $0x14] sm:$0xf] }
 0x1bc   : > { %v1705_v18 = vsel %vm3069_vm2, %v3334_v10, %v1704_v26 }
 0x1bd   : > { %v1416_v62 = vld [vmem:[#allocation2 + $0x18] sm:$0x8]  ;;  %1606 = vrot.lane.b32.xlu0 %v3085_v55, %s2492_s12  ;;  %1667 = vrot.lane.b32.xlu1 %v3300_v19, %s2493_s14  ;;  %1706 = vst [vmem:[#allocation2 + $0x14] sm:$0xf] %v1705_v18 }
 0x1be   : > { %v1417_v37 = vsel %vm2953_vm9, 0, %v1416_v62  ;;  %1604 = vrot.lane.b32.xlu2 %v2975_v42, %s2492_s12 }
 0x1bf   : > { %1418 = vst [vmem:[#allocation2 + $0x18] sm:$0x8] %v1417_v37  ;;  %v935_v31 = vpop.permute.xlu0 %934  ;;  %v3448_v23 = vpop.permute.xlu1 %1316 }
 0x1c0   : > { %v987_v10 = vsel %vm2900_vm4, %v935_v31, %v986_v2  ;;  %v3452_v43 = vpop.permute.xlu2 %1097  ;;  %v1419_v55 = vld [vmem:[#allocation2 + $0x1c] sm:$0x8] }
 0x1c1   : > { %v1043_v5 = vld [vmem:[#allocation2 + $0x28] sm:$0x8]  ;;  %988 = vst [vmem:[#allocation2 + $0x24] sm:$0xf] %v987_v10  ;;  %v1420_v19 = vsel %vm2953_vm9, 0, %v1419_v55 }
 0x1c2   : > { %v1044_v41 = vsel %vm2799_vm11, 0, %v1043_v5  ;;  %v1199_v42 = vld [vmem:[#allocation2 + $0x20] sm:$0x1]  ;;  %1421 = vst [vmem:[#allocation2 + $0x1c] sm:$0x8] %v1420_v19 }
 0x1c3   : > { %1045 = vst [vmem:[#allocation2 + $0x28] sm:$0x8] %v1044_v41  ;;  %v1200_v40 = vsel %vm2870_vm15, 0, %v1199_v42 }
 0x1c4   : > { %1201 = vst [vmem:[#allocation2 + $0x20] sm:$0x1] %v1200_v40  ;;  %v1751_v45 = vld [vmem:[#allocation2 + $0x14] sm:$0x8] }
 0x1c5   : > { %1282 = vst.msk [vmem:[#allocation2 + $0x20] sm:$0xf] %vm1273_vm0, %v3390_v50  ;;  %1663 = vrot.lane.b32.xlu0 %v3247_v36, %s2493_s14  ;;  %1665 = vrot.lane.b32.xlu1 %v3249_v24, %s2493_s14  ;;  %v1752_v59 = vsel %vm3112_vm7, 0, %v1751_v45 }
 0x1c6   : > { %v1508_v21 = vld [vmem:[#allocation2 + $0x18] sm:$0xf]  ;;  %1669 = vrot.lane.b32.xlu2 %v2689_v28, %s2493_s14  ;;  %1753 = vst [vmem:[#allocation2 + $0x14] sm:$0x8] %v1752_v59 }
 0x1c7   : > { %v1509_v6 = vsel %vm2981_vm8, %v3376_v1, %v1508_v21  ;;  %v1315_v52 = vpop.permute.xlu0 %1314  ;;  %v1096_v50 = vpop.permute.xlu1 %1095  ;;  %1534 = vst.msk [vmem:[#allocation2 + $0x1c] sm:$0xf] %vm3881_vm6, %v2494_v13  ;;  %vm3882_vm6 = vmmov %vm3878_vm1 }
 0x1c8   : > { %1510 = vst [vmem:[#allocation2 + $0x18] sm:$0xf] %v1509_v6  ;;  %v1040_v36 = vld [vmem:[#allocation2 + $0x24] sm:$0x8]  ;;  %v828_v24 = vpop.permute.xlu2 %827 }
 0x1c9   : > { %v1041_v35 = vsel %vm2799_vm11, 0, %v1040_v36  ;;  %859 = vst.msk [vmem:[#allocation2 + $0x34] sm:$0xf] %vm3878_vm1, %v828_v24  ;;  %vm3883_vm1 = vcmask 290048  }
 0x1ca   : > { %1042 = vst [vmem:[#allocation2 + $0x24] sm:$0x8] %v1041_v35  ;;  %v1155_v28 = vld [vmem:[#allocation2 + $0x28] sm:$0xf]  ;;  %v2002_v35 = vld [vmem:[%s3843_s7] sm:$0x3] }
 0x1cb   : > { %v1156_v15 = vsel %vm2847_vm13, %v1096_v50, %v1155_v28  ;;  %v2029_v28 = vsel %vm1885_vm5, %v2002_v35, 0 }
 0x1cc   : > { %v1372_v38 = vld [vmem:[#allocation2 + $0x20] sm:$0xf]  ;;  %1157 = vst [vmem:[#allocation2 + $0x28] sm:$0xf] %v1156_v15  ;;  %2038 = vmatpush.bf16.msra.mxu2 %v2029_v28  ;;  %2452 = vmatpush.bf16.msra.mxu3 %v2029_v28 }
 0x1cd   : > { %v1373_v1 = vsel %vm2922_vm12, %v1315_v52, %v1372_v38  ;;  %1671 = vrot.lane.b32.xlu0 %v3413_v33, %s2493_s14  ;;  %v2401_v48 = vld [vmem:[#allocation2 + $0x10] sm:$0xff] }
 0x1ce   : > { %1374 = vst [vmem:[#allocation2 + $0x20] sm:$0xf] %v1373_v1  ;;  %1612 = vrot.lane.b32.xlu2 %v3313_v51, %s2492_s12  ;;  %2372 = vmatmul.msk.bf16.gmra.mxu1 %vm1860_vm3, %v2401_v48  ;;  %v1559_v10 = vld [vmem:[#allocation2 + $0x1c] sm:$0x1] }
 0x1cf   : > { %v1556_v60 = vld [vmem:[#allocation2 + $0x18] sm:$0x1]  ;;  %v1246_v46 = vpop.permute.xlu0 %1245  ;;  %v826_v47 = vpop.permute.xlu1 %825 }
 0x1d0   : > { %v1557_v22 = vsel %vm3024_vm14, 0, %v1556_v60  ;;  %858 = vst.msk [vmem:[#allocation2 + $0x30] sm:$0xf] %vm3882_vm6, %v826_v47  ;;  %v1461_v25 = vpop.permute.xlu2 %1460  ;;  %v998_v21 = vld [vmem:[#allocation2 + $0x34] sm:$0xf] }
 0x1d1   : > { %1558 = vst [vmem:[#allocation2 + $0x18] sm:$0x1] %v1557_v22  ;;  %v1152_v16 = vld [vmem:[#allocation2 + $0x24] sm:$0xf] }
 0x1d2   : > { %1635 = vst.msk [vmem:[#allocation2 + $0x18] sm:$0xf] %vm1628_vm10, %v3359_v17  ;;  %v1153_v51 = vsel %vm2847_vm13, %v3426_v11, %v1152_v16 }
 0x1d3   : > { %1154 = vst [vmem:[#allocation2 + $0x24] sm:$0xf] %v1153_v51  ;;  %v1205_v34 = vld [vmem:[#allocation2 + $0x28] sm:$0x1] }
 0x1d4   : > { %v1206_v33 = vsel %vm2870_vm15, 0, %v1205_v34 }
 0x1d5   : > { %v1422_v12 = vld [vmem:[#allocation2 + $0x20] sm:$0x8]  ;;  %1207 = vst [vmem:[#allocation2 + $0x28] sm:$0x1] %v1206_v33 }
 0x1d6   : > { %v1423_v56 = vsel %vm2953_vm9, 0, %v1422_v12  ;;  %1284 = vst.msk [vmem:[#allocation2 + $0x28] sm:$0xf] %vm1273_vm0, %v1246_v46  ;;  %v1170_v46 = vld [vmem:[#allocation2 + $0x3c] sm:$0xf] }
 0x1d7   : > { %1424 = vst [vmem:[#allocation2 + $0x20] sm:$0x8] %v1423_v56  ;;  %v939_v61 = vpop.permute.xlu0 %938  ;;  %v3500_v17 = vpop.permute.xlu1 %1247  ;;  %v995_v19 = vld [vmem:[#allocation2 + $0x30] sm:$0xf] }
 0x1d8   : > { %v993_v63 = vsel %vm2900_vm4, %v939_v61, %v992_v49  ;;  %v3504_v11 = vpop.permute.xlu2 %1249 }
 0x1d9   : > { %994 = vst [vmem:[#allocation2 + $0x2c] sm:$0xf] %v993_v63 }
 0x1da   : > { %v1202_v29 = vld [vmem:[#allocation2 + $0x24] sm:$0x1] }
 0x1db   : > { %v1203_v8 = vsel %vm2870_vm15, 0, %v1202_v29 }
 0x1dc   : > { %1204 = vst [vmem:[#allocation2 + $0x24] sm:$0x1] %v1203_v8 }
 0x1dd   : > { %1283 = vst.msk [vmem:[#allocation2 + $0x24] sm:$0xf] %vm1273_vm0, %v3380_v3  ;;  %v1378_v27 = vld [vmem:[#allocation2 + $0x28] sm:$0xf] }
 0x1de   : > { %v1511_v57 = vld [vmem:[#allocation2 + $0x20] sm:$0xf]  ;;  %v1379_v26 = vsel %vm2922_vm12, %v3433_v54, %v1378_v27  ;;  %v1560_v54 = vsel %vm3024_vm14, 0, %v1559_v10 }
 0x1df   : > { %v1512_v18 = vsel %vm2981_vm8, %v1461_v25, %v1511_v57  ;;  %v3515_v62 = vpop.permute.xlu0 %1462  ;;  %v3517_v37 = vpop.permute.xlu1 %1099  ;;  %1380 = vst [vmem:[#allocation2 + $0x28] sm:$0xf] %v1379_v26 }
 0x1e0   : > { %1513 = vst [vmem:[#allocation2 + $0x20] sm:$0xf] %v1512_v18  ;;  %v1046_v2 = vld [vmem:[#allocation2 + $0x2c] sm:$0x8]  ;;  %v3519_v31 = vpop.permute.xlu2 %1322 }
 0x1e1   : > { %v1047_v3 = vsel %vm2799_vm11, 0, %v1046_v2  ;;  %1561 = vst [vmem:[#allocation2 + $0x1c] sm:$0x1] %v1560_v54  ;;  %v1707_v54 = vld [vmem:[#allocation2 + $0x18] sm:$0xf] }
 0x1e2   : > { %1048 = vst [vmem:[#allocation2 + $0x2c] sm:$0x8] %v1047_v3 }
 0x1e3   : > { %1643 = vst.msk [vmem:[#allocation2 + $0x1c] sm:$0xf] %vm1628_vm10, %v2494_v13 }
 0x1e4   : > { %v1375_v55 = vld [vmem:[#allocation2 + $0x24] sm:$0xf]  ;;  %1732 = vst.msk [vmem:[#allocation2 + $0x1c] sm:$0xf] %vm3883_vm1, %v2494_v13 }
 0x1e5   : > { %v1376_v5 = vsel %vm2922_vm12, %v3448_v23, %v1375_v55 }
 0x1e6   : > { %1377 = vst [vmem:[#allocation2 + $0x24] sm:$0xf] %v1376_v5  ;;  %v1428_v41 = vld [vmem:[#allocation2 + $0x28] sm:$0x8]  ;;  %v3581_v5 = vld [vmem:[%s3841_s5] ss:$0 sm:$0xff] }
 0x1e7   : > { %v1562_v42 = vld [vmem:[#allocation2 + $0x20] sm:$0x1]  ;;  %v941_v40 = vpop.permute.xlu0 %940  ;;  %v943_v45 = vpop.permute.xlu1 %942  ;;  %v1429_v59 = vsel %vm2953_vm9, 0, %v1428_v41 }
 0x1e8   : > { %v1563_v6 = vsel %vm3024_vm14, 0, %v1562_v42  ;;  %v996_v23 = vsel %vm2900_vm4, %v941_v40, %v995_v19  ;;  %v1102_v52 = vpop.permute.xlu2 %1101  ;;  %1430 = vst [vmem:[#allocation2 + $0x28] sm:$0x8] %v1429_v59  ;;  %v999_v36 = vsel %vm2900_vm4, %v943_v45, %v998_v21 }
 0x1e9   : > { %1564 = vst [vmem:[#allocation2 + $0x20] sm:$0x1] %v1563_v6  ;;  %v1158_v50 = vld [vmem:[#allocation2 + $0x2c] sm:$0xf] }
 0x1ea   : > { %v1159_v24 = vsel %vm2847_vm13, %v3452_v43, %v1158_v50  ;;  %997 = vst [vmem:[#allocation2 + $0x30] sm:$0xf] %v996_v23  ;;  %v3595_v23 = vld [vmem:[%s3842_s6] ss:$0 sm:$0xff] }
 0x1eb   : > { %1160 = vst [vmem:[#allocation2 + $0x2c] sm:$0xf] %v1159_v24  ;;  %v1757_v1 = vld [vmem:[#allocation2 + $0x1c] sm:$0x8] }
 0x1ec   : > { %1000 = vst [vmem:[#allocation2 + $0x34] sm:$0xf] %v999_v36  ;;  %v1758_v43 = vsel %vm3112_vm7, 0, %v1757_v1 }
 0x1ed   : > { %v1425_v15 = vld [vmem:[#allocation2 + $0x24] sm:$0x8]  ;;  %1759 = vst [vmem:[#allocation2 + $0x1c] sm:$0x8] %v1758_v43 }
 0x1ee   : > { %v1426_v38 = vsel %vm2953_vm9, 0, %v1425_v15 }
 0x1ef   : > { %1427 = vst [vmem:[#allocation2 + $0x24] sm:$0x8] %v1426_v38  ;;  %v1321_v48 = vpop.permute.xlu0 %1320  ;;  %v830_v60 = vpop.permute.xlu1 %829 }
 0x1f0   : > { %860 = vst.msk [vmem:[#allocation2 + $0x38] sm:$0xf] %vm3882_vm6, %v830_v60  ;;  %v1106_v47 = vpop.permute.xlu2 %1105 }
 0x1f1   : > { %v1049_v22 = vld [vmem:[#allocation2 + $0x30] sm:$0x8]  ;;  %v1171_v25 = vsel %vm2847_vm13, %v1106_v47, %v1170_v46 }
 0x1f2   : > { %v1208_v16 = vld [vmem:[#allocation2 + $0x2c] sm:$0x1]  ;;  %v1050_v51 = vsel %vm2799_vm11, 0, %v1049_v22  ;;  %1172 = vst [vmem:[#allocation2 + $0x3c] sm:$0xf] %v1171_v25 }
 0x1f3   : > { %v1209_v34 = vsel %vm2870_vm15, 0, %v1208_v16  ;;  %1051 = vst [vmem:[#allocation2 + $0x30] sm:$0x8] %v1050_v51  ;;  %v1052_v33 = vld [vmem:[#allocation2 + $0x34] sm:$0x8] }
 0x1f4   : > { %1210 = vst [vmem:[#allocation2 + $0x2c] sm:$0x1] %v1209_v34  ;;  %v1053_v12 = vsel %vm2799_vm11, 0, %v1052_v33 }
 0x1f5   : > { %1285 = vst.msk [vmem:[#allocation2 + $0x2c] sm:$0xf] %vm1273_vm0, %v3500_v17 }
 0x1f6   : > { %v1514_v56 = vld [vmem:[#allocation2 + $0x24] sm:$0xf]  ;;  %1054 = vst [vmem:[#allocation2 + $0x34] sm:$0x8] %v1053_v12 }
 0x1f7   : > { %v1515_v49 = vsel %vm2981_vm8, %v3515_v62, %v1514_v56  ;;  %v1001_v61 = vld [vmem:[#allocation2 + $0x38] sm:$0xf]  ;;  %v1252_v63 = vpop.permute.xlu0 %1251  ;;  %v945_v29 = vpop.permute.xlu1 %944 }
 0x1f8   : > { %1516 = vst [vmem:[#allocation2 + $0x24] sm:$0xf] %v1515_v49  ;;  %v1002_v8 = vsel %vm2900_vm4, %v945_v29, %v1001_v61  ;;  %v3567_v27 = vpop.permute.xlu2 %1470 }
 0x1f9   : > { %v1220_v57 = vld [vmem:[#allocation2 + $0x3c] sm:$0x1]  ;;  %1003 = vst [vmem:[#allocation2 + $0x38] sm:$0xf] %v1002_v8 }
 0x1fa   : > { %v1161_v26 = vld [vmem:[#allocation2 + $0x30] sm:$0xf]  ;;  %v1221_v17 = vsel %vm2870_vm15, 0, %v1220_v57 }
 0x1fb   : > { %v1162_v18 = vsel %vm2847_vm13, %v3517_v37, %v1161_v26  ;;  %1222 = vst [vmem:[#allocation2 + $0x3c] sm:$0x1] %v1221_v17 }
 0x1fc   : > { %1163 = vst [vmem:[#allocation2 + $0x30] sm:$0xf] %v1162_v18  ;;  %v1381_v62 = vld [vmem:[#allocation2 + $0x2c] sm:$0xf] }
 0x1fd   : > { %v1164_v2 = vld [vmem:[#allocation2 + $0x34] sm:$0xf]  ;;  %v1382_v30 = vsel %vm2922_vm12, %v1321_v48, %v1381_v62  ;;  %v1898_v10 = vpop.f32.mrf.mxu1 }
 0x1fe   : > { %v1165_v3 = vsel %vm2847_vm13, %v1102_v52, %v1164_v2  ;;  %1383 = vst [vmem:[#allocation2 + $0x2c] sm:$0xf] %v1382_v30  ;;  %v1942_v6 = vmul.f32 %v3581_v5, %v1898_v10 }
 0x1ff   : > { %v1565_v55 = vld [vmem:[#allocation2 + $0x24] sm:$0x1]  ;;  %1166 = vst [vmem:[#allocation2 + $0x34] sm:$0xf] %v1165_v3  ;;  %v3583_v37 = vpop.permute.xlu0 %1326  ;;  %v1658_v19 = vpop.permute.xlu1 %1657 }
 0x200   : > { %v1566_v41 = vsel %vm3024_vm14, 0, %v1565_v55  ;;  %v1055_v42 = vld [vmem:[#allocation2 + $0x38] sm:$0x8]  ;;  %v1708_v40 = vsel %vm3069_vm2, %v1658_v19, %v1707_v54  ;;  %v1256_v59 = vpop.permute.xlu2 %1255  ;;  %v1962_v28 = vadd.f32 %v3595_v23, %v1942_v6 }
 0x201   : > { %1567 = vst [vmem:[#allocation2 + $0x24] sm:$0x1] %v1566_v41  ;;  %v1056_v45 = vsel %vm2799_vm11, 0, %v1055_v42  ;;  %vm2003_vm11 = vcmask 31744  }
 0x202   : > { %1057 = vst [vmem:[#allocation2 + $0x38] sm:$0x8] %v1056_v45  ;;  %v1978_v46 = vmax.f32 %v1962_v28, 0.0 }
 0x203   : > { %v1211_v21 = vld [vmem:[#allocation2 + $0x30] sm:$0x1]  ;;  %1709 = vst [vmem:[#allocation2 + $0x18] sm:$0xf] %v1708_v40 }
 0x204   : > { %v1212_v52 = vsel %vm2870_vm15, 0, %v1211_v21  ;;  %1289 = vst.msk [vmem:[#allocation2 + $0x3c] sm:$0xf] %vm1273_vm0, %v1256_v59 }
 0x205   : > { %1213 = vst [vmem:[#allocation2 + $0x30] sm:$0x1] %v1212_v52  ;;  %v1431_v50 = vld [vmem:[#allocation2 + $0x2c] sm:$0x8]  ;;  %v1900_v24 = vpop.f32.mrf.mxu1 }
 0x206   : > { %1286 = vst.msk [vmem:[#allocation2 + $0x30] sm:$0xf] %vm1273_vm0, %v3504_v11  ;;  %v1214_v0 = vld [vmem:[#allocation2 + $0x34] sm:$0x1]  ;;  %v1432_v36 = vsel %vm2953_vm9, 0, %v1431_v50  ;;  %v1943_v15 = vmul.f32 %v3581_v5, %v1900_v24 }
 0x207   : > { %v1215_v35 = vsel %vm2870_vm15, 0, %v1214_v0  ;;  %1433 = vst [vmem:[#allocation2 + $0x2c] sm:$0x8] %v1432_v36  ;;  %v1325_v38 = vpop.permute.xlu0 %1324  ;;  %v1469_v1 = vpop.permute.xlu1 %1468 }
 0x208   : > { %1216 = vst [vmem:[#allocation2 + $0x34] sm:$0x1] %v1215_v35  ;;  %v1963_v11 = vadd.f32 %v3595_v23, %v1943_v15  ;;  %v1660_v33 = vpop.permute.xlu2 %1659 }
 0x209   : > { %1287 = vst.msk [vmem:[#allocation2 + $0x34] sm:$0xf] %vm1273_vm0, %v1252_v63  ;;  %v1167_v48 = vld [vmem:[#allocation2 + $0x38] sm:$0xf]  ;;  %v1517_v63 = vld [vmem:[#allocation2 + $0x28] sm:$0xf] }
 0x20a   : > { %v1168_v60 = vsel %vm2847_vm13, %v2831_v39, %v1167_v48  ;;  %v1754_v43 = vld [vmem:[#allocation2 + $0x18] sm:$0x8]  ;;  %v1979_v22 = vmax.f32 %v1963_v11, 0.0  ;;  %vm3884_vm13 = vcmask 224448  }
 0x20b   : > { %1169 = vst [vmem:[#allocation2 + $0x38] sm:$0xf] %v1168_v60  ;;  %v1755_v47 = vsel %vm3112_vm7, 0, %v1754_v43  ;;  %v1393_v60 = vld [vmem:[#allocation2 + $0x3c] sm:$0xf] }
 0x20c   : > { %1756 = vst [vmem:[#allocation2 + $0x18] sm:$0x8] %v1755_v47  ;;  %v1994_v16 = vpack.c.bf16 %v1979_v22, %v1978_v46 }
 0x20d   : > { %v1384_v25 = vld [vmem:[#allocation2 + $0x30] sm:$0xf] }
 0x20e   : > { %v1385_v51 = vsel %vm2922_vm12, %v3519_v31, %v1384_v25  ;;  %2378 = vmatmul.msk.bf16.vlgmr.msra.gmra.mxu2 %vm2003_vm11, %v1994_v16  ;;  %v1520_v57 = vld [vmem:[#allocation2 + $0x2c] sm:$0xf] }
 0x20f   : > { %1386 = vst [vmem:[#allocation2 + $0x30] sm:$0xf] %v1385_v51  ;;  %v1601_v20 = vpop.permute.xlu0 %1600  ;;  %v1603_v39 = vpop.permute.xlu1 %1602 }
 0x210   : > { %v1387_v34 = vld [vmem:[#allocation2 + $0x34] sm:$0xf]  ;;  %1636 = vst.msk [vmem:[#allocation2 + $0x20] sm:$0xf] %vm1628_vm10, %v1601_v20  ;;  %v1611_v30 = vpop.permute.xlu2 %1610 }
 0x211   : > { %v1388_v12 = vsel %vm2922_vm12, %v1325_v38, %v1387_v34  ;;  %1637 = vst.msk [vmem:[#allocation2 + $0x24] sm:$0xf] %vm1628_vm10, %v1603_v39 }
 0x212   : > { %v1217_v56 = vld [vmem:[#allocation2 + $0x38] sm:$0x1]  ;;  %1389 = vst [vmem:[#allocation2 + $0x34] sm:$0xf] %v1388_v12 }
 0x213   : > { %v1218_v49 = vsel %vm2870_vm15, 0, %v1217_v56  ;;  %v2402_v31 = vld [vmem:[#allocation2 + $0x18] sm:$0xff] }
 0x214   : > { %1219 = vst [vmem:[#allocation2 + $0x38] sm:$0x1] %v1218_v49  ;;  %2373 = vmatmul.msk.bf16.gmra.mxu1 %vm1860_vm3, %v2402_v31 }
 0x215   : > { %1288 = vst.msk [vmem:[#allocation2 + $0x38] sm:$0xf] %vm1273_vm0, %v2855_v53 }
 0x216   : > { %v1434_v61 = vld [vmem:[#allocation2 + $0x30] sm:$0x8] }
 0x217   : > { %v1435_v29 = vsel %vm2953_vm9, 0, %v1434_v61  ;;  %v1465_v8 = vpop.permute.xlu0 %1464  ;;  %v1467_v26 = vpop.permute.xlu1 %1466  ;;  %v1710_v17 = vld [vmem:[#allocation2 + $0x20] sm:$0xf] }
 0x218   : > { %1436 = vst [vmem:[#allocation2 + $0x30] sm:$0x8] %v1435_v29  ;;  %v1518_v4 = vsel %vm2981_vm8, %v1465_v8, %v1517_v63  ;;  %v1521_v18 = vsel %vm2981_vm8, %v1467_v26, %v1520_v57  ;;  %v1711_v53 = vsel %vm3069_vm2, %v1660_v33, %v1710_v17  ;;  %v1713_v59 = vld [vmem:[#allocation2 + $0x24] sm:$0xf]  ;;  %v1605_v35 = vpop.permute.xlu2 %1604 }
 0x219   : > { %v1437_v62 = vld [vmem:[#allocation2 + $0x34] sm:$0x8]  ;;  %1519 = vst [vmem:[#allocation2 + $0x28] sm:$0xf] %v1518_v4 }
 0x21a   : > { %v1438_v2 = vsel %vm2953_vm9, 0, %v1437_v62  ;;  %1522 = vst [vmem:[#allocation2 + $0x2c] sm:$0xf] %v1521_v18 }
 0x21b   : > { %1439 = vst [vmem:[#allocation2 + $0x34] sm:$0x8] %v1438_v2  ;;  %v1903_v3 = vpop.f32.mrf.mxu1 }
 0x21c   : > { %v1390_v10 = vld [vmem:[#allocation2 + $0x38] sm:$0xf]  ;;  %1712 = vst [vmem:[#allocation2 + $0x20] sm:$0xf] %v1711_v53  ;;  %v1944_v45 = vmul.f32 %v3581_v5, %v1903_v3 }
 0x21d   : > { %v1391_v54 = vsel %vm2922_vm12, %v3583_v37, %v1390_v10 }
 0x21e   : > { %1392 = vst [vmem:[#allocation2 + $0x38] sm:$0xf] %v1391_v54  ;;  %v1964_v28 = vadd.f32 %v3595_v23, %v1944_v45 }
 0x21f   : > { %v1523_v55 = vld [vmem:[#allocation2 + $0x30] sm:$0xf]  ;;  %v1662_v19 = vpop.permute.xlu0 %1661  ;;  %v1609_v41 = vpop.permute.xlu1 %1608 }
 0x220   : > { %v1524_v42 = vsel %vm2981_vm8, %v1469_v1, %v1523_v55  ;;  %v1568_v40 = vld [vmem:[#allocation2 + $0x28] sm:$0x1]  ;;  %v1714_v0 = vsel %vm3069_vm2, %v1662_v19, %v1713_v59  ;;  %v1980_v47 = vmax.f32 %v1964_v28, 0.0  ;;  %v1670_v12 = vpop.permute.xlu2 %1669 }
 0x221   : > { %1525 = vst [vmem:[#allocation2 + $0x30] sm:$0xf] %v1524_v42  ;;  %v1569_v21 = vsel %vm3024_vm14, 0, %v1568_v40  ;;  %v1571_v6 = vld [vmem:[#allocation2 + $0x2c] sm:$0x1] }
 0x222   : > { %v1526_v52 = vld [vmem:[#allocation2 + $0x34] sm:$0xf]  ;;  %1570 = vst [vmem:[#allocation2 + $0x28] sm:$0x1] %v1569_v21  ;;  %v1572_v37 = vsel %vm3024_vm14, 0, %v1571_v6 }
 0x223   : > { %v1527_v50 = vsel %vm2981_vm8, %v3567_v27, %v1526_v52  ;;  %1573 = vst [vmem:[#allocation2 + $0x2c] sm:$0x1] %v1572_v37  ;;  %v1905_v36 = vpop.f32.mrf.mxu1  ;;  %v1760_v24 = vld [vmem:[#allocation2 + $0x20] sm:$0x8] }
 0x224   : > { %1528 = vst [vmem:[#allocation2 + $0x34] sm:$0xf] %v1527_v50  ;;  %v1945_v15 = vmul.f32 %v3581_v5, %v1905_v36  ;;  %v1761_v1 = vsel %vm3112_vm7, 0, %v1760_v24 }
 0x225   : > { %v1440_v38 = vld [vmem:[#allocation2 + $0x38] sm:$0x8]  ;;  %1638 = vst.msk [vmem:[#allocation2 + $0x28] sm:$0xf] %vm1628_vm10, %v1605_v35 }
 0x226   : > { %v1441_v27 = vsel %vm2953_vm9, 0, %v1440_v38  ;;  %1715 = vst [vmem:[#allocation2 + $0x24] sm:$0xf] %v1714_v0  ;;  %v1965_v48 = vadd.f32 %v3595_v23, %v1945_v15 }
 0x227   : > { %1442 = vst [vmem:[#allocation2 + $0x38] sm:$0x8] %v1441_v27  ;;  %v1329_v11 = vpop.permute.xlu0 %1328  ;;  %v1473_v43 = vpop.permute.xlu1 %1472 }
 0x228   : > { %v1574_v46 = vld [vmem:[#allocation2 + $0x30] sm:$0x1]  ;;  %v1981_v22 = vmax.f32 %v1965_v48, 0.0  ;;  %v1394_v25 = vsel %vm2922_vm12, %v1329_v11, %v1393_v60  ;;  %1762 = vst [vmem:[#allocation2 + $0x20] sm:$0x8] %v1761_v1  ;;  %v1613_v53 = vpop.permute.xlu2 %1612 }
 0x229   : > { %v1575_v16 = vsel %vm3024_vm14, 0, %v1574_v46  ;;  %1395 = vst [vmem:[#allocation2 + $0x3c] sm:$0xf] %v1394_v25  ;;  %v3722_v60 = vld [vmem:[%s3844_s8] ss:$0 sm:$0xff] }
 0x22a   : > { %1576 = vst [vmem:[#allocation2 + $0x30] sm:$0x1] %v1575_v16  ;;  %v1995_v51 = vpack.c.bf16 %v1981_v22, %v1980_v47  ;;  %v3728_v46 = vld [vmem:[%s3845_s9] ss:$0 sm:$0xff] }
 0x22b   : > { %v1577_v20 = vld [vmem:[#allocation2 + $0x34] sm:$0x1]  ;;  %1640 = vst.msk [vmem:[#allocation2 + $0x30] sm:$0xf] %vm1628_vm10, %v1609_v41 }
 0x22c   : > { %v1578_v39 = vsel %vm3024_vm14, 0, %v1577_v20  ;;  %2379 = vmatmul.msk.bf16.gmra.mxu2 %vm2003_vm11, %v1995_v51  ;;  %v1716_v4 = vld [vmem:[#allocation2 + $0x28] sm:$0xf] }
 0x22d   : > { %1579 = vst [vmem:[#allocation2 + $0x34] sm:$0x1] %v1578_v39  ;;  %v1763_v34 = vld [vmem:[#allocation2 + $0x24] sm:$0x8] }
 0x22e   : > { %1641 = vst.msk [vmem:[#allocation2 + $0x34] sm:$0xf] %vm1628_vm10, %v1611_v30  ;;  %v1764_v58 = vsel %vm3112_vm7, 0, %v1763_v34  ;;  %v1529_v33 = vld [vmem:[#allocation2 + $0x38] sm:$0xf] }
 0x22f   : > { %1765 = vst [vmem:[#allocation2 + $0x24] sm:$0x8] %v1764_v58  ;;  %v1530_v56 = vsel %vm2981_vm8, %v1473_v43, %v1529_v33  ;;  %v1607_v49 = vpop.permute.xlu0 %1606  ;;  %v1668_v63 = vpop.permute.xlu1 %1667  ;;  %vm3885_vm8 = vmmov %vm3883_vm1  ;;  %v2410_v43 = vld [vmem:[%s2569_s21] sm:$0xff]  }
 0x230   : > { %v1443_v31 = vld [vmem:[#allocation2 + $0x3c] sm:$0x8]  ;;  %1531 = vst [vmem:[#allocation2 + $0x38] sm:$0xf] %v1530_v56  ;;  %v2411_v25 = vunpack.c.l.bf16 %v2410_v43  ;;  %v2412_v33 = vunpack.c.h.bf16 %v2410_v43 }
 0x231   : > { %v1444_v61 = vsel %vm2953_vm9, 0, %v1443_v31  ;;  %1639 = vst.msk [vmem:[#allocation2 + $0x2c] sm:$0xf] %vm1628_vm10, %v1607_v49 }
 0x232   : > { %1445 = vst [vmem:[#allocation2 + $0x3c] sm:$0x8] %v1444_v61  ;;  %v1722_v29 = vld [vmem:[#allocation2 + $0x30] sm:$0xf] }
 0x233   : > { %1535 = vst.msk [vmem:[#allocation2 + $0x3c] sm:$0xf] %vm3884_vm13, %v2494_v13  ;;  %v1723_v8 = vsel %vm3069_vm2, %v1668_v63, %v1722_v29 }
 0x234   : > { %1724 = vst [vmem:[#allocation2 + $0x30] sm:$0xf] %v1723_v8 }
 0x235   : > { %v1725_v44 = vld [vmem:[#allocation2 + $0x34] sm:$0xf] }
 0x236   : > { %v1726_v57 = vsel %vm3069_vm2, %v1670_v12, %v1725_v44  ;;  %v2403_v26 = vld [vmem:[#allocation2 + $0x20] sm:$0xff] }
 0x237   : > { %1727 = vst [vmem:[#allocation2 + $0x34] sm:$0xf] %v1726_v57  ;;  %v1580_v9 = vld [vmem:[#allocation2 + $0x38] sm:$0x1]  ;;  %v1664_v17 = vpop.permute.xlu0 %1663  ;;  %2374 = vmatmul.msk.bf16.gmra.mxu1 %vm1860_vm3, %v2403_v26  ;;  %v1666_v54 = vpop.permute.xlu1 %1665 }
 0x238   : > { %v1581_v18 = vsel %vm3024_vm14, 0, %v1580_v9  ;;  %v1717_v62 = vsel %vm3069_vm2, %v1664_v17, %v1716_v4  ;;  %v1719_v30 = vld [vmem:[#allocation2 + $0x2c] sm:$0xf] }
 0x239   : > { %1582 = vst [vmem:[#allocation2 + $0x38] sm:$0x1] %v1581_v18  ;;  %v1720_v41 = vsel %vm3069_vm2, %v1666_v54, %v1719_v30  ;;  %v2441_v4 = vld [vmem:[%s2569_s21 + $0x8] sm:$0xff]  }
 0x23a   : > { %v1583_v2 = vld [vmem:[#allocation2 + $0x3c] sm:$0x1]  ;;  %1642 = vst.msk [vmem:[#allocation2 + $0x38] sm:$0xf] %vm1628_vm10, %v1613_v53 }
 0x23b   : > { %v1584_v3 = vsel %vm3024_vm14, 0, %v1583_v2  ;;  %v1772_v10 = vld [vmem:[#allocation2 + $0x30] sm:$0x8]  ;;  %1718 = vst [vmem:[#allocation2 + $0x28] sm:$0xf] %v1717_v62  ;;  %v2415_v62 = vunpack.c.l.bf16 %v2441_v4 }
 0x23c   : > { %1585 = vst [vmem:[#allocation2 + $0x3c] sm:$0x1] %v1584_v3  ;;  %v1773_v55 = vsel %vm3112_vm7, 0, %v1772_v10 }
 0x23d   : > { %1644 = vst.msk [vmem:[#allocation2 + $0x3c] sm:$0xf] %vm1628_vm10, %v2494_v13 }
 0x23e   : > { %v1775_v19 = vld [vmem:[#allocation2 + $0x34] sm:$0x8]  ;;  %1733 = vst.msk [vmem:[#allocation2 + $0x3c] sm:$0xf] %vm3885_vm8, %v2494_v13 }
 0x23f   : > { %v1776_v32 = vsel %vm3112_vm7, 0, %v1775_v19  ;;  %1774 = vst [vmem:[#allocation2 + $0x30] sm:$0x8] %v1773_v55  ;;  %v1672_v42 = vpop.permute.xlu0 %1671  ;;  %v2416_v19 = vunpack.c.h.bf16 %v2441_v4 }
 0x240   : > { %1777 = vst [vmem:[#allocation2 + $0x34] sm:$0x8] %v1776_v32 }
 0x241   : > { %1721 = vst [vmem:[#allocation2 + $0x2c] sm:$0xf] %v1720_v41  ;;  %v1728_v40 = vld [vmem:[#allocation2 + $0x38] sm:$0xf] }
 0x242   : > { %v1766_v45 = vld [vmem:[#allocation2 + $0x28] sm:$0x8]  ;;  %v1729_v59 = vsel %vm3069_vm2, %v1672_v42, %v1728_v40 }
 0x243   : > { %v1767_v21 = vsel %vm3112_vm7, 0, %v1766_v45  ;;  %1730 = vst [vmem:[#allocation2 + $0x38] sm:$0xf] %v1729_v59 }
 0x244   : > { %1768 = vst [vmem:[#allocation2 + $0x28] sm:$0x8] %v1767_v21 }
 0x245   : > { %v1781_v13 = vld [vmem:[#allocation2 + $0x3c] sm:$0x8] }
 0x246   : > { %v1782_v6 = vsel %vm3112_vm7, 0, %v1781_v13 }
 0x247   : > { %v2405_v52 = vld [vmem:[#allocation2 + $0x30] sm:$0xff]  ;;  %1783 = vst [vmem:[#allocation2 + $0x3c] sm:$0x8] %v1782_v6 }
 0x248   : > { %v1769_v37 = vld [vmem:[#allocation2 + $0x2c] sm:$0x8]  ;;  %2376 = vmatmul.msk.bf16.vlgmr.msrb.gmra.mxu3 %vm1860_vm3, %v2405_v52 }
 0x249   : > { %v1770_v50 = vsel %vm3112_vm7, 0, %v1769_v37 }
 0x24a   : > { %1771 = vst [vmem:[#allocation2 + $0x2c] sm:$0x8] %v1770_v50  ;;  %v1778_v7 = vld [vmem:[#allocation2 + $0x38] sm:$0x8] }
 0x24b   : > { %v1779_v0 = vsel %vm3112_vm7, 0, %v1778_v7  ;;  %v1908_v36 = vpop.f32.mrf.mxu1  ;;  %vm2200_vm7 = vcmask 125952  }
 0x24c   : > { %1780 = vst [vmem:[#allocation2 + $0x38] sm:$0x8] %v1779_v0  ;;  %v1946_v24 = vmul.f32 %v3581_v5, %v1908_v36 }
 0x24e   : > { %v1966_v15 = vadd.f32 %v3595_v23, %v1946_v24 }
 0x250   : > { %v1982_v48 = vmax.f32 %v1966_v15, 0.0 }
 0x251   : > { %v2404_v35 = vld [vmem:[#allocation2 + $0x28] sm:$0xff] }
 0x252   : > { %2375 = vmatmul.msk.bf16.gmra.mxu1 %vm1860_vm3, %v2404_v35 }
 0x253   : > { %v1910_v28 = vpop.f32.mrf.mxu1  ;;  %v2406_v1 = vld [vmem:[#allocation2 + $0x38] sm:$0xff] }
 0x254   : > { %v1947_v38 = vmul.f32 %v3581_v5, %v1910_v28 }
 0x256   : > { %v1967_v27 = vadd.f32 %v3595_v23, %v1947_v38 }
 0x258   : > { %v1983_v14 = vmax.f32 %v1967_v27, 0.0  ;;  %2377 = vmatmul.msk.bf16.gmra.mxu3 %vm1860_vm3, %v2406_v1 }
 0x25a   : > { %v1996_v11 = vpack.c.bf16 %v1983_v14, %v1982_v48 }
 0x25c   : > { %2380 = vmatmul.msk.bf16.gmra.mxu2 %vm2003_vm11, %v1996_v11  ;;  %v2442_v11 = vld [vmem:[%s2569_s21 + $0x10] sm:$0xff]  }
 0x291   : > { %v2040_v47 = vpop.f32.mrf.mxu2  ;;  %v1913_v22 = vpop.f32.mrf.mxu1 }
 0x292   : > { %v2116_v16 = vmul.f32 %v3722_v60, %v2040_v47  ;;  %v1948_v39 = vmul.f32 %v3581_v5, %v1913_v22 }
 0x294   : > { %v2136_v51 = vadd.f32 %v3728_v46, %v2116_v16  ;;  %v1968_v49 = vadd.f32 %v3595_v23, %v1948_v39 }
 0x296   : > { %v2152_v20 = vadd.f32 %v2411_v25, %v2136_v51  ;;  %v1984_v8 = vmax.f32 %v1968_v49, 0.0  ;;  %v2419_v25 = vunpack.c.l.bf16 %v2442_v11 }
 0x298   : > { %v2168_v34 = vmax.f32 %v2152_v20, 0.0 }
 0x299   : > { %v2042_v58 = vpop.f32.mrf.mxu2  ;;  %v1915_v12 = vpop.f32.mrf.mxu1 }
 0x29a   : > { %v2184_v56 = vpack.c.bf16 %v2168_v34, %v2168_v34  ;;  %v2117_v31 = vmul.f32 %v3722_v60, %v2042_v58  ;;  %v1949_v61 = vmul.f32 %v3581_v5, %v1915_v12 }
 0x29c   : > { %2201 = vst.msk [vmem:[%s3738_s24] sm:$0xf] %vm2200_vm7, %v2184_v56  ;;  %v2137_v63 = vadd.f32 %v3728_v46, %v2117_v31  ;;  %v1969_v29 = vadd.f32 %v3595_v23, %v1949_v61 }
 0x29e   : > { %v2153_v44 = vadd.f32 %v2412_v33, %v2137_v63  ;;  %v1985_v57 = vmax.f32 %v1969_v29, 0.0  ;;  %v2420_v29 = vunpack.c.h.bf16 %v2442_v11 }
 0x2a0   : > { %v2169_v26 = vmax.f32 %v2153_v44, 0.0  ;;  %v1997_v9 = vpack.c.bf16 %v1985_v57, %v1984_v8 }
 0x2a2   : > { %v2185_v17 = vpack.c.bf16 %v2169_v26, %v2169_v26  ;;  %2381 = vmatmul.msk.bf16.gmra.mxu2 %vm2003_vm11, %v1997_v9 }
 0x2a4   : > { %2202 = vst.msk [vmem:[%s3738_s24 + $0x4] sm:$0xf] %vm2200_vm7, %v2185_v17 }
 0x2af   : > { %v2045_v18 = vpop.f32.mrf.mxu2 }
 0x2b0   : > { %v2118_v53 = vmul.f32 %v3722_v60, %v2045_v18 }
 0x2b2   : > { %v2138_v2 = vadd.f32 %v3728_v46, %v2118_v53 }
 0x2b4   : > { %v2154_v30 = vadd.f32 %v2415_v62, %v2138_v2  ;;  %v1918_v3 = vpop.f32.mrf.mxu1  ;;  %v2443_v2 = vld [vmem:[%s2569_s21 + $0x18] sm:$0xff]  }
 0x2b5   : > { %v1950_v32 = vmul.f32 %v3581_v5, %v1918_v3  ;;  %v2423_v3 = vunpack.c.l.bf16 %v2443_v2 }
 0x2b6   : > { %v2170_v10 = vmax.f32 %v2154_v30, 0.0 }
 0x2b7   : > { %v2047_v54 = vpop.f32.mrf.mxu2  ;;  %v1970_v59 = vadd.f32 %v3595_v23, %v1950_v32 }
 0x2b8   : > { %v2186_v55 = vpack.c.bf16 %v2170_v10, %v2170_v10  ;;  %v2119_v41 = vmul.f32 %v3722_v60, %v2047_v54 }
 0x2b9   : > { %v1986_v37 = vmax.f32 %v1970_v59, 0.0 }
 0x2ba   : > { %2203 = vst.msk [vmem:[%s3738_s24 + $0x8] sm:$0xf] %vm2200_vm7, %v2186_v55  ;;  %v2139_v42 = vadd.f32 %v3728_v46, %v2119_v41 }
 0x2bc   : > { %v2155_v40 = vadd.f32 %v2416_v19, %v2139_v42  ;;  %v1920_v45 = vpop.f32.mrf.mxu1  ;;  %v2424_v42 = vunpack.c.h.bf16 %v2443_v2 }
 0x2bd   : > { %v1951_v13 = vmul.f32 %v3581_v5, %v1920_v45 }
 0x2be   : > { %v2171_v21 = vmax.f32 %v2155_v40, 0.0 }
 0x2bf   : > { %v1971_v52 = vadd.f32 %v3595_v23, %v1951_v13 }
 0x2c0   : > { %v2187_v6 = vpack.c.bf16 %v2171_v21, %v2171_v21 }
 0x2c1   : > { %v1987_v50 = vmax.f32 %v1971_v52, 0.0 }
 0x2c2   : > { %2204 = vst.msk [vmem:[%s3738_s24 + $0xc] sm:$0xf] %vm2200_vm7, %v2187_v6  ;;  %v2444_v6 = vld [vmem:[%s2569_s21 + $0x20] sm:$0xff]  }
 0x2c3   : > { %v1998_v7 = vpack.c.bf16 %v1987_v50, %v1986_v37  ;;  %v2427_v37 = vunpack.c.l.bf16 %v2444_v6 }
 0x2c5   : > { %2382 = vmatmul.msk.bf16.gmra.mxu2 %vm2003_vm11, %v1998_v7 }
 0x2cb   : > { %v1928_v0 = vpop.f32.mrf.mxu3 }
 0x2cc   : > { %v1954_v39 = vmul.f32 %v3581_v5, %v1928_v0 }
 0x2ce   : > { %v1974_v61 = vadd.f32 %v3595_v23, %v1954_v39 }
 0x2cf   : > { %v1923_v36 = vpop.f32.mrf.mxu1 }
 0x2d0   : > { %v1952_v35 = vmul.f32 %v3581_v5, %v1923_v36  ;;  %v1990_v4 = vmax.f32 %v1974_v61, 0.0  ;;  %v2446_v61 = vld [vmem:[%s2569_s21 + $0x30] sm:$0xff]  }
 0x2d2   : > { %v1972_v15 = vadd.f32 %v3595_v23, %v1952_v35 }
 0x2d3   : > { %v1930_v24 = vpop.f32.mrf.mxu3 }
 0x2d4   : > { %v1988_v48 = vmax.f32 %v1972_v15, 0.0  ;;  %v1955_v51 = vmul.f32 %v3581_v5, %v1930_v24 }
 0x2d6   : > { %v1975_v56 = vadd.f32 %v3595_v23, %v1955_v51 }
 0x2d7   : > { %v1925_v28 = vpop.f32.mrf.mxu1 }
 0x2d8   : > { %v1953_v38 = vmul.f32 %v3581_v5, %v1925_v28  ;;  %v1991_v9 = vmax.f32 %v1975_v56, 0.0  ;;  %v2428_v28 = vunpack.c.h.bf16 %v2444_v6 }
 0x2da   : > { %v1973_v1 = vadd.f32 %v3595_v23, %v1953_v38  ;;  %v2000_v62 = vpack.c.bf16 %v1991_v9, %v1990_v4 }
 0x2db   : > { %v1933_v27 = vpop.f32.mrf.mxu3 }
 0x2dc   : > { %v1989_v14 = vmax.f32 %v1973_v1, 0.0  ;;  %v1956_v22 = vmul.f32 %v3581_v5, %v1933_v27 }
 0x2de   : > { %v1999_v43 = vpack.c.bf16 %v1989_v14, %v1988_v48  ;;  %v1976_v58 = vadd.f32 %v3595_v23, %v1956_v22  ;;  %v2445_v14 = vld [vmem:[%s2569_s21 + $0x28] sm:$0xff]  }
 0x2df   : > { %v2050_v47 = vpop.f32.mrf.mxu2  ;;  %v2432_v39 = vunpack.c.h.bf16 %v2445_v14 }
 0x2e0   : > { %2383 = vmatmul.msk.bf16.gmra.mxu2 %vm2003_vm11, %v1999_v43  ;;  %v2120_v16 = vmul.f32 %v3722_v60, %v2050_v47  ;;  %v1992_v8 = vmax.f32 %v1976_v58, 0.0  ;;  %v2431_v43 = vunpack.c.l.bf16 %v2445_v14  ;;  %v2447_v58 = vld [vmem:[%s2569_s21 + $0x38] sm:$0xff]  }
 0x2e2   : > { %v2140_v20 = vadd.f32 %v3728_v46, %v2120_v16 }
 0x2e3   : > { %v1935_v34 = vpop.f32.mrf.mxu3 }
 0x2e4   : > { %v2156_v33 = vadd.f32 %v2419_v25, %v2140_v20  ;;  %v1957_v12 = vmul.f32 %v3581_v5, %v1935_v34 }
 0x2e6   : > { %v2172_v49 = vmax.f32 %v2156_v33, 0.0  ;;  %v1977_v31 = vadd.f32 %v3595_v23, %v1957_v12 }
 0x2e7   : > { %v2052_v63 = vpop.f32.mrf.mxu2 }
 0x2e8   : > { %v2188_v44 = vpack.c.bf16 %v2172_v49, %v2172_v49  ;;  %v1993_v57 = vmax.f32 %v1977_v31, 0.0  ;;  %v2121_v26 = vmul.f32 %v3722_v60, %v2052_v63  ;;  %v2439_v49 = vunpack.c.l.bf16 %v2447_v58 }
 0x2ea   : > { %2205 = vst.msk [vmem:[%s3738_s24 + $0x10] sm:$0xf] %vm2200_vm7, %v2188_v44  ;;  %v2001_v5 = vpack.c.bf16 %v1993_v57, %v1992_v8  ;;  %v2141_v17 = vadd.f32 %v3728_v46, %v2121_v26  ;;  %v2435_v57 = vunpack.c.l.bf16 %v2446_v61 }
 0x2ec   : > { %v2157_v18 = vadd.f32 %v2420_v29, %v2141_v17  ;;  %2385 = vmatmul.msk.bf16.vlgmr.msra.gmra.mxu3 %vm2003_vm11, %v2001_v5 }
 0x2ee   : > { %v2173_v23 = vmax.f32 %v2157_v18, 0.0 }
 0x2f0   : > { %v2189_v53 = vpack.c.bf16 %v2173_v23, %v2173_v23  ;;  %2384 = vmatmul.msk.bf16.gmra.mxu2 %vm2003_vm11, %v2000_v62  ;;  %v2440_v62 = vunpack.c.h.bf16 %v2447_v58 }
 0x2f2   : > { %2206 = vst.msk [vmem:[%s3738_s24 + $0x14] sm:$0xf] %vm2200_vm7, %v2189_v53 }
 0x325   : > { %v2055_v30 = vpop.f32.mrf.mxu2 }
 0x326   : > { %v2122_v10 = vmul.f32 %v3722_v60, %v2055_v30 }
 0x328   : > { %v2142_v54 = vadd.f32 %v3728_v46, %v2122_v10 }
 0x32a   : > { %v2158_v55 = vadd.f32 %v2423_v3, %v2142_v54  ;;  %v2436_v54 = vunpack.c.h.bf16 %v2446_v61 }
 0x32c   : > { %v2174_v19 = vmax.f32 %v2158_v55, 0.0 }
 0x32d   : > { %v2057_v41 = vpop.f32.mrf.mxu2 }
 0x32e   : > { %v2190_v32 = vpack.c.bf16 %v2174_v19, %v2174_v19  ;;  %v2123_v40 = vmul.f32 %v3722_v60, %v2057_v41 }
 0x330   : > { %2207 = vst.msk [vmem:[%s3738_s24 + $0x18] sm:$0xf] %vm2200_vm7, %v2190_v32  ;;  %v2143_v45 = vadd.f32 %v3728_v46, %v2123_v40 }
 0x332   : > { %v2159_v59 = vadd.f32 %v2424_v42, %v2143_v45 }
 0x334   : > { %v2175_v21 = vmax.f32 %v2159_v59, 0.0 }
 0x336   : > { %v2191_v13 = vpack.c.bf16 %v2175_v21, %v2175_v21 }
 0x338   : > { %2208 = vst.msk [vmem:[%s3738_s24 + $0x1c] sm:$0xf] %vm2200_vm7, %v2191_v13 }
 0x348   : > { %v2060_v52 = vpop.f32.mrf.mxu2 }
 0x349   : > { %v2124_v50 = vmul.f32 %v3722_v60, %v2060_v52 }
 0x34b   : > { %v2144_v7 = vadd.f32 %v3728_v46, %v2124_v50 }
 0x34d   : > { %v2160_v0 = vadd.f32 %v2427_v37, %v2144_v7 }
 0x34f   : > { %v2176_v36 = vmax.f32 %v2160_v0, 0.0 }
 0x350   : > { %v2062_v24 = vpop.f32.mrf.mxu2 }
 0x351   : > { %v2192_v35 = vpack.c.bf16 %v2176_v36, %v2176_v36  ;;  %v2125_v15 = vmul.f32 %v3722_v60, %v2062_v24 }
 0x353   : > { %2209 = vst.msk [vmem:[%s3738_s24 + $0x20] sm:$0xf] %vm2200_vm7, %v2192_v35  ;;  %v2145_v38 = vadd.f32 %v3728_v46, %v2125_v15 }
 0x355   : > { %v2161_v1 = vadd.f32 %v2428_v28, %v2145_v38 }
 0x357   : > { %v2177_v27 = vmax.f32 %v2161_v1, 0.0 }
 0x359   : > { %v2193_v48 = vpack.c.bf16 %v2177_v27, %v2177_v27 }
 0x35b   : > { %2210 = vst.msk [vmem:[%s3738_s24 + $0x24] sm:$0xf] %vm2200_vm7, %v2193_v48 }
 0x363   : > { %v2065_v11 = vpop.f32.mrf.mxu2 }
 0x364   : > { %v2126_v47 = vmul.f32 %v3722_v60, %v2065_v11 }
 0x366   : > { %v2146_v22 = vadd.f32 %v3728_v46, %v2126_v47 }
 0x368   : > { %v2162_v25 = vadd.f32 %v2431_v43, %v2146_v22 }
 0x36a   : > { %v2178_v16 = vmax.f32 %v2162_v25, 0.0 }
 0x36b   : > { %v2067_v51 = vpop.f32.mrf.mxu2 }
 0x36c   : > { %v2194_v20 = vpack.c.bf16 %v2178_v16, %v2178_v16  ;;  %v2127_v34 = vmul.f32 %v3722_v60, %v2067_v51 }
 0x36e   : > { %2211 = vst.msk [vmem:[%s3738_s24 + $0x28] sm:$0xf] %vm2200_vm7, %v2194_v20  ;;  %v2147_v33 = vadd.f32 %v3728_v46, %v2127_v34 }
 0x36f   : > { %v2075_v12 = vpop.f32.mrf.mxu3 }
 0x370   : > { %v2163_v56 = vadd.f32 %v2432_v39, %v2147_v33  ;;  %v2130_v31 = vmul.f32 %v3722_v60, %v2075_v12 }
 0x372   : > { %v2179_v63 = vmax.f32 %v2163_v56, 0.0  ;;  %v2150_v29 = vadd.f32 %v3728_v46, %v2130_v31 }
 0x373   : > { %v2070_v8 = vpop.f32.mrf.mxu2 }
 0x374   : > { %v2195_v44 = vpack.c.bf16 %v2179_v63, %v2179_v63  ;;  %v2128_v26 = vmul.f32 %v3722_v60, %v2070_v8  ;;  %v2166_v9 = vadd.f32 %v2439_v49, %v2150_v29 }
 0x376   : > { %2212 = vst.msk [vmem:[%s3738_s24 + $0x2c] sm:$0xf] %vm2200_vm7, %v2195_v44  ;;  %v2148_v5 = vadd.f32 %v3728_v46, %v2128_v26  ;;  %v2182_v17 = vmax.f32 %v2166_v9, 0.0 }
 0x377   : > { %v2077_v4 = vpop.f32.mrf.mxu3 }
 0x378   : > { %v2164_v18 = vadd.f32 %v2435_v57, %v2148_v5  ;;  %v2198_v23 = vpack.c.bf16 %v2182_v17, %v2182_v17  ;;  %v2131_v53 = vmul.f32 %v3722_v60, %v2077_v4 }
 0x37a   : > { %v2180_v2 = vmax.f32 %v2164_v18, 0.0  ;;  %2215 = vst.msk [vmem:[%s3738_s24 + $0x38] sm:$0xf] %vm2200_vm7, %v2198_v23  ;;  %v2151_v30 = vadd.f32 %v3728_v46, %v2131_v53 }
 0x37b   : > { %v2072_v3 = vpop.f32.mrf.mxu2 }
 0x37c   : > { %v2196_v10 = vpack.c.bf16 %v2180_v2, %v2180_v2  ;;  %v2129_v55 = vmul.f32 %v3722_v60, %v2072_v3  ;;  %v2167_v19 = vadd.f32 %v2440_v62, %v2151_v30 }
 0x37e   : > { %2213 = vst.msk [vmem:[%s3738_s24 + $0x30] sm:$0xf] %vm2200_vm7, %v2196_v10  ;;  %v2149_v41 = vadd.f32 %v3728_v46, %v2129_v55  ;;  %v2183_v32 = vmax.f32 %v2167_v19, 0.0 }
 0x380   : > { %v2165_v42 = vadd.f32 %v2436_v54, %v2149_v41  ;;  %v2199_v40 = vpack.c.bf16 %v2183_v32, %v2183_v32 }
 0x382   : > { %v2181_v45 = vmax.f32 %v2165_v42, 0.0  ;;  %2216 = vst.msk [vmem:[%s3738_s24 + $0x3c] sm:$0xf] %vm2200_vm7, %v2199_v40 }
 0x384   : > { %v2197_v59 = vpack.c.bf16 %v2181_v45, %v2181_v45 }
 0x386   : > { %2214 = vst.msk [vmem:[%s3738_s24 + $0x34] sm:$0xf] %vm2200_vm7, %v2197_v59 }
 0x387 PF: > { %s20_s13 = sadd.s32 1, %s2484_s13  }
 0x388   : > { %p17_p4 = scmp.ge.s32.totalorder %s20_s13, 4  }
 0x38a   :  { %19 = sbr.rel (!%p17_p4) target bundleno = 1 (0x1), region = 92 }

</bundles_post_ra>
